<compile_context>
chip_gen: v6e
topology: v6e:2x2x1
jax: 0.10.0
libtpu: 0.0.40
codegen_flags: <defaults>
</compile_context>

<pallas_src>
import numpy as np
import jax
import jax.numpy as jnp
from jax import lax
from jax.experimental import pallas as pl
from jax.experimental.pallas import tpu as pltpu


# ----------------------------------------------------------------------------
# Pallas kernel
# ----------------------------------------------------------------------------
def _make_kernel(H, W, cins, couts, img_sz):
    """cins/couts = fused per-layer channel counts (tl+br branches fused)."""
    PW = W + 2                     # padded row width (zero column on each side)
    LP = H * PW                    # flattened padded-row spatial extent (lanes)
    OFF = PW + 1                   # leading zero strip (covers oy=-1, ox=-1 tap)
    FL = OFF + LP + OFF            # full buffer lane length
    inv = 1.0 / float(img_sz)
    cbuf = max(couts)

    def kernel(x_ref, mask_ref, red_ref,
               w1, b1, w2, b2, w3, b3, w4, b4, w5, b5,
               out_ref, buf_ref):
        w_refs = (w1, w2, w3, w4)
        b_refs = (b1, b2, b3, b4)

        # Zero only the flat top/bottom strips of the activation buffer; the
        # interleaved pad columns are maintained by the per-layer valid mask
        # and the interior is fully rewritten before every read.
        buf_ref[:, 0:OFF] = jnp.zeros((cbuf, OFF), jnp.bfloat16)
        buf_ref[:, OFF + LP:FL] = jnp.zeros((cbuf, FL - OFF - LP), jnp.bfloat16)

        mask = mask_ref[...]                                   # (1, LP) f32

        a = None
        for li in range(4):
            cin, cout = cins[li], couts[li]
            acc = None
            # 9 taps: each operand is a statically shifted lane slice.
            for tap in range(9):
                oy, ox = tap // 3 - 1, tap % 3 - 1
                start = OFF + oy * PW + ox
                if li == 0:
                    rhs = x_ref[0, :, start:start + LP]        # (cin, LP) bf16
                else:
                    rhs = buf_ref[0:cin, start:start + LP]     # (cin, LP) bf16
                p = jnp.dot(w_refs[li][tap], rhs,
                            preferred_element_type=jnp.float32)
                acc = p if acc is None else acc + p            # (cout, LP) f32
            # bias (BN folded) + ReLU, then re-zero the pad columns.
            act = jnp.maximum(acc + b_refs[li][...], 0.0) * mask
            a = act.astype(jnp.bfloat16)                       # (cout, LP)
            if li < 3:
                buf_ref[0:cout, OFF:OFF + LP] = a

        # fused 1x1 head: row 0 = tl score, row 1 = br score
        score = jnp.dot(w5[...], a,
                        preferred_element_type=jnp.float32) + b5[...]   # (2, LP)

        # vectorized soft-argmax: pad columns have zero weight in `red`.
        m = jnp.max(score, axis=1, keepdims=True)              # (2, 1)
        e = jnp.exp(score - m)                                 # (2, LP)
        st = jnp.dot(e, red_ref[...],
                     preferred_element_type=jnp.float32)       # (2, 3)
        exy = st[:, 1:3] / st[:, 0:1]                          # rows [tl; br] -> (x, y)
        row = jnp.concatenate([exy[0:1, :], exy[1:2, :]], axis=1) * inv   # (1, 4)
        out_ref[...] = row.reshape(1, 1, 4)

    return kernel


# ----------------------------------------------------------------------------
# Parameter initialization (deterministic, synthetic) — eval-mode BN folded
# ----------------------------------------------------------------------------
def init_params(key, inplanes, channel):
    """Per branch: 4x (3x3 conv + eval-mode BN folded) + 1x 1x1 conv."""
    chans = [inplanes, channel, channel // 2, channel // 4, channel // 8]
    eps = 1e-5
    branches = []
    for _ in range(2):                      # tl branch, br branch
        layers = []
        for i in range(4):
            cin, cout = chans[i], chans[i + 1]
            key, k1, k2, k3, k4, k5, k6 = jax.random.split(key, 7)
            w = jax.random.normal(k1, (3, 3, cin, cout), jnp.float32) / np.sqrt(9 * cin)
            b = 0.1 * jax.random.normal(k2, (cout,), jnp.float32)
            gamma = 1.0 + 0.1 * jax.random.normal(k3, (cout,), jnp.float32)
            beta = 0.1 * jax.random.normal(k4, (cout,), jnp.float32)
            mean = 0.1 * jax.random.normal(k5, (cout,), jnp.float32)
            var = 1.0 + 0.2 * jax.random.uniform(k6, (cout,), jnp.float32)
            scale = gamma / jnp.sqrt(var + eps)
            w_f = w * scale                              # fold BN into weights
            b_f = (b - mean) * scale + beta              # fold BN into bias
            layers.append((w_f, b_f))
        cin = chans[4]
        key, k1, k2 = jax.random.split(key, 3)
        w5 = jax.random.normal(k1, (1, 1, cin, 1), jnp.float32) / np.sqrt(cin)
        b5 = 0.1 * jax.random.normal(k2, (1,), jnp.float32)
        layers.append((w5, b5))
        branches.append(layers)
    return branches


# ----------------------------------------------------------------------------
# Wrapper around pallas_call
# ----------------------------------------------------------------------------
def corner_predictor_pallas(x_nchw, params, feat_sz, stride):
    B, inplanes, H, W = x_nchw.shape
    assert H == feat_sz and W == feat_sz
    img_sz = feat_sz * stride
    PW = W + 2
    LP = H * PW
    OFF = PW + 1
    FL = OFF + LP + OFF

    tl, br = params
    channel = tl[0][0].shape[3]                       # per-branch conv1 cout
    cins = [inplanes, 2 * channel, channel, channel // 2]        # fused Cin
    couts = [2 * channel, channel, channel // 2, channel // 4]   # fused Cout

    # ---- fused, transposed, per-tap weight packs: (9, cout_f, cin_f) bf16 ----
    flat = []
    for li in range(4):
        w_t, b_t = tl[li]
        w_b, b_b = br[li]
        _, _, cin, cout = w_t.shape
        if li == 0:
            wf = jnp.concatenate([w_t, w_b], axis=3)          # (3,3,cin,2cout)
            wf = wf.reshape(9, cin, 2 * cout)
        else:
            wf = jnp.zeros((3, 3, 2 * cin, 2 * cout), jnp.float32)
            wf = wf.at[:, :, 0:cin, 0:cout].set(w_t)
            wf = wf.at[:, :, cin:, cout:].set(w_b)
            wf = wf.reshape(9, 2 * cin, 2 * cout)
        wf = jnp.transpose(wf, (0, 2, 1))                     # (9, cout_f, cin_f)
        bf = jnp.concatenate([b_t, b_b]).reshape(-1, 1)       # (cout_f, 1)
        flat += [wf.astype(jnp.bfloat16), bf.astype(jnp.float32)]

    # fused 1x1 head: (2, 2*c_head) block-structured, row 0 = tl, row 1 = br
    w5_t, b5_t = tl[4]
    w5_b, b5_b = br[4]
    c_head = w5_t.shape[2]
    w5 = jnp.zeros((2, 2 * c_head), jnp.float32)
    w5 = w5.at[0, 0:c_head].set(w5_t.reshape(c_head))
    w5 = w5.at[1, c_head:].set(w5_b.reshape(c_head))
    b5 = jnp.concatenate([b5_t, b5_b]).reshape(2, 1)
    flat += [w5.astype(jnp.bfloat16), b5.astype(jnp.float32)]

    # ---- input in padded-flat layout: (B, Cin, FL) bf16, zeros at all pads ----
    x = x_nchw.astype(jnp.float32)
    xp = jnp.pad(x, ((0, 0), (0, 0), (0, 0), (1, 1)))         # (B,C,H,W+2)
    xp = xp.reshape(B, inplanes, LP)
    xp = jnp.pad(xp, ((0, 0), (0, 0), (OFF, OFF)))            # (B,C,FL)
    xp = xp.astype(jnp.bfloat16)

    # ---- constants: per-position valid mask and reduction matrix ----
    d = np.arange(LP)
    xcol = d % PW
    yrow = d // PW
    valid = ((xcol >= 1) & (xcol <= W)).astype(np.float32)
    coord_x = (xcol - 1).astype(np.float32) * stride
    coord_y = yrow.astype(np.float32) * stride
    mask = jnp.asarray(valid.reshape(1, LP), jnp.float32)                 # (1, LP)
    red = jnp.asarray(np.stack([valid, valid * coord_x, valid * coord_y],
                               axis=1), jnp.float32)                      # (LP, 3)

    def full_spec(shape):
        n = len(shape)
        return pl.BlockSpec(shape, lambda b, n=n: (0,) * n)

    in_specs = [pl.BlockSpec((1, inplanes, FL), lambda b: (b, 0, 0)),
                full_spec((1, LP)), full_spec((LP, 3))]
    in_specs += [full_spec(tuple(p.shape)) for p in flat]

    grid_spec = pltpu.PrefetchScalarGridSpec(
        num_scalar_prefetch=0,
        grid=(B,),                                   # one batch element / step
        in_specs=in_specs,
        out_specs=pl.BlockSpec((1, 1, 4), lambda b: (b, 0, 0)),
        scratch_shapes=[pltpu.VMEM((max(couts), FL), jnp.bfloat16)],
    )

    conv_flops = sum(9 * ci * co for ci, co in zip(cins, couts)) + 2 * couts[-1]
    flops = int(2 * B * LP * (conv_flops + 2 * 3))
    bytes_accessed = int(sum(int(a.size) * a.dtype.itemsize
                             for a in ([xp, mask, red] + flat)) + B * 4 * 4)
    cost = pl.CostEstimate(flops=flops,
                           transcendentals=int(2 * B * LP),
                           bytes_accessed=bytes_accessed)

    kernel = _make_kernel(H, W, cins, couts, img_sz)
    out = pl.pallas_call(
        kernel,
        out_shape=jax.ShapeDtypeStruct((B, 1, 4), jnp.float32),
        grid_spec=grid_spec,
        compiler_params=pltpu.CompilerParams(
            dimension_semantics=("parallel",),
            vmem_limit_bytes=32 * 1024 * 1024),
        cost_estimate=cost,
    )(xp, mask, red, *flat)
    return out.reshape(B, 4)                                              # (B, 4)


# ----------------------------------------------------------------------------
# Pure-JAX reference (unfused, for validation only)
# ----------------------------------------------------------------------------
def corner_predictor_reference(x_nchw, params, feat_sz, stride):
    img_sz = feat_sz * stride
    x = jnp.transpose(x_nchw, (0, 2, 3, 1)).astype(jnp.float32)
    B = x.shape[0]
    k = jnp.arange(feat_sz * feat_sz)
    cx = ((k % feat_sz) * stride).astype(jnp.float32)
    cy = ((k // feat_sz) * stride).astype(jnp.float32)
    cols = []
    for layers in params:
        a = x
        for (w, b) in layers[:4]:
            a = lax.conv_general_dilated(
                a, w, window_strides=(1, 1), padding="SAME",
                dimension_numbers=("NHWC", "HWIO", "NHWC"))
            a = jnp.maximum(a + b.reshape(1, 1, 1, -1), 0.0)
        w5, b5 = layers[4]
        s = lax.conv_general_dilated(
            a, w5, window_strides=(1, 1), padding="SAME",
            dimension_numbers=("NHWC", "HWIO", "NHWC")) + b5.reshape(1, 1, 1, -1)
        sv = s.reshape(B, feat_sz * feat_sz)
        prob = jax.nn.softmax(sv, axis=1)
        cols.append(jnp.sum(cx[None, :] * prob, axis=1))
        cols.append(jnp.sum(cy[None, :] * prob, axis=1))
    return jnp.stack(cols, axis=1) / img_sz


# ----------------------------------------------------------------------------
if __name__ == "__main__":
    B, inplanes, channel, feat_sz, stride = 2, 4, 32, 16, 16

    key = jax.random.PRNGKey(0)
    key, kx, kp = jax.random.split(key, 3)
    x = jax.random.normal(kx, (B, inplanes, feat_sz, feat_sz), jnp.float32)
    params = init_params(kp, inplanes, channel)

    out = jax.block_until_ready(corner_predictor_pallas(x, params, feat_sz, stride))
    ref = jax.block_until_ready(corner_predictor_reference(x, params, feat_sz, stride))

    assert out.shape == (B, 4)
    np.testing.assert_allclose(np.asarray(out), np.asarray(ref), atol=2e-2, rtol=0)
    print("KERNEL_OK")
</pallas_src>

<mosaic_0001>
module attributes {stable_mosaic.version = 11 : i64} {
  func.func @kernel(%arg0: i32, %arg1: memref<1x4x326xbf16, #tpu.memory_space<vmem>>, %arg2: memref<1x288xf32, #tpu.memory_space<vmem>>, %arg3: memref<288x3xf32, #tpu.memory_space<vmem>>, %arg4: memref<9x64x4xbf16, #tpu.memory_space<vmem>>, %arg5: memref<64x1xf32, #tpu.memory_space<vmem>>, %arg6: memref<9x32x64xbf16, #tpu.memory_space<vmem>>, %arg7: memref<32x1xf32, #tpu.memory_space<vmem>>, %arg8: memref<9x16x32xbf16, #tpu.memory_space<vmem>>, %arg9: memref<16x1xf32, #tpu.memory_space<vmem>>, %arg10: memref<9x8x16xbf16, #tpu.memory_space<vmem>>, %arg11: memref<8x1xf32, #tpu.memory_space<vmem>>, %arg12: memref<2x8xbf16, #tpu.memory_space<vmem>>, %arg13: memref<2x1xf32, #tpu.memory_space<vmem>>, %arg14: memref<1x1x4xf32, #tpu.memory_space<vmem>>, %arg15: memref<64x326xbf16, #tpu.memory_space<vmem>>) attributes {dimension_semantics = [#tpu.dimension_semantics<parallel>], iteration_bounds = array<i64: 2>, scalar_prefetch = 0 : i64, scratch_operands = 1 : i64, tpu.core_type = #tpu.core_type<tc>, window_params = [{transform_indices = @transform_0, window_bounds = array<i64: 1, 4, 326>}, {pipeline_mode = #tpu.pipeline_mode<synchronous>, transform_indices = @transform_1, window_bounds = array<i64: 1, 288>}, {pipeline_mode = #tpu.pipeline_mode<synchronous>, transform_indices = @transform_2, window_bounds = array<i64: 288, 3>}, {pipeline_mode = #tpu.pipeline_mode<synchronous>, transform_indices = @transform_3, window_bounds = array<i64: 9, 64, 4>}, {pipeline_mode = #tpu.pipeline_mode<synchronous>, transform_indices = @transform_4, window_bounds = array<i64: 64, 1>}, {pipeline_mode = #tpu.pipeline_mode<synchronous>, transform_indices = @transform_5, window_bounds = array<i64: 9, 32, 64>}, {pipeline_mode = #tpu.pipeline_mode<synchronous>, transform_indices = @transform_6, window_bounds = array<i64: 32, 1>}, {pipeline_mode = #tpu.pipeline_mode<synchronous>, transform_indices = @transform_7, window_bounds = array<i64: 9, 16, 32>}, {pipeline_mode = #tpu.pipeline_mode<synchronous>, transform_indices = @transform_8, window_bounds = array<i64: 16, 1>}, {pipeline_mode = #tpu.pipeline_mode<synchronous>, transform_indices = @transform_9, window_bounds = array<i64: 9, 8, 16>}, {pipeline_mode = #tpu.pipeline_mode<synchronous>, transform_indices = @transform_10, window_bounds = array<i64: 8, 1>}, {pipeline_mode = #tpu.pipeline_mode<synchronous>, transform_indices = @transform_11, window_bounds = array<i64: 2, 8>}, {pipeline_mode = #tpu.pipeline_mode<synchronous>, transform_indices = @transform_12, window_bounds = array<i64: 2, 1>}, {transform_indices = @transform_13, window_bounds = array<i64: 1, 1, 4>}]} {
    %cst = arith.constant 0.000000e+00 : bf16
    %0 = vector.broadcast %cst : bf16 to vector<64x19xbf16>
    %c0 = arith.constant 0 : index
    %c0_0 = arith.constant 0 : index
    %1 = vector.load %arg15[%c0, %c0_0] : memref<64x326xbf16, #tpu.memory_space<vmem>>, vector<64x19xbf16>
    tpu.vector_store %arg15[%c0, %c0_0], %0 {strides = array<i32>} : memref<64x326xbf16, #tpu.memory_space<vmem>>, vector<64x19xbf16>,
    %cst_1 = arith.constant 0.000000e+00 : bf16
    %2 = vector.broadcast %cst_1 : bf16 to vector<64x19xbf16>
    %c0_2 = arith.constant 0 : index
    %c307 = arith.constant 307 : index
    %3 = vector.load %arg15[%c0_2, %c307] : memref<64x326xbf16, #tpu.memory_space<vmem>>, vector<64x19xbf16>
    tpu.vector_store %arg15[%c0_2, %c307], %2 {strides = array<i32>} : memref<64x326xbf16, #tpu.memory_space<vmem>>, vector<64x19xbf16>,
    %c0_3 = arith.constant 0 : index
    %c0_4 = arith.constant 0 : index
    %4 = vector.load %arg2[%c0_3, %c0_4] : memref<1x288xf32, #tpu.memory_space<vmem>>, vector<1x288xf32>
    %c0_5 = arith.constant 0 : index
    %c0_6 = arith.constant 0 : index
    %c0_7 = arith.constant 0 : index
    %5 = vector.load %arg1[%c0_5, %c0_6, %c0_7] : memref<1x4x326xbf16, #tpu.memory_space<vmem>>, vector<1x4x288xbf16>
    %6 = vector.shape_cast %5 : vector<1x4x288xbf16> to vector<4x288xbf16>
    %c0_8 = arith.constant 0 : index
    %c0_9 = arith.constant 0 : index
    %c0_10 = arith.constant 0 : index
    %7 = vector.load %arg4[%c0_8, %c0_9, %c0_10] : memref<9x64x4xbf16, #tpu.memory_space<vmem>>, vector<1x64x4xbf16>
    %8 = vector.shape_cast %7 : vector<1x64x4xbf16> to vector<64x4xbf16>
    %cst_11 = arith.constant dense<0.000000e+00> : vector<64x288xf32>
    %9 = tpu.matmul %8, %6, %cst_11 {dimension_numbers = #tpu.dot_dimension_numbers<[1], [0], [0], [1], [0, 0, 1, 1], [], []>} : vector<64x4xbf16>, vector<4x288xbf16>, vector<64x288xf32> -> vector<64x288xf32>
    %c0_12 = arith.constant 0 : index
    %c0_13 = arith.constant 0 : index
    %c1 = arith.constant 1 : index
    %10 = vector.load %arg1[%c0_12, %c0_13, %c1] : memref<1x4x326xbf16, #tpu.memory_space<vmem>>, vector<1x4x288xbf16>
    %11 = vector.shape_cast %10 : vector<1x4x288xbf16> to vector<4x288xbf16>
    %c1_14 = arith.constant 1 : index
    %c0_15 = arith.constant 0 : index
    %c0_16 = arith.constant 0 : index
    %12 = vector.load %arg4[%c1_14, %c0_15, %c0_16] : memref<9x64x4xbf16, #tpu.memory_space<vmem>>, vector<1x64x4xbf16>
    %13 = vector.shape_cast %12 : vector<1x64x4xbf16> to vector<64x4xbf16>
    %cst_17 = arith.constant dense<0.000000e+00> : vector<64x288xf32>
    %14 = tpu.matmul %13, %11, %cst_17 {dimension_numbers = #tpu.dot_dimension_numbers<[1], [0], [0], [1], [0, 0, 1, 1], [], []>} : vector<64x4xbf16>, vector<4x288xbf16>, vector<64x288xf32> -> vector<64x288xf32>
    %15 = arith.addf %9, %14 : vector<64x288xf32>
    %c0_18 = arith.constant 0 : index
    %c0_19 = arith.constant 0 : index
    %c2 = arith.constant 2 : index
    %16 = vector.load %arg1[%c0_18, %c0_19, %c2] : memref<1x4x326xbf16, #tpu.memory_space<vmem>>, vector<1x4x288xbf16>
    %17 = vector.shape_cast %16 : vector<1x4x288xbf16> to vector<4x288xbf16>
    %c2_20 = arith.constant 2 : index
    %c0_21 = arith.constant 0 : index
    %c0_22 = arith.constant 0 : index
    %18 = vector.load %arg4[%c2_20, %c0_21, %c0_22] : memref<9x64x4xbf16, #tpu.memory_space<vmem>>, vector<1x64x4xbf16>
    %19 = vector.shape_cast %18 : vector<1x64x4xbf16> to vector<64x4xbf16>
    %cst_23 = arith.constant dense<0.000000e+00> : vector<64x288xf32>
    %20 = tpu.matmul %19, %17, %cst_23 {dimension_numbers = #tpu.dot_dimension_numbers<[1], [0], [0], [1], [0, 0, 1, 1], [], []>} : vector<64x4xbf16>, vector<4x288xbf16>, vector<64x288xf32> -> vector<64x288xf32>
    %21 = arith.addf %15, %20 : vector<64x288xf32>
    %c0_24 = arith.constant 0 : index
    %c0_25 = arith.constant 0 : index
    %c18 = arith.constant 18 : index
    %22 = vector.load %arg1[%c0_24, %c0_25, %c18] : memref<1x4x326xbf16, #tpu.memory_space<vmem>>, vector<1x4x288xbf16>
    %23 = vector.shape_cast %22 : vector<1x4x288xbf16> to vector<4x288xbf16>
    %c3 = arith.constant 3 : index
    %c0_26 = arith.constant 0 : index
    %c0_27 = arith.constant 0 : index
    %24 = vector.load %arg4[%c3, %c0_26, %c0_27] : memref<9x64x4xbf16, #tpu.memory_space<vmem>>, vector<1x64x4xbf16>
    %25 = vector.shape_cast %24 : vector<1x64x4xbf16> to vector<64x4xbf16>
    %cst_28 = arith.constant dense<0.000000e+00> : vector<64x288xf32>
    %26 = tpu.matmul %25, %23, %cst_28 {dimension_numbers = #tpu.dot_dimension_numbers<[1], [0], [0], [1], [0, 0, 1, 1], [], []>} : vector<64x4xbf16>, vector<4x288xbf16>, vector<64x288xf32> -> vector<64x288xf32>
    %27 = arith.addf %21, %26 : vector<64x288xf32>
    %c0_29 = arith.constant 0 : index
    %c0_30 = arith.constant 0 : index
    %c19 = arith.constant 19 : index
    %28 = vector.load %arg1[%c0_29, %c0_30, %c19] : memref<1x4x326xbf16, #tpu.memory_space<vmem>>, vector<1x4x288xbf16>
    %29 = vector.shape_cast %28 : vector<1x4x288xbf16> to vector<4x288xbf16>
    %c4 = arith.constant 4 : index
    %c0_31 = arith.constant 0 : index
    %c0_32 = arith.constant 0 : index
    %30 = vector.load %arg4[%c4, %c0_31, %c0_32] : memref<9x64x4xbf16, #tpu.memory_space<vmem>>, vector<1x64x4xbf16>
    %31 = vector.shape_cast %30 : vector<1x64x4xbf16> to vector<64x4xbf16>
    %cst_33 = arith.constant dense<0.000000e+00> : vector<64x288xf32>
    %32 = tpu.matmul %31, %29, %cst_33 {dimension_numbers = #tpu.dot_dimension_numbers<[1], [0], [0], [1], [0, 0, 1, 1], [], []>} : vector<64x4xbf16>, vector<4x288xbf16>, vector<64x288xf32> -> vector<64x288xf32>
    %33 = arith.addf %27, %32 : vector<64x288xf32>
    %c0_34 = arith.constant 0 : index
    %c0_35 = arith.constant 0 : index
    %c20 = arith.constant 20 : index
    %34 = vector.load %arg1[%c0_34, %c0_35, %c20] : memref<1x4x326xbf16, #tpu.memory_space<vmem>>, vector<1x4x288xbf16>
    %35 = vector.shape_cast %34 : vector<1x4x288xbf16> to vector<4x288xbf16>
    %c5 = arith.constant 5 : index
    %c0_36 = arith.constant 0 : index
    %c0_37 = arith.constant 0 : index
    %36 = vector.load %arg4[%c5, %c0_36, %c0_37] : memref<9x64x4xbf16, #tpu.memory_space<vmem>>, vector<1x64x4xbf16>
    %37 = vector.shape_cast %36 : vector<1x64x4xbf16> to vector<64x4xbf16>
    %cst_38 = arith.constant dense<0.000000e+00> : vector<64x288xf32>
    %38 = tpu.matmul %37, %35, %cst_38 {dimension_numbers = #tpu.dot_dimension_numbers<[1], [0], [0], [1], [0, 0, 1, 1], [], []>} : vector<64x4xbf16>, vector<4x288xbf16>, vector<64x288xf32> -> vector<64x288xf32>
    %39 = arith.addf %33, %38 : vector<64x288xf32>
    %c0_39 = arith.constant 0 : index
    %c0_40 = arith.constant 0 : index
    %c36 = arith.constant 36 : index
    %40 = vector.load %arg1[%c0_39, %c0_40, %c36] : memref<1x4x326xbf16, #tpu.memory_space<vmem>>, vector<1x4x288xbf16>
    %41 = vector.shape_cast %40 : vector<1x4x288xbf16> to vector<4x288xbf16>
    %c6 = arith.constant 6 : index
    %c0_41 = arith.constant 0 : index
    %c0_42 = arith.constant 0 : index
    %42 = vector.load %arg4[%c6, %c0_41, %c0_42] : memref<9x64x4xbf16, #tpu.memory_space<vmem>>, vector<1x64x4xbf16>
    %43 = vector.shape_cast %42 : vector<1x64x4xbf16> to vector<64x4xbf16>
    %cst_43 = arith.constant dense<0.000000e+00> : vector<64x288xf32>
    %44 = tpu.matmul %43, %41, %cst_43 {dimension_numbers = #tpu.dot_dimension_numbers<[1], [0], [0], [1], [0, 0, 1, 1], [], []>} : vector<64x4xbf16>, vector<4x288xbf16>, vector<64x288xf32> -> vector<64x288xf32>
    %45 = arith.addf %39, %44 : vector<64x288xf32>
    %c0_44 = arith.constant 0 : index
    %c0_45 = arith.constant 0 : index
    %c37 = arith.constant 37 : index
    %46 = vector.load %arg1[%c0_44, %c0_45, %c37] : memref<1x4x326xbf16, #tpu.memory_space<vmem>>, vector<1x4x288xbf16>
    %47 = vector.shape_cast %46 : vector<1x4x288xbf16> to vector<4x288xbf16>
    %c7 = arith.constant 7 : index
    %c0_46 = arith.constant 0 : index
    %c0_47 = arith.constant 0 : index
    %48 = vector.load %arg4[%c7, %c0_46, %c0_47] : memref<9x64x4xbf16, #tpu.memory_space<vmem>>, vector<1x64x4xbf16>
    %49 = vector.shape_cast %48 : vector<1x64x4xbf16> to vector<64x4xbf16>
    %cst_48 = arith.constant dense<0.000000e+00> : vector<64x288xf32>
    %50 = tpu.matmul %49, %47, %cst_48 {dimension_numbers = #tpu.dot_dimension_numbers<[1], [0], [0], [1], [0, 0, 1, 1], [], []>} : vector<64x4xbf16>, vector<4x288xbf16>, vector<64x288xf32> -> vector<64x288xf32>
    %51 = arith.addf %45, %50 : vector<64x288xf32>
    %c0_49 = arith.constant 0 : index
    %c0_50 = arith.constant 0 : index
    %c38 = arith.constant 38 : index
    %52 = vector.load %arg1[%c0_49, %c0_50, %c38] : memref<1x4x326xbf16, #tpu.memory_space<vmem>>, vector<1x4x288xbf16>
    %53 = vector.shape_cast %52 : vector<1x4x288xbf16> to vector<4x288xbf16>
    %c8 = arith.constant 8 : index
    %c0_51 = arith.constant 0 : index
    %c0_52 = arith.constant 0 : index
    %54 = vector.load %arg4[%c8, %c0_51, %c0_52] : memref<9x64x4xbf16, #tpu.memory_space<vmem>>, vector<1x64x4xbf16>
    %55 = vector.shape_cast %54 : vector<1x64x4xbf16> to vector<64x4xbf16>
    %cst_53 = arith.constant dense<0.000000e+00> : vector<64x288xf32>
    %56 = tpu.matmul %55, %53, %cst_53 {dimension_numbers = #tpu.dot_dimension_numbers<[1], [0], [0], [1], [0, 0, 1, 1], [], []>} : vector<64x4xbf16>, vector<4x288xbf16>, vector<64x288xf32> -> vector<64x288xf32>
    %57 = arith.addf %51, %56 : vector<64x288xf32>
    %c0_54 = arith.constant 0 : index
    %c0_55 = arith.constant 0 : index
    %58 = vector.load %arg5[%c0_54, %c0_55] : memref<64x1xf32, #tpu.memory_space<vmem>>, vector<64x1xf32>
    %59 = vector.broadcast %58 : vector<64x1xf32> to vector<64x288xf32>
    %60 = arith.addf %57, %59 : vector<64x288xf32>
    %cst_56 = arith.constant 0.000000e+00 : f32
    %61 = vector.broadcast %cst_56 : f32 to vector<64x288xf32>
    %62 = arith.maximumf %60, %61 : vector<64x288xf32>
    %63 = vector.broadcast %4 : vector<1x288xf32> to vector<64x288xf32>
    %64 = arith.mulf %62, %63 : vector<64x288xf32>
    %65 = arith.truncf %64 : vector<64x288xf32> to vector<64x288xbf16>
    %c0_57 = arith.constant 0 : index
    %c19_58 = arith.constant 19 : index
    %66 = vector.load %arg15[%c0_57, %c19_58] : memref<64x326xbf16, #tpu.memory_space<vmem>>, vector<64x288xbf16>
    tpu.vector_store %arg15[%c0_57, %c19_58], %65 {strides = array<i32>} : memref<64x326xbf16, #tpu.memory_space<vmem>>, vector<64x288xbf16>,
    %c0_59 = arith.constant 0 : index
    %c0_60 = arith.constant 0 : index
    %67 = vector.load %arg15[%c0_59, %c0_60] : memref<64x326xbf16, #tpu.memory_space<vmem>>, vector<64x288xbf16>
    %c0_61 = arith.constant 0 : index
    %c0_62 = arith.constant 0 : index
    %c0_63 = arith.constant 0 : index
    %68 = vector.load %arg6[%c0_61, %c0_62, %c0_63] : memref<9x32x64xbf16, #tpu.memory_space<vmem>>, vector<1x32x64xbf16>
    %69 = vector.shape_cast %68 : vector<1x32x64xbf16> to vector<32x64xbf16>
    %cst_64 = arith.constant dense<0.000000e+00> : vector<32x288xf32>
    %70 = tpu.matmul %69, %67, %cst_64 {dimension_numbers = #tpu.dot_dimension_numbers<[1], [0], [0], [1], [0, 0, 1, 1], [], []>} : vector<32x64xbf16>, vector<64x288xbf16>, vector<32x288xf32> -> vector<32x288xf32>
    %c0_65 = arith.constant 0 : index
    %c1_66 = arith.constant 1 : index
    %71 = vector.load %arg15[%c0_65, %c1_66] : memref<64x326xbf16, #tpu.memory_space<vmem>>, vector<64x288xbf16>
    %c1_67 = arith.constant 1 : index
    %c0_68 = arith.constant 0 : index
    %c0_69 = arith.constant 0 : index
    %72 = vector.load %arg6[%c1_67, %c0_68, %c0_69] : memref<9x32x64xbf16, #tpu.memory_space<vmem>>, vector<1x32x64xbf16>
    %73 = vector.shape_cast %72 : vector<1x32x64xbf16> to vector<32x64xbf16>
    %cst_70 = arith.constant dense<0.000000e+00> : vector<32x288xf32>
    %74 = tpu.matmul %73, %71, %cst_70 {dimension_numbers = #tpu.dot_dimension_numbers<[1], [0], [0], [1], [0, 0, 1, 1], [], []>} : vector<32x64xbf16>, vector<64x288xbf16>, vector<32x288xf32> -> vector<32x288xf32>
    %75 = arith.addf %70, %74 : vector<32x288xf32>
    %c0_71 = arith.constant 0 : index
    %c2_72 = arith.constant 2 : index
    %76 = vector.load %arg15[%c0_71, %c2_72] : memref<64x326xbf16, #tpu.memory_space<vmem>>, vector<64x288xbf16>
    %c2_73 = arith.constant 2 : index
    %c0_74 = arith.constant 0 : index
    %c0_75 = arith.constant 0 : index
    %77 = vector.load %arg6[%c2_73, %c0_74, %c0_75] : memref<9x32x64xbf16, #tpu.memory_space<vmem>>, vector<1x32x64xbf16>
    %78 = vector.shape_cast %77 : vector<1x32x64xbf16> to vector<32x64xbf16>
    %cst_76 = arith.constant dense<0.000000e+00> : vector<32x288xf32>
    %79 = tpu.matmul %78, %76, %cst_76 {dimension_numbers = #tpu.dot_dimension_numbers<[1], [0], [0], [1], [0, 0, 1, 1], [], []>} : vector<32x64xbf16>, vector<64x288xbf16>, vector<32x288xf32> -> vector<32x288xf32>
    %80 = arith.addf %75, %79 : vector<32x288xf32>
    %c0_77 = arith.constant 0 : index
    %c18_78 = arith.constant 18 : index
    %81 = vector.load %arg15[%c0_77, %c18_78] : memref<64x326xbf16, #tpu.memory_space<vmem>>, vector<64x288xbf16>
    %c3_79 = arith.constant 3 : index
    %c0_80 = arith.constant 0 : index
    %c0_81 = arith.constant 0 : index
    %82 = vector.load %arg6[%c3_79, %c0_80, %c0_81] : memref<9x32x64xbf16, #tpu.memory_space<vmem>>, vector<1x32x64xbf16>
    %83 = vector.shape_cast %82 : vector<1x32x64xbf16> to vector<32x64xbf16>
    %cst_82 = arith.constant dense<0.000000e+00> : vector<32x288xf32>
    %84 = tpu.matmul %83, %81, %cst_82 {dimension_numbers = #tpu.dot_dimension_numbers<[1], [0], [0], [1], [0, 0, 1, 1], [], []>} : vector<32x64xbf16>, vector<64x288xbf16>, vector<32x288xf32> -> vector<32x288xf32>
    %85 = arith.addf %80, %84 : vector<32x288xf32>
    %c0_83 = arith.constant 0 : index
    %c19_84 = arith.constant 19 : index
    %86 = vector.load %arg15[%c0_83, %c19_84] : memref<64x326xbf16, #tpu.memory_space<vmem>>, vector<64x288xbf16>
    %c4_85 = arith.constant 4 : index
    %c0_86 = arith.constant 0 : index
    %c0_87 = arith.constant 0 : index
    %87 = vector.load %arg6[%c4_85, %c0_86, %c0_87] : memref<9x32x64xbf16, #tpu.memory_space<vmem>>, vector<1x32x64xbf16>
    %88 = vector.shape_cast %87 : vector<1x32x64xbf16> to vector<32x64xbf16>
    %cst_88 = arith.constant dense<0.000000e+00> : vector<32x288xf32>
    %89 = tpu.matmul %88, %86, %cst_88 {dimension_numbers = #tpu.dot_dimension_numbers<[1], [0], [0], [1], [0, 0, 1, 1], [], []>} : vector<32x64xbf16>, vector<64x288xbf16>, vector<32x288xf32> -> vector<32x288xf32>
    %90 = arith.addf %85, %89 : vector<32x288xf32>
    %c0_89 = arith.constant 0 : index
    %c20_90 = arith.constant 20 : index
    %91 = vector.load %arg15[%c0_89, %c20_90] : memref<64x326xbf16, #tpu.memory_space<vmem>>, vector<64x288xbf16>
    %c5_91 = arith.constant 5 : index
    %c0_92 = arith.constant 0 : index
    %c0_93 = arith.constant 0 : index
    %92 = vector.load %arg6[%c5_91, %c0_92, %c0_93] : memref<9x32x64xbf16, #tpu.memory_space<vmem>>, vector<1x32x64xbf16>
    %93 = vector.shape_cast %92 : vector<1x32x64xbf16> to vector<32x64xbf16>
    %cst_94 = arith.constant dense<0.000000e+00> : vector<32x288xf32>
    %94 = tpu.matmul %93, %91, %cst_94 {dimension_numbers = #tpu.dot_dimension_numbers<[1], [0], [0], [1], [0, 0, 1, 1], [], []>} : vector<32x64xbf16>, vector<64x288xbf16>, vector<32x288xf32> -> vector<32x288xf32>
    %95 = arith.addf %90, %94 : vector<32x288xf32>
    %c0_95 = arith.constant 0 : index
    %c36_96 = arith.constant 36 : index
    %96 = vector.load %arg15[%c0_95, %c36_96] : memref<64x326xbf16, #tpu.memory_space<vmem>>, vector<64x288xbf16>
    %c6_97 = arith.constant 6 : index
    %c0_98 = arith.constant 0 : index
    %c0_99 = arith.constant 0 : index
    %97 = vector.load %arg6[%c6_97, %c0_98, %c0_99] : memref<9x32x64xbf16, #tpu.memory_space<vmem>>, vector<1x32x64xbf16>
    %98 = vector.shape_cast %97 : vector<1x32x64xbf16> to vector<32x64xbf16>
    %cst_100 = arith.constant dense<0.000000e+00> : vector<32x288xf32>
    %99 = tpu.matmul %98, %96, %cst_100 {dimension_numbers = #tpu.dot_dimension_numbers<[1], [0], [0], [1], [0, 0, 1, 1], [], []>} : vector<32x64xbf16>, vector<64x288xbf16>, vector<32x288xf32> -> vector<32x288xf32>
    %100 = arith.addf %95, %99 : vector<32x288xf32>
    %c0_101 = arith.constant 0 : index
    %c37_102 = arith.constant 37 : index
    %101 = vector.load %arg15[%c0_101, %c37_102] : memref<64x326xbf16, #tpu.memory_space<vmem>>, vector<64x288xbf16>
    %c7_103 = arith.constant 7 : index
    %c0_104 = arith.constant 0 : index
    %c0_105 = arith.constant 0 : index
    %102 = vector.load %arg6[%c7_103, %c0_104, %c0_105] : memref<9x32x64xbf16, #tpu.memory_space<vmem>>, vector<1x32x64xbf16>
    %103 = vector.shape_cast %102 : vector<1x32x64xbf16> to vector<32x64xbf16>
    %cst_106 = arith.constant dense<0.000000e+00> : vector<32x288xf32>
    %104 = tpu.matmul %103, %101, %cst_106 {dimension_numbers = #tpu.dot_dimension_numbers<[1], [0], [0], [1], [0, 0, 1, 1], [], []>} : vector<32x64xbf16>, vector<64x288xbf16>, vector<32x288xf32> -> vector<32x288xf32>
    %105 = arith.addf %100, %104 : vector<32x288xf32>
    %c0_107 = arith.constant 0 : index
    %c38_108 = arith.constant 38 : index
    %106 = vector.load %arg15[%c0_107, %c38_108] : memref<64x326xbf16, #tpu.memory_space<vmem>>, vector<64x288xbf16>
    %c8_109 = arith.constant 8 : index
    %c0_110 = arith.constant 0 : index
    %c0_111 = arith.constant 0 : index
    %107 = vector.load %arg6[%c8_109, %c0_110, %c0_111] : memref<9x32x64xbf16, #tpu.memory_space<vmem>>, vector<1x32x64xbf16>
    %108 = vector.shape_cast %107 : vector<1x32x64xbf16> to vector<32x64xbf16>
    %cst_112 = arith.constant dense<0.000000e+00> : vector<32x288xf32>
    %109 = tpu.matmul %108, %106, %cst_112 {dimension_numbers = #tpu.dot_dimension_numbers<[1], [0], [0], [1], [0, 0, 1, 1], [], []>} : vector<32x64xbf16>, vector<64x288xbf16>, vector<32x288xf32> -> vector<32x288xf32>
    %110 = arith.addf %105, %109 : vector<32x288xf32>
    %c0_113 = arith.constant 0 : index
    %c0_114 = arith.constant 0 : index
    %111 = vector.load %arg7[%c0_113, %c0_114] : memref<32x1xf32, #tpu.memory_space<vmem>>, vector<32x1xf32>
    %112 = vector.broadcast %111 : vector<32x1xf32> to vector<32x288xf32>
    %113 = arith.addf %110, %112 : vector<32x288xf32>
    %cst_115 = arith.constant 0.000000e+00 : f32
    %114 = vector.broadcast %cst_115 : f32 to vector<32x288xf32>
    %115 = arith.maximumf %113, %114 : vector<32x288xf32>
    %116 = vector.broadcast %4 : vector<1x288xf32> to vector<32x288xf32>
    %117 = arith.mulf %115, %116 : vector<32x288xf32>
    %118 = arith.truncf %117 : vector<32x288xf32> to vector<32x288xbf16>
    %c0_116 = arith.constant 0 : index
    %c19_117 = arith.constant 19 : index
    %119 = vector.load %arg15[%c0_116, %c19_117] : memref<64x326xbf16, #tpu.memory_space<vmem>>, vector<32x288xbf16>
    tpu.vector_store %arg15[%c0_116, %c19_117], %118 {strides = array<i32>} : memref<64x326xbf16, #tpu.memory_space<vmem>>, vector<32x288xbf16>,
    %c0_118 = arith.constant 0 : index
    %c0_119 = arith.constant 0 : index
    %120 = vector.load %arg15[%c0_118, %c0_119] : memref<64x326xbf16, #tpu.memory_space<vmem>>, vector<32x288xbf16>
    %c0_120 = arith.constant 0 : index
    %c0_121 = arith.constant 0 : index
    %c0_122 = arith.constant 0 : index
    %121 = vector.load %arg8[%c0_120, %c0_121, %c0_122] : memref<9x16x32xbf16, #tpu.memory_space<vmem>>, vector<1x16x32xbf16>
    %122 = vector.shape_cast %121 : vector<1x16x32xbf16> to vector<16x32xbf16>
    %cst_123 = arith.constant dense<0.000000e+00> : vector<16x288xf32>
    %123 = tpu.matmul %122, %120, %cst_123 {dimension_numbers = #tpu.dot_dimension_numbers<[1], [0], [0], [1], [0, 0, 1, 1], [], []>} : vector<16x32xbf16>, vector<32x288xbf16>, vector<16x288xf32> -> vector<16x288xf32>
    %c0_124 = arith.constant 0 : index
    %c1_125 = arith.constant 1 : index
    %124 = vector.load %arg15[%c0_124, %c1_125] : memref<64x326xbf16, #tpu.memory_space<vmem>>, vector<32x288xbf16>
    %c1_126 = arith.constant 1 : index
    %c0_127 = arith.constant 0 : index
    %c0_128 = arith.constant 0 : index
    %125 = vector.load %arg8[%c1_126, %c0_127, %c0_128] : memref<9x16x32xbf16, #tpu.memory_space<vmem>>, vector<1x16x32xbf16>
    %126 = vector.shape_cast %125 : vector<1x16x32xbf16> to vector<16x32xbf16>
    %cst_129 = arith.constant dense<0.000000e+00> : vector<16x288xf32>
    %127 = tpu.matmul %126, %124, %cst_129 {dimension_numbers = #tpu.dot_dimension_numbers<[1], [0], [0], [1], [0, 0, 1, 1], [], []>} : vector<16x32xbf16>, vector<32x288xbf16>, vector<16x288xf32> -> vector<16x288xf32>
    %128 = arith.addf %123, %127 : vector<16x288xf32>
    %c0_130 = arith.constant 0 : index
    %c2_131 = arith.constant 2 : index
    %129 = vector.load %arg15[%c0_130, %c2_131] : memref<64x326xbf16, #tpu.memory_space<vmem>>, vector<32x288xbf16>
    %c2_132 = arith.constant 2 : index
    %c0_133 = arith.constant 0 : index
    %c0_134 = arith.constant 0 : index
    %130 = vector.load %arg8[%c2_132, %c0_133, %c0_134] : memref<9x16x32xbf16, #tpu.memory_space<vmem>>, vector<1x16x32xbf16>
    %131 = vector.shape_cast %130 : vector<1x16x32xbf16> to vector<16x32xbf16>
    %cst_135 = arith.constant dense<0.000000e+00> : vector<16x288xf32>
    %132 = tpu.matmul %131, %129, %cst_135 {dimension_numbers = #tpu.dot_dimension_numbers<[1], [0], [0], [1], [0, 0, 1, 1], [], []>} : vector<16x32xbf16>, vector<32x288xbf16>, vector<16x288xf32> -> vector<16x288xf32>
    %133 = arith.addf %128, %132 : vector<16x288xf32>
    %c0_136 = arith.constant 0 : index
    %c18_137 = arith.constant 18 : index
    %134 = vector.load %arg15[%c0_136, %c18_137] : memref<64x326xbf16, #tpu.memory_space<vmem>>, vector<32x288xbf16>
    %c3_138 = arith.constant 3 : index
    %c0_139 = arith.constant 0 : index
    %c0_140 = arith.constant 0 : index
    %135 = vector.load %arg8[%c3_138, %c0_139, %c0_140] : memref<9x16x32xbf16, #tpu.memory_space<vmem>>, vector<1x16x32xbf16>
    %136 = vector.shape_cast %135 : vector<1x16x32xbf16> to vector<16x32xbf16>
    %cst_141 = arith.constant dense<0.000000e+00> : vector<16x288xf32>
    %137 = tpu.matmul %136, %134, %cst_141 {dimension_numbers = #tpu.dot_dimension_numbers<[1], [0], [0], [1], [0, 0, 1, 1], [], []>} : vector<16x32xbf16>, vector<32x288xbf16>, vector<16x288xf32> -> vector<16x288xf32>
    %138 = arith.addf %133, %137 : vector<16x288xf32>
    %c0_142 = arith.constant 0 : index
    %c19_143 = arith.constant 19 : index
    %139 = vector.load %arg15[%c0_142, %c19_143] : memref<64x326xbf16, #tpu.memory_space<vmem>>, vector<32x288xbf16>
    %c4_144 = arith.constant 4 : index
    %c0_145 = arith.constant 0 : index
    %c0_146 = arith.constant 0 : index
    %140 = vector.load %arg8[%c4_144, %c0_145, %c0_146] : memref<9x16x32xbf16, #tpu.memory_space<vmem>>, vector<1x16x32xbf16>
    %141 = vector.shape_cast %140 : vector<1x16x32xbf16> to vector<16x32xbf16>
    %cst_147 = arith.constant dense<0.000000e+00> : vector<16x288xf32>
    %142 = tpu.matmul %141, %139, %cst_147 {dimension_numbers = #tpu.dot_dimension_numbers<[1], [0], [0], [1], [0, 0, 1, 1], [], []>} : vector<16x32xbf16>, vector<32x288xbf16>, vector<16x288xf32> -> vector<16x288xf32>
    %143 = arith.addf %138, %142 : vector<16x288xf32>
    %c0_148 = arith.constant 0 : index
    %c20_149 = arith.constant 20 : index
    %144 = vector.load %arg15[%c0_148, %c20_149] : memref<64x326xbf16, #tpu.memory_space<vmem>>, vector<32x288xbf16>
    %c5_150 = arith.constant 5 : index
    %c0_151 = arith.constant 0 : index
    %c0_152 = arith.constant 0 : index
    %145 = vector.load %arg8[%c5_150, %c0_151, %c0_152] : memref<9x16x32xbf16, #tpu.memory_space<vmem>>, vector<1x16x32xbf16>
    %146 = vector.shape_cast %145 : vector<1x16x32xbf16> to vector<16x32xbf16>
    %cst_153 = arith.constant dense<0.000000e+00> : vector<16x288xf32>
    %147 = tpu.matmul %146, %144, %cst_153 {dimension_numbers = #tpu.dot_dimension_numbers<[1], [0], [0], [1], [0, 0, 1, 1], [], []>} : vector<16x32xbf16>, vector<32x288xbf16>, vector<16x288xf32> -> vector<16x288xf32>
    %148 = arith.addf %143, %147 : vector<16x288xf32>
    %c0_154 = arith.constant 0 : index
    %c36_155 = arith.constant 36 : index
    %149 = vector.load %arg15[%c0_154, %c36_155] : memref<64x326xbf16, #tpu.memory_space<vmem>>, vector<32x288xbf16>
    %c6_156 = arith.constant 6 : index
    %c0_157 = arith.constant 0 : index
    %c0_158 = arith.constant 0 : index
    %150 = vector.load %arg8[%c6_156, %c0_157, %c0_158] : memref<9x16x32xbf16, #tpu.memory_space<vmem>>, vector<1x16x32xbf16>
    %151 = vector.shape_cast %150 : vector<1x16x32xbf16> to vector<16x32xbf16>
    %cst_159 = arith.constant dense<0.000000e+00> : vector<16x288xf32>
    %152 = tpu.matmul %151, %149, %cst_159 {dimension_numbers = #tpu.dot_dimension_numbers<[1], [0], [0], [1], [0, 0, 1, 1], [], []>} : vector<16x32xbf16>, vector<32x288xbf16>, vector<16x288xf32> -> vector<16x288xf32>
    %153 = arith.addf %148, %152 : vector<16x288xf32>
    %c0_160 = arith.constant 0 : index
    %c37_161 = arith.constant 37 : index
    %154 = vector.load %arg15[%c0_160, %c37_161] : memref<64x326xbf16, #tpu.memory_space<vmem>>, vector<32x288xbf16>
    %c7_162 = arith.constant 7 : index
    %c0_163 = arith.constant 0 : index
    %c0_164 = arith.constant 0 : index
    %155 = vector.load %arg8[%c7_162, %c0_163, %c0_164] : memref<9x16x32xbf16, #tpu.memory_space<vmem>>, vector<1x16x32xbf16>
    %156 = vector.shape_cast %155 : vector<1x16x32xbf16> to vector<16x32xbf16>
    %cst_165 = arith.constant dense<0.000000e+00> : vector<16x288xf32>
    %157 = tpu.matmul %156, %154, %cst_165 {dimension_numbers = #tpu.dot_dimension_numbers<[1], [0], [0], [1], [0, 0, 1, 1], [], []>} : vector<16x32xbf16>, vector<32x288xbf16>, vector<16x288xf32> -> vector<16x288xf32>
    %158 = arith.addf %153, %157 : vector<16x288xf32>
    %c0_166 = arith.constant 0 : index
    %c38_167 = arith.constant 38 : index
    %159 = vector.load %arg15[%c0_166, %c38_167] : memref<64x326xbf16, #tpu.memory_space<vmem>>, vector<32x288xbf16>
    %c8_168 = arith.constant 8 : index
    %c0_169 = arith.constant 0 : index
    %c0_170 = arith.constant 0 : index
    %160 = vector.load %arg8[%c8_168, %c0_169, %c0_170] : memref<9x16x32xbf16, #tpu.memory_space<vmem>>, vector<1x16x32xbf16>
    %161 = vector.shape_cast %160 : vector<1x16x32xbf16> to vector<16x32xbf16>
    %cst_171 = arith.constant dense<0.000000e+00> : vector<16x288xf32>
    %162 = tpu.matmul %161, %159, %cst_171 {dimension_numbers = #tpu.dot_dimension_numbers<[1], [0], [0], [1], [0, 0, 1, 1], [], []>} : vector<16x32xbf16>, vector<32x288xbf16>, vector<16x288xf32> -> vector<16x288xf32>
    %163 = arith.addf %158, %162 : vector<16x288xf32>
    %c0_172 = arith.constant 0 : index
    %c0_173 = arith.constant 0 : index
    %164 = vector.load %arg9[%c0_172, %c0_173] : memref<16x1xf32, #tpu.memory_space<vmem>>, vector<16x1xf32>
    %165 = vector.broadcast %164 : vector<16x1xf32> to vector<16x288xf32>
    %166 = arith.addf %163, %165 : vector<16x288xf32>
    %cst_174 = arith.constant 0.000000e+00 : f32
    %167 = vector.broadcast %cst_174 : f32 to vector<16x288xf32>
    %168 = arith.maximumf %166, %167 : vector<16x288xf32>
    %169 = vector.broadcast %4 : vector<1x288xf32> to vector<16x288xf32>
    %170 = arith.mulf %168, %169 : vector<16x288xf32>
    %171 = arith.truncf %170 : vector<16x288xf32> to vector<16x288xbf16>
    %c0_175 = arith.constant 0 : index
    %c19_176 = arith.constant 19 : index
    %172 = vector.load %arg15[%c0_175, %c19_176] : memref<64x326xbf16, #tpu.memory_space<vmem>>, vector<16x288xbf16>
    tpu.vector_store %arg15[%c0_175, %c19_176], %171 {strides = array<i32>} : memref<64x326xbf16, #tpu.memory_space<vmem>>, vector<16x288xbf16>,
    %c0_177 = arith.constant 0 : index
    %c0_178 = arith.constant 0 : index
    %173 = vector.load %arg15[%c0_177, %c0_178] : memref<64x326xbf16, #tpu.memory_space<vmem>>, vector<16x288xbf16>
    %c0_179 = arith.constant 0 : index
    %c0_180 = arith.constant 0 : index
    %c0_181 = arith.constant 0 : index
    %174 = vector.load %arg10[%c0_179, %c0_180, %c0_181] : memref<9x8x16xbf16, #tpu.memory_space<vmem>>, vector<1x8x16xbf16>
    %175 = vector.shape_cast %174 : vector<1x8x16xbf16> to vector<8x16xbf16>
    %cst_182 = arith.constant dense<0.000000e+00> : vector<8x288xf32>
    %176 = tpu.matmul %175, %173, %cst_182 {dimension_numbers = #tpu.dot_dimension_numbers<[1], [0], [0], [1], [0, 0, 1, 1], [], []>} : vector<8x16xbf16>, vector<16x288xbf16>, vector<8x288xf32> -> vector<8x288xf32>
    %c0_183 = arith.constant 0 : index
    %c1_184 = arith.constant 1 : index
    %177 = vector.load %arg15[%c0_183, %c1_184] : memref<64x326xbf16, #tpu.memory_space<vmem>>, vector<16x288xbf16>
    %c1_185 = arith.constant 1 : index
    %c0_186 = arith.constant 0 : index
    %c0_187 = arith.constant 0 : index
    %178 = vector.load %arg10[%c1_185, %c0_186, %c0_187] : memref<9x8x16xbf16, #tpu.memory_space<vmem>>, vector<1x8x16xbf16>
    %179 = vector.shape_cast %178 : vector<1x8x16xbf16> to vector<8x16xbf16>
    %cst_188 = arith.constant dense<0.000000e+00> : vector<8x288xf32>
    %180 = tpu.matmul %179, %177, %cst_188 {dimension_numbers = #tpu.dot_dimension_numbers<[1], [0], [0], [1], [0, 0, 1, 1], [], []>} : vector<8x16xbf16>, vector<16x288xbf16>, vector<8x288xf32> -> vector<8x288xf32>
    %181 = arith.addf %176, %180 : vector<8x288xf32>
    %c0_189 = arith.constant 0 : index
    %c2_190 = arith.constant 2 : index
    %182 = vector.load %arg15[%c0_189, %c2_190] : memref<64x326xbf16, #tpu.memory_space<vmem>>, vector<16x288xbf16>
    %c2_191 = arith.constant 2 : index
    %c0_192 = arith.constant 0 : index
    %c0_193 = arith.constant 0 : index
    %183 = vector.load %arg10[%c2_191, %c0_192, %c0_193] : memref<9x8x16xbf16, #tpu.memory_space<vmem>>, vector<1x8x16xbf16>
    %184 = vector.shape_cast %183 : vector<1x8x16xbf16> to vector<8x16xbf16>
    %cst_194 = arith.constant dense<0.000000e+00> : vector<8x288xf32>
    %185 = tpu.matmul %184, %182, %cst_194 {dimension_numbers = #tpu.dot_dimension_numbers<[1], [0], [0], [1], [0, 0, 1, 1], [], []>} : vector<8x16xbf16>, vector<16x288xbf16>, vector<8x288xf32> -> vector<8x288xf32>
    %186 = arith.addf %181, %185 : vector<8x288xf32>
    %c0_195 = arith.constant 0 : index
    %c18_196 = arith.constant 18 : index
    %187 = vector.load %arg15[%c0_195, %c18_196] : memref<64x326xbf16, #tpu.memory_space<vmem>>, vector<16x288xbf16>
    %c3_197 = arith.constant 3 : index
    %c0_198 = arith.constant 0 : index
    %c0_199 = arith.constant 0 : index
    %188 = vector.load %arg10[%c3_197, %c0_198, %c0_199] : memref<9x8x16xbf16, #tpu.memory_space<vmem>>, vector<1x8x16xbf16>
    %189 = vector.shape_cast %188 : vector<1x8x16xbf16> to vector<8x16xbf16>
    %cst_200 = arith.constant dense<0.000000e+00> : vector<8x288xf32>
    %190 = tpu.matmul %189, %187, %cst_200 {dimension_numbers = #tpu.dot_dimension_numbers<[1], [0], [0], [1], [0, 0, 1, 1], [], []>} : vector<8x16xbf16>, vector<16x288xbf16>, vector<8x288xf32> -> vector<8x288xf32>
    %191 = arith.addf %186, %190 : vector<8x288xf32>
    %c0_201 = arith.constant 0 : index
    %c19_202 = arith.constant 19 : index
    %192 = vector.load %arg15[%c0_201, %c19_202] : memref<64x326xbf16, #tpu.memory_space<vmem>>, vector<16x288xbf16>
    %c4_203 = arith.constant 4 : index
    %c0_204 = arith.constant 0 : index
    %c0_205 = arith.constant 0 : index
    %193 = vector.load %arg10[%c4_203, %c0_204, %c0_205] : memref<9x8x16xbf16, #tpu.memory_space<vmem>>, vector<1x8x16xbf16>
    %194 = vector.shape_cast %193 : vector<1x8x16xbf16> to vector<8x16xbf16>
    %cst_206 = arith.constant dense<0.000000e+00> : vector<8x288xf32>
    %195 = tpu.matmul %194, %192, %cst_206 {dimension_numbers = #tpu.dot_dimension_numbers<[1], [0], [0], [1], [0, 0, 1, 1], [], []>} : vector<8x16xbf16>, vector<16x288xbf16>, vector<8x288xf32> -> vector<8x288xf32>
    %196 = arith.addf %191, %195 : vector<8x288xf32>
    %c0_207 = arith.constant 0 : index
    %c20_208 = arith.constant 20 : index
    %197 = vector.load %arg15[%c0_207, %c20_208] : memref<64x326xbf16, #tpu.memory_space<vmem>>, vector<16x288xbf16>
    %c5_209 = arith.constant 5 : index
    %c0_210 = arith.constant 0 : index
    %c0_211 = arith.constant 0 : index
    %198 = vector.load %arg10[%c5_209, %c0_210, %c0_211] : memref<9x8x16xbf16, #tpu.memory_space<vmem>>, vector<1x8x16xbf16>
    %199 = vector.shape_cast %198 : vector<1x8x16xbf16> to vector<8x16xbf16>
    %cst_212 = arith.constant dense<0.000000e+00> : vector<8x288xf32>
    %200 = tpu.matmul %199, %197, %cst_212 {dimension_numbers = #tpu.dot_dimension_numbers<[1], [0], [0], [1], [0, 0, 1, 1], [], []>} : vector<8x16xbf16>, vector<16x288xbf16>, vector<8x288xf32> -> vector<8x288xf32>
    %201 = arith.addf %196, %200 : vector<8x288xf32>
    %c0_213 = arith.constant 0 : index
    %c36_214 = arith.constant 36 : index
    %202 = vector.load %arg15[%c0_213, %c36_214] : memref<64x326xbf16, #tpu.memory_space<vmem>>, vector<16x288xbf16>
    %c6_215 = arith.constant 6 : index
    %c0_216 = arith.constant 0 : index
    %c0_217 = arith.constant 0 : index
    %203 = vector.load %arg10[%c6_215, %c0_216, %c0_217] : memref<9x8x16xbf16, #tpu.memory_space<vmem>>, vector<1x8x16xbf16>
    %204 = vector.shape_cast %203 : vector<1x8x16xbf16> to vector<8x16xbf16>
    %cst_218 = arith.constant dense<0.000000e+00> : vector<8x288xf32>
    %205 = tpu.matmul %204, %202, %cst_218 {dimension_numbers = #tpu.dot_dimension_numbers<[1], [0], [0], [1], [0, 0, 1, 1], [], []>} : vector<8x16xbf16>, vector<16x288xbf16>, vector<8x288xf32> -> vector<8x288xf32>
    %206 = arith.addf %201, %205 : vector<8x288xf32>
    %c0_219 = arith.constant 0 : index
    %c37_220 = arith.constant 37 : index
    %207 = vector.load %arg15[%c0_219, %c37_220] : memref<64x326xbf16, #tpu.memory_space<vmem>>, vector<16x288xbf16>
    %c7_221 = arith.constant 7 : index
    %c0_222 = arith.constant 0 : index
    %c0_223 = arith.constant 0 : index
    %208 = vector.load %arg10[%c7_221, %c0_222, %c0_223] : memref<9x8x16xbf16, #tpu.memory_space<vmem>>, vector<1x8x16xbf16>
    %209 = vector.shape_cast %208 : vector<1x8x16xbf16> to vector<8x16xbf16>
    %cst_224 = arith.constant dense<0.000000e+00> : vector<8x288xf32>
    %210 = tpu.matmul %209, %207, %cst_224 {dimension_numbers = #tpu.dot_dimension_numbers<[1], [0], [0], [1], [0, 0, 1, 1], [], []>} : vector<8x16xbf16>, vector<16x288xbf16>, vector<8x288xf32> -> vector<8x288xf32>
    %211 = arith.addf %206, %210 : vector<8x288xf32>
    %c0_225 = arith.constant 0 : index
    %c38_226 = arith.constant 38 : index
    %212 = vector.load %arg15[%c0_225, %c38_226] : memref<64x326xbf16, #tpu.memory_space<vmem>>, vector<16x288xbf16>
    %c8_227 = arith.constant 8 : index
    %c0_228 = arith.constant 0 : index
    %c0_229 = arith.constant 0 : index
    %213 = vector.load %arg10[%c8_227, %c0_228, %c0_229] : memref<9x8x16xbf16, #tpu.memory_space<vmem>>, vector<1x8x16xbf16>
    %214 = vector.shape_cast %213 : vector<1x8x16xbf16> to vector<8x16xbf16>
    %cst_230 = arith.constant dense<0.000000e+00> : vector<8x288xf32>
    %215 = tpu.matmul %214, %212, %cst_230 {dimension_numbers = #tpu.dot_dimension_numbers<[1], [0], [0], [1], [0, 0, 1, 1], [], []>} : vector<8x16xbf16>, vector<16x288xbf16>, vector<8x288xf32> -> vector<8x288xf32>
    %216 = arith.addf %211, %215 : vector<8x288xf32>
    %c0_231 = arith.constant 0 : index
    %c0_232 = arith.constant 0 : index
    %217 = vector.load %arg11[%c0_231, %c0_232] : memref<8x1xf32, #tpu.memory_space<vmem>>, vector<8x1xf32>
    %218 = vector.broadcast %217 : vector<8x1xf32> to vector<8x288xf32>
    %219 = arith.addf %216, %218 : vector<8x288xf32>
    %cst_233 = arith.constant 0.000000e+00 : f32
    %220 = vector.broadcast %cst_233 : f32 to vector<8x288xf32>
    %221 = arith.maximumf %219, %220 : vector<8x288xf32>
    %222 = vector.broadcast %4 : vector<1x288xf32> to vector<8x288xf32>
    %223 = arith.mulf %221, %222 : vector<8x288xf32>
    %224 = arith.truncf %223 : vector<8x288xf32> to vector<8x288xbf16>
    %c0_234 = arith.constant 0 : index
    %c0_235 = arith.constant 0 : index
    %225 = vector.load %arg12[%c0_234, %c0_235] : memref<2x8xbf16, #tpu.memory_space<vmem>>, vector<2x8xbf16>
    %cst_236 = arith.constant dense<0.000000e+00> : vector<2x288xf32>
    %226 = tpu.matmul %225, %224, %cst_236 {dimension_numbers = #tpu.dot_dimension_numbers<[1], [0], [0], [1], [0, 0, 1, 1], [], []>} : vector<2x8xbf16>, vector<8x288xbf16>, vector<2x288xf32> -> vector<2x288xf32>
    %c0_237 = arith.constant 0 : index
    %c0_238 = arith.constant 0 : index
    %227 = vector.load %arg13[%c0_237, %c0_238] : memref<2x1xf32, #tpu.memory_space<vmem>>, vector<2x1xf32>
    %228 = vector.broadcast %227 : vector<2x1xf32> to vector<2x288xf32>
    %229 = arith.addf %226, %228 : vector<2x288xf32>
    %cst_239 = arith.constant dense<0xFF800000> : vector<2xf32>
    %230 = vector.multi_reduction <maximumf>, %229, %cst_239 [1] : vector<2x288xf32> to vector<2xf32>
    %231 = vector.shape_cast %230 : vector<2xf32> to vector<2x1xf32>
    %232 = vector.broadcast %231 : vector<2x1xf32> to vector<2x288xf32>
    %233 = arith.subf %229, %232 : vector<2x288xf32>
    %234 = math.exp %233 : vector<2x288xf32>
    %c0_240 = arith.constant 0 : index
    %c0_241 = arith.constant 0 : index
    %235 = vector.load %arg3[%c0_240, %c0_241] : memref<288x3xf32, #tpu.memory_space<vmem>>, vector<288x3xf32>
    %cst_242 = arith.constant dense<0.000000e+00> : vector<2x3xf32>
    %236 = tpu.matmul %234, %235, %cst_242 {dimension_numbers = #tpu.dot_dimension_numbers<[1], [0], [0], [1], [0, 0, 1, 1], [], []>} : vector<2x288xf32>, vector<288x3xf32>, vector<2x3xf32> -> vector<2x3xf32>
    %237 = vector.extract_strided_slice %236 {offsets = [0, 1], sizes = [2, 2], strides = [1, 1]} : vector<2x3xf32> to vector<2x2xf32>
    %238 = vector.extract_strided_slice %236 {offsets = [0, 0], sizes = [2, 1], strides = [1, 1]} : vector<2x3xf32> to vector<2x1xf32>
    %239 = vector.broadcast %238 : vector<2x1xf32> to vector<2x2xf32>
    %240 = arith.divf %237, %239 : vector<2x2xf32>
    %241 = vector.extract_strided_slice %240 {offsets = [0, 0], sizes = [1, 2], strides = [1, 1]} : vector<2x2xf32> to vector<1x2xf32>
    %242 = vector.extract_strided_slice %240 {offsets = [1, 0], sizes = [1, 2], strides = [1, 1]} : vector<2x2xf32> to vector<1x2xf32>
    %243 = tpu.concatenate %241, %242 in 1 : vector<1x2xf32>, vector<1x2xf32> -> vector<1x4xf32>
    %cst_243 = arith.constant 3.906250e-03 : f32
    %244 = vector.broadcast %cst_243 : f32 to vector<1x4xf32>
    %245 = arith.mulf %243, %244 : vector<1x4xf32>
    %246 = vector.shape_cast %245 : vector<1x4xf32> to vector<1x1x4xf32>
    %c0_244 = arith.constant 0 : index
    %c0_245 = arith.constant 0 : index
    %c0_246 = arith.constant 0 : index
    %247 = vector.load %arg14[%c0_244, %c0_245, %c0_246] : memref<1x1x4xf32, #tpu.memory_space<vmem>>, vector<1x1x4xf32>
    tpu.vector_store %arg14[%c0_244, %c0_245, %c0_246], %246 {strides = array<i32>} : memref<1x1x4xf32, #tpu.memory_space<vmem>>, vector<1x1x4xf32>,
    return
  }
  func.func @transform_0(%arg0: i32) -> (i32, i32, i32) {
    %c0_i32 = arith.constant 0 : i32
    %c0_i32_0 = arith.constant 0 : i32
    %c0_i32_1 = arith.constant 0 : i32
    return %arg0, %c0_i32, %c0_i32_0 : i32, i32, i32
  }
  func.func @transform_1(%arg0: i32) -> (i32, i32) {
    %c0_i32 = arith.constant 0 : i32
    %c0_i32_0 = arith.constant 0 : i32
    %c0_i32_1 = arith.constant 0 : i32
    return %c0_i32, %c0_i32_0 : i32, i32
  }
  func.func @transform_2(%arg0: i32) -> (i32, i32) {
    %c0_i32 = arith.constant 0 : i32
    %c0_i32_0 = arith.constant 0 : i32
    %c0_i32_1 = arith.constant 0 : i32
    return %c0_i32, %c0_i32_0 : i32, i32
  }
  func.func @transform_3(%arg0: i32) -> (i32, i32, i32) {
    %c0_i32 = arith.constant 0 : i32
    %c0_i32_0 = arith.constant 0 : i32
    %c0_i32_1 = arith.constant 0 : i32
    %c0_i32_2 = arith.constant 0 : i32
    return %c0_i32, %c0_i32_0, %c0_i32_1 : i32, i32, i32
  }
  func.func @transform_4(%arg0: i32) -> (i32, i32) {
    %c0_i32 = arith.constant 0 : i32
    %c0_i32_0 = arith.constant 0 : i32
    %c0_i32_1 = arith.constant 0 : i32
    return %c0_i32, %c0_i32_0 : i32, i32
  }
  func.func @transform_5(%arg0: i32) -> (i32, i32, i32) {
    %c0_i32 = arith.constant 0 : i32
    %c0_i32_0 = arith.constant 0 : i32
    %c0_i32_1 = arith.constant 0 : i32
    %c0_i32_2 = arith.constant 0 : i32
    return %c0_i32, %c0_i32_0, %c0_i32_1 : i32, i32, i32
  }
  func.func @transform_6(%arg0: i32) -> (i32, i32) {
    %c0_i32 = arith.constant 0 : i32
    %c0_i32_0 = arith.constant 0 : i32
    %c0_i32_1 = arith.constant 0 : i32
    return %c0_i32, %c0_i32_0 : i32, i32
  }
  func.func @transform_7(%arg0: i32) -> (i32, i32, i32) {
    %c0_i32 = arith.constant 0 : i32
    %c0_i32_0 = arith.constant 0 : i32
    %c0_i32_1 = arith.constant 0 : i32
    %c0_i32_2 = arith.constant 0 : i32
    return %c0_i32, %c0_i32_0, %c0_i32_1 : i32, i32, i32
  }
  func.func @transform_8(%arg0: i32) -> (i32, i32) {
    %c0_i32 = arith.constant 0 : i32
    %c0_i32_0 = arith.constant 0 : i32
    %c0_i32_1 = arith.constant 0 : i32
    return %c0_i32, %c0_i32_0 : i32, i32
  }
  func.func @transform_9(%arg0: i32) -> (i32, i32, i32) {
    %c0_i32 = arith.constant 0 : i32
    %c0_i32_0 = arith.constant 0 : i32
    %c0_i32_1 = arith.constant 0 : i32
    %c0_i32_2 = arith.constant 0 : i32
    return %c0_i32, %c0_i32_0, %c0_i32_1 : i32, i32, i32
  }
  func.func @transform_10(%arg0: i32) -> (i32, i32) {
    %c0_i32 = arith.constant 0 : i32
    %c0_i32_0 = arith.constant 0 : i32
    %c0_i32_1 = arith.constant 0 : i32
    return %c0_i32, %c0_i32_0 : i32, i32
  }
  func.func @transform_11(%arg0: i32) -> (i32, i32) {
    %c0_i32 = arith.constant 0 : i32
    %c0_i32_0 = arith.constant 0 : i32
    %c0_i32_1 = arith.constant 0 : i32
    return %c0_i32, %c0_i32_0 : i32, i32
  }
  func.func @transform_12(%arg0: i32) -> (i32, i32) {
    %c0_i32 = arith.constant 0 : i32
    %c0_i32_0 = arith.constant 0 : i32
    %c0_i32_1 = arith.constant 0 : i32
    return %c0_i32, %c0_i32_0 : i32, i32
  }
  func.func @transform_13(%arg0: i32) -> (i32, i32, i32) {
    %c0_i32 = arith.constant 0 : i32
    %c0_i32_0 = arith.constant 0 : i32
    %c0_i32_1 = arith.constant 0 : i32
    return %arg0, %c0_i32, %c0_i32_0 : i32, i32, i32
  }
}

</mosaic_0001>

<bundles_post_ra>
// kernel: tpu_custom_call.1
= control target key start
LH: loop header
LB: loop body
LE: loop exit
PB: predicated region body
PF: predicated region fallthrough
CT: control target
= control target key end

     0   :  { %s10793_s0 = inlined_call_operand.vmem [shape: bf16[2,4,326], index: 0, kind: input, shape index: {}]   ;;  %s10794_s1 = inlined_call_operand.vmem [shape: f32[1,288], index: 1, kind: input, shape index: {}]   ;;  %s10795_s2 = inlined_call_operand.vmem [shape: f32[288,3], index: 2, kind: input, shape index: {}]   ;;  %s10796_s3 = inlined_call_operand.vmem [shape: bf16[9,64,4], index: 3, kind: input, shape index: {}]   ;;  %s10797_s4 = inlined_call_operand.vmem [shape: f32[64,1], index: 4, kind: input, shape index: {}]   ;;  %s10798_s5 = inlined_call_operand.vmem [shape: bf16[9,32,64], index: 5, kind: input, shape index: {}]   ;;  %s10799_s6 = inlined_call_operand.vmem [shape: f32[32,1], index: 6, kind: input, shape index: {}]   ;;  %s10800_s7 = inlined_call_operand.vmem [shape: bf16[9,16,32], index: 7, kind: input, shape index: {}]   ;;  %s10801_s8 = inlined_call_operand.vmem [shape: f32[16,1], index: 8, kind: input, shape index: {}]   ;;  %s10802_s9 = inlined_call_operand.vmem [shape: bf16[9,8,16], index: 9, kind: input, shape index: {}]   ;;  %s10803_s10 = inlined_call_operand.vmem [shape: f32[8,1], index: 10, kind: input, shape index: {}]   ;;  %s10804_s11 = inlined_call_operand.vmem [shape: bf16[2,8], index: 11, kind: input, shape index: {}]   ;;  %s10805_s12 = inlined_call_operand.vmem [shape: f32[2,1], index: 12, kind: input, shape index: {}]   ;;  %s10806_s13 = inlined_call_operand.hbm [shape: f32[2,1,4], index: 13, kind: output, shape index: {}]  }
   0x1   :  { %10839 = sst [smem:[#allocation48_spill]] %s10793_s0 }
   0x2   :  { %10840 = sst [smem:[#allocation49_spill]] %s10794_s1 }
   0x3   :  { %10841 = sst [smem:[#allocation50_spill]] %s10796_s3 }
   0x4   :  { %10842 = sst [smem:[#allocation51_spill]] %s10797_s4 }
   0x5   :  { %18 = vsyncpa [#allocation4], 0 }
   0x6   :  { %20 = vsyncpa [#allocation4 + $0x1], 0  ;;  %s8322_s25 = smov 0   ;;  %s8324_s26 = smov 0  }
   0x7   :  { %s8326_s27 = smov 0   ;;  %s8328_s28 = smov 0  }
   0x8 LB: > { %10843 = sst [smem:[#allocation6_spill]] %s8231_s27  ;;  %s8343_s29 = sadd.s32 4294967295, %s8235_s28   ;;  %s8235_s28 = sphi %s8328_s28, %s10975_s28   ;;  %s8231_s27 = sphi %s8326_s27, %s10972_s27   ;;  %s8227_s26 = sphi %s8324_s26, %s10974_s26   ;;  %s8223_s25 = sphi %s8322_s25, %s10973_s25  }
   0x9   : > { %s7075_s30 = sadd.s32 4294967294, %s8235_s28   ;;  %s8347_s14 = sadd.s32 1, %s8235_s28  }
   0xa   : > { %s311_s15 = sadd.s32 1, %s8231_s27  ;;  %s308_s16 = ssub.s32 %s8235_s28, %s8347_s14 }
   0xb   : > { %p321_p0 = scmp.ne.s32.totalorder %s8231_s27, %s8227_s26  ;;  %p309_p1 = scmp.eq.s32.totalorder %s308_s16, 0 }
   0xc   : > { %p322_p2 = scmp.eq.s32.totalorder %s8343_s29, 1  ;;  %p327_p3 = scmp.ne.s32.totalorder %s8227_s26, %s8223_s25 }
   0xd   : > { %p328_p4 = scmp.eq.s32.totalorder %s7075_s30, 1  ;;  %p7078_p7 = scmp.ge.s32.totalorder %s8235_s28, 1 }
   0xe   : > { %s8358_s17 = scalar_select %p309_p1, %s8231_s27, %s311_s15  }
   0xf   : > { %p8360_p5 = por %p322_p2, %p321_p0  ;;  %p8364_p6 = por %p328_p4, %p327_p3 }
  0x10   : > { %10844 = sst [smem:[#allocation7_spill]] %s8358_s17  ;;  %p390_p8 = scmp.lt.s32.totalorder %s8235_s28, 3 }
  0x12   : > { %p391_p9 = pnand %p7078_p7, %p390_p8 }
  0x14   : > { %394 = sbr.rel (%p391_p9) target bundleno = 3174 (0xc66), region = 72 }
  0x19   : > { %p433_p10 = scmp.lt.s32.totalorder %s8343_s29, 1  ;;  %v501_v0 = vlaneseq  ;;  %v8237_v1 = vmov 1983009808   ;;  %s10847_s3 = sld [smem:[#allocation50_spill]]  ;;  %vm522_vm0 = vcmask 31744   ;;  %v10823_v7 = vmov 0  }
  0x1a   : > { %v499_v2 = vunpack.c.l.s4 %v8237_v1  ;;  %577 = vmatprep.mubr.bf16.mxu0 %v10823_v7  ;;  %8094 = vset.pattern.permute.xlu1 %v10823_v7  ;;  %s10848_s0 = sld [smem:[#allocation48_spill]]  ;;  %s10821_s16 = smov 127   ;;  %vm535_vm1 = vcmask 1041408   ;;  %vm519_vm2 = vcmask 1039360   ;;  %vm1154_vm3 = vcmask 900096  }
  0x1b   : > { %s434_s20 = scalar_select %p433_p10, %s8343_s29, 1  ;;  %v8372_v3 = vshrl.u32 %v501_v0, 7  ;;  %8093 = vset.pattern.permute.xlu0 %v10823_v7  ;;  %vm915_vm4 = vcmask 1031168   ;;  %vm1632_vm5 = vcmask 883712   ;;  %vm1393_vm6 = vcmask 891904  }
  0x1c   : > { %v500_v5 = vunpack.c.0.s8 %v499_v2  ;;  %s10817_s21 = smov 110   ;;  %s10815_s22 = smov 109   ;;  %vm2110_vm7 = vcmask 744448   ;;  %vm1871_vm8 = vcmask 752640   ;;  %vm2349_vm9 = vcmask 736256  }
  0x1d   : > { %s8039_s23 = smul.u32 6, %s434_s20  ;;  %s10819_s20 = smov 126   ;;  %vm439_vm10 = vcmask 150528   ;;  %vm448_vm11 = vcmask 568728   ;;  %vm2808_vm12 = vcmask 1043608   ;;  %vm2809_vm13 = vcmask 1047556  }
  0x1e   : > { %v8382_v6 = vsub.s32 %v500_v5, %v8372_v3  ;;  %s10813_s24 = smov 92   ;;  %s10809_s30 = smov 91   ;;  %vm2775_vm14 = vcmask 154624   ;;  %vm9312_vm15 = vmor %vm2809_vm13, %vm2808_vm12  ;;  %vm4653_vm12 = vcmask 261120   ;;  %vm5799_vm13 = vcmask 130048  }
  0x1f   : > { %v8377_v4 = vld [vmem:[%s10847_s3 + $0x30] sm:$0xff]   ;;  %v8101_v51 = vld [vmem:[%s10847_s3 + $0x38] sm:$0xff]   ;;  %v8102_v57 = vld [vmem:[%s10847_s3 + $0x20] sm:$0xff]   ;;  %s10849_s4 = sld [smem:[#allocation51_spill]] }
  0x20   : > { %7692 = vmatprep.mubr.msk.bf16.mxu1 %vm522_vm0, %v8377_v4  ;;  %s8389_s15 = scalar_lea.vmem %s10848_s0, %s8039_s23  ;;  %s10807_s23 = smov 108   ;;  %v8103_v61 = vld [vmem:[%s10847_s3] sm:$0xff]   ;;  %v8104_v0 = vld [vmem:[%s10847_s3 + $0x28] sm:$0xff]  }
  0x21   : > { %v458_v8 = vld [vmem:[%s8389_s15] sm:$0x3f]  ;;  %v8105_v5 = vld [vmem:[%s10847_s3 + $0x8] sm:$0xff]   ;;  %s10887_s1 = sld [smem:[#allocation49_spill]] }
  0x22   : > { %v8394_v9 = vrot.slane %v458_v8, %v8382_v6  ;;  %v497_v10 = vcombine.high %v458_v8, %v458_v8  ;;  %v862_v11 = vld [vmem:[%s8389_s15] sm:$0x3f]  ;;  %v8108_v8 = vld [vmem:[%s10847_s3 + $0x18] sm:$0xff]  }
  0x23   : > { %v1101_v14 = vld [vmem:[%s8389_s15] sm:$0x3f]  ;;  %v900_v15 = vrot.slane %v862_v11, %v8382_v6  ;;  %v893_v16 = vcombine.high %v862_v11, %v862_v11 }
  0x24   : > { %513 = vrot.lane.b32.xlu0 %v8394_v9, %s10821_s16  ;;  %v8400_v12 = vrot.slane %v497_v10, %v8382_v6  ;;  %v8404_v13 = vcombine.high %v8394_v9, %v8394_v9  ;;  %v1132_v18 = vcombine.high %v1101_v14, %v1101_v14  ;;  %v1139_v21 = vrot.slane %v1101_v14, %v8382_v6  ;;  %v1340_v22 = vld [vmem:[%s8389_s15] sm:$0x3f] }
  0x25   : > { %v908_v17 = vcombine.high %v900_v15, %v900_v15  ;;  %v907_v19 = vrot.slane %v893_v16, %v8382_v6  ;;  %v1579_v24 = vld [vmem:[%s8389_s15] sm:$0x3f]  ;;  %v1378_v25 = vrot.slane %v1340_v22, %v8382_v6  ;;  %v1371_v26 = vcombine.high %v1340_v22, %v1340_v22 }
  0x26   : > { %517 = vrot.lane.b32.xlu1 %v8400_v12, %s10821_s16  ;;  %v1146_v20 = vrot.slane %v1132_v18, %v8382_v6  ;;  %v1147_v23 = vcombine.high %v1139_v21, %v1139_v21  ;;  %v1610_v28 = vcombine.high %v1579_v24, %v1579_v24  ;;  %v1617_v31 = vrot.slane %v1579_v24, %v8382_v6  ;;  %v1818_v32 = vld [vmem:[%s8389_s15] sm:$0x3f] }
  0x27   : > { %v1386_v27 = vcombine.high %v1378_v25, %v1378_v25  ;;  %v1385_v29 = vrot.slane %v1371_v26, %v8382_v6  ;;  %v2057_v34 = vld [vmem:[%s8389_s15] sm:$0x3f]  ;;  %v1856_v35 = vrot.slane %v1818_v32, %v8382_v6  ;;  %v1849_v36 = vcombine.high %v1818_v32, %v1818_v32 }
  0x28   : > { %515 = vrot.lane.b32.xlu0 %v8404_v13, %s10821_s16  ;;  %v1624_v30 = vrot.slane %v1610_v28, %v8382_v6  ;;  %v1625_v33 = vcombine.high %v1617_v31, %v1617_v31  ;;  %v2088_v38 = vcombine.high %v2057_v34, %v2057_v34  ;;  %v2095_v41 = vrot.slane %v2057_v34, %v8382_v6  ;;  %v2296_v43 = vld [vmem:[%s8389_s15] sm:$0x3f]  ;;  %s10933_s16 = smov 126   ;;  %s10938_s15 = smov 91  }
  0x29   : > { %v1864_v37 = vcombine.high %v1856_v35, %v1856_v35  ;;  %v1863_v39 = vrot.slane %v1849_v36, %v8382_v6  ;;  %v2334_v44 = vrot.slane %v2296_v43, %v8382_v6  ;;  %v2327_v45 = vcombine.high %v2296_v43, %v2296_v43  ;;  %v8119_v32 = vld [vmem:[%s10847_s3 + $0x80] sm:$0xff]   ;;  %v8120_v36 = vld [vmem:[%s10847_s3 + $0x88] sm:$0xff]   ;;  %v8122_v43 = vld [vmem:[%s10847_s3 + $0x98] sm:$0xff]  }
  0x2a   : > { %909 = vrot.lane.b32.xlu1 %v900_v15, %s10819_s20  ;;  %v2102_v40 = vrot.slane %v2088_v38, %v8382_v6  ;;  %v2103_v42 = vcombine.high %v2095_v41, %v2095_v41  ;;  %v716_v55 = vsel %vm535_vm1, %v8394_v9, 0  ;;  %v722_v10 = vsel %vm535_vm1, %v8400_v12, 0  ;;  %v8111_v15 = vld [vmem:[%s10847_s3 + $0x48] sm:$0xff]  }
  0x2b   : > { %v2342_v46 = vcombine.high %v2334_v44, %v2334_v44  ;;  %v2341_v47 = vrot.slane %v2327_v45, %v8382_v6  ;;  %v8107_v6 = vld [vmem:[%s10847_s3 + $0x10] sm:$0xff]   ;;  %v8123_v45 = vld [vmem:[%s10847_s3 + $0xa0] sm:$0xff]  }
  0x2c   : > { %911 = vrot.lane.b32.xlu0 %v908_v17, %s10819_s20 }
  0x2e   : > { %913 = vrot.lane.b32.xlu1 %v907_v19, %s10819_s20  ;;  %s10936_s20 = smov 108  }
  0x30   : > { %1152 = vrot.lane.b32.xlu0 %v1146_v20, %s10817_s21 }
  0x32   : > { %1148 = vrot.lane.b32.xlu1 %v1139_v21, %s10817_s21  ;;  %v8113_v21 = vld [vmem:[%s10847_s3 + $0x58] sm:$0xff]  }
  0x34   : > { %1150 = vrot.lane.b32.xlu0 %v1147_v23, %s10817_s21  ;;  %v8114_v23 = vld [vmem:[%s10847_s3 + $0x60] sm:$0xff]   ;;  %s10935_s21 = smov 109  }
  0x36   : > { %1387 = vrot.lane.b32.xlu1 %v1378_v25, %s10815_s22 }
  0x38   : > { %1389 = vrot.lane.b32.xlu0 %v1386_v27, %s10815_s22 }
  0x3a   : > { %1391 = vrot.lane.b32.xlu1 %v1385_v29, %s10815_s22  ;;  %v8116_v29 = vld [vmem:[%s10847_s3 + $0x68] sm:$0xff]   ;;  %s10825_s22 = smov 19  }
  0x3c   : > { %1630 = vrot.lane.b32.xlu0 %v1624_v30, %s10807_s23  ;;  %v8117_v30 = vld [vmem:[%s10847_s3 + $0x70] sm:$0xff]  }
  0x3e   : > { %1626 = vrot.lane.b32.xlu1 %v1617_v31, %s10807_s23  ;;  %v8118_v31 = vld [vmem:[%s10847_s3 + $0x78] sm:$0xff]  }
  0x40   : > { %1628 = vrot.lane.b32.xlu0 %v1625_v33, %s10807_s23  ;;  %s10811_s23 = smov 90  }
  0x42   : > { %1865 = vrot.lane.b32.xlu1 %v1856_v35, %s10813_s24 }
  0x44   : > { %1867 = vrot.lane.b32.xlu0 %v1864_v37, %s10813_s24  ;;  %v8121_v37 = vld [vmem:[%s10847_s3 + $0x90] sm:$0xff]  }
  0x46   : > { %1869 = vrot.lane.b32.xlu1 %v1863_v39, %s10813_s24  ;;  %s10934_s24 = smov 110  }
  0x48   : > { %2108 = vrot.lane.b32.xlu0 %v2102_v40, %s10809_s30 }
  0x4a   : > { %2104 = vrot.lane.b32.xlu1 %v2095_v41, %s10809_s30 }
  0x4c   : > { %2106 = vrot.lane.b32.xlu0 %v2103_v42, %s10809_s30  ;;  %s10937_s30 = smov 92  }
  0x4e   : > { %2343 = vrot.lane.b32.xlu1 %v2334_v44, %s10811_s23 }
  0x50   : > { %2345 = vrot.lane.b32.xlu0 %v2342_v46, %s10811_s23 }
  0x52   : > { %2347 = vrot.lane.b32.xlu1 %v2341_v47, %s10811_s23  ;;  %s10932_s23 = smov 127  }
  0x96   : > { %v514_v48 = vpop.permute.xlu0 %513 }
  0x98   : > { %v518_v49 = vpop.permute.xlu1 %517 }
  0x99   : > { %8030 = vmatprep.subr.msk.bf16.mxu1 %vm535_vm1, %v518_v49  ;;  %v543_v50 = vsel %vm535_vm1, %v518_v49, 0 }
  0x9a   : > { %v516_v52 = vpop.permute.xlu0 %515  ;;  %8028 = vmatpush3.bf16.msra.mxu1 %v543_v50 }
  0x9b   : > { %v521_v53 = vsel %vm519_vm2, %v516_v52, %v518_v49  ;;  %v520_v54 = vsel %vm519_vm2, %v514_v48, %v516_v52  ;;  %7105 = vmatprep.subr.msk.bf16.mxu1 %vm535_vm1, %v8404_v13  ;;  %v8125_v52 = vld [vmem:[%s10847_s3 + $0xb0] sm:$0xff]  }
  0x9c   : > { %7092 = vmatprep.subr.msk.bf16.mxu0 %vm535_vm1, %v521_v53  ;;  %v537_v56 = vsel %vm535_vm1, %v520_v54, 0  ;;  %v910_v58 = vpop.permute.xlu1 %909  ;;  %v2542_v53 = vld [vmem:[%s10849_s4 + $0x38] sm:$0xff] }
  0x9d   : > { %560 = vmatpush1.bf16.msra.mxu0 %v537_v56  ;;  %7693 = vmatmul.mubr.msk.bf16.vlgmr.msra.gmra.mxu1 %vm522_vm0, %v8101_v51  ;;  %v8126_v54 = vld [vmem:[%s10847_s3 + $0xb8] sm:$0xff]  }
  0x9e   : > { %8029 = vmatprep.subr.msk.bf16.mxu0 %vm535_vm1, %v518_v49  ;;  %739 = vmatpush1.bf16.msra.mxu1 %v716_v55  ;;  %v912_v59 = vpop.permute.xlu0 %911  ;;  %v8127_v55 = vld [vmem:[%s10847_s3 + $0xc0] sm:$0xff]  }
  0x9f   : > { %756 = vmatprep.mubr.bf16.mxu1 %v10823_v7  ;;  %v916_v16 = vsel %vm915_vm4, %v910_v58, %v912_v59  ;;  %2580 = vperm.xlu1 %8094, %v2542_v53   ;;  %v2539_v58 = vld [vmem:[%s10849_s4 + $0x20] sm:$0xff] }
  0xa0   : > { %7093 = vmatmul.mubr.msk.bf16.vlgmr.msra.gmra.mxu0 %vm522_vm0, %v8102_v57  ;;  %v914_v60 = vpop.permute.xlu1 %913  ;;  %v931_v20 = vsel %vm535_vm1, %v916_v16, 0  ;;  %v8132_v16 = vld [vmem:[%s10847_s3 + $0xe8] sm:$0xff]  }
  0xa1   : > { %7687 = vmatpush3.bf16.msra.mxu0 %v543_v50  ;;  %587 = vmatprep.mubr.bf16.mxu0 %v10823_v7  ;;  %v937_v63 = vsel %vm535_vm1, %v914_v60, 0  ;;  %v917_v13 = vsel %vm915_vm4, %v912_v59, %v914_v60 }
  0xa2   : > { %8031 = vmatprep.subr.msk.bf16.mxu0 %vm535_vm1, %v8400_v12  ;;  %8032 = vmatprep.subr.msk.bf16.mxu1 %vm535_vm1, %v914_v60  ;;  %v8478_v62 = vpop.permute.xlu0 %1152  ;;  %v8112_v12 = vld [vmem:[%s10847_s3 + $0x50] sm:$0xff]   ;;  %v2540_v60 = vld [vmem:[%s10849_s4 + $0x28] sm:$0xff] }
  0xa3   : > { %v1176_v27 = vsel %vm535_vm1, %v8478_v62, 0  ;;  %2565 = vperm.xlu1 %8094, %v2539_v58  }
  0xa4   : > { %v1149_v9 = vpop.permute.xlu1 %1148 }
  0xa5   : > { %7106 = vmatmul.mubr.msk.bf16.vlgmr.msra.gmra.mxu1 %vm522_vm0, %v8103_v61 }
  0xa6   : > { %766 = vmatprep.mubr.bf16.mxu1 %v10823_v7  ;;  %7707 = vmatpush3.bf16.msra.mxu1 %v937_v63  ;;  %v1151_v1 = vpop.permute.xlu0 %1150  ;;  %v8128_v63 = vld [vmem:[%s10847_s3 + $0xc8] sm:$0xff]  }
  0xa7   : > { %v1156_v2 = vsel %vm1154_vm3, %v1151_v1, %v8478_v62  ;;  %v1155_v14 = vsel %vm1154_vm3, %v1149_v9, %v1151_v1  ;;  %v2538_v1 = vld [vmem:[%s10849_s4 + $0x18] sm:$0xff]  ;;  %v2536_v9 = vld [vmem:[%s10849_s4 + $0x8] sm:$0xff] }
  0xa8   : > { %7094 = vmatmul.mubr.msk.bf16.gmra.mxu0 %vm522_vm0, %v8104_v0  ;;  %7147 = vmatprep.subr.msk.bf16.mxu1 %vm535_vm1, %v1156_v2  ;;  %v8516_v11 = vpop.permute.xlu1 %1387  ;;  %v1170_v17 = vsel %vm535_vm1, %v1155_v14, 0  ;;  %v2535_v2 = vld [vmem:[%s10849_s4] sm:$0xff] }
  0xa9   : > { %597 = vmatprep.mubr.bf16.mxu0 %v10823_v7 }
  0xaa   : > { %v1390_v19 = vpop.permute.xlu0 %1389 }
  0xab   : > { %v1394_v38 = vsel %vm1393_vm6, %v8516_v11, %v1390_v19  ;;  %v8131_v11 = vld [vmem:[%s10847_s3 + $0xe0] sm:$0xff]  }
  0xac   : > { %v1392_v18 = vpop.permute.xlu1 %1391  ;;  %v1409_v42 = vsel %vm535_vm1, %v1394_v38, 0 }
  0xad   : > { %7107 = vmatmul.mubr.msk.bf16.gmra.mxu1 %vm522_vm0, %v8105_v5  ;;  %v1415_v25 = vsel %vm535_vm1, %v1392_v18, 0  ;;  %v1395_v28 = vsel %vm1393_vm6, %v1390_v19, %v1392_v18  ;;  %v8135_v19 = vld [vmem:[%s10847_s3 + $0x100] sm:$0xff]  }
  0xae   : > { %776 = vmatprep.mubr.bf16.mxu1 %v10823_v7  ;;  %v8542_v22 = vpop.permute.xlu0 %1630 }
  0xaf   : > { %v1654_v49 = vsel %vm535_vm1, %v8542_v22, 0 }
  0xb0   : > { %7095 = vmatmul.mubr.msk.bf16.gmra.mxu0 %vm522_vm0, %v8377_v4  ;;  %v8110_v4 = vld [vmem:[%s10847_s3 + $0x40] sm:$0xff]   ;;  %v1627_v33 = vpop.permute.xlu1 %1626 }
  0xb1   : > { %607 = vmatprep.mubr.bf16.mxu0 %v10823_v7 }
  0xb2   : > { %v1629_v24 = vpop.permute.xlu0 %1628 }
  0xb3   : > { %v1634_v26 = vsel %vm1632_vm5, %v1629_v24, %v8542_v22  ;;  %v1633_v35 = vsel %vm1632_vm5, %v1627_v33, %v1629_v24  ;;  %v8138_v24 = vld [vmem:[%s10847_s3 + $0x118] sm:$0xff]  }
  0xb4   : > { %v8585_v34 = vpop.permute.xlu1 %1865  ;;  %v1648_v39 = vsel %vm535_vm1, %v1633_v35, 0 }
  0xb5   : > { %7108 = vmatmul.mubr.msk.bf16.gmra.mxu1 %vm522_vm0, %v8107_v6 }
  0xb6   : > { %786 = vmatprep.mubr.bf16.mxu1 %v10823_v7  ;;  %v8600_v41 = vpop.permute.xlu0 %1867 }
  0xb8   : > { %7096 = vmatmul.mubr.msk.bf16.gmra.mxu0 %vm522_vm0, %v8101_v51  ;;  %v1870_v40 = vpop.permute.xlu1 %1869  ;;  %v8124_v51 = vld [vmem:[%s10847_s3 + $0xa8] sm:$0xff]  }
  0xb9   : > { %7688 = vmatprep.mubr.msk.bf16.mxu0 %vm522_vm0, %v8102_v57  ;;  %v1893_v47 = vsel %vm535_vm1, %v1870_v40, 0  ;;  %v1873_v50 = vsel %vm1871_vm8, %v8600_v41, %v1870_v40  ;;  %v2541_v57 = vld [vmem:[%s10849_s4 + $0x30] sm:$0xff] }
  0xba   : > { %v8612_v44 = vpop.permute.xlu0 %2108  ;;  %2575 = vperm.xlu0 %8093, %v2541_v57  }
  0xbc   : > { %v2105_v56 = vpop.permute.xlu1 %2104 }
  0xbd   : > { %7109 = vmatmul.mubr.msk.bf16.gmra.mxu1 %vm522_vm0, %v8108_v8 }
  0xbe   : > { %7708 = vmatprep.mubr.msk.bf16.mxu1 %vm522_vm0, %v8110_v4  ;;  %v2107_v46 = vpop.permute.xlu0 %2106  ;;  %2570 = vperm.xlu0 %8093, %v2540_v60  }
  0xbf   : > { %v2112_v48 = vsel %vm2110_vm7, %v2107_v46, %v8612_v44 }
  0xc0   : > { %7689 = vmatmul.mubr.msk.bf16.vlgmr.msra.gmra.mxu0 %vm522_vm0, %v8104_v0  ;;  %v8665_v59 = vpop.permute.xlu1 %2343  ;;  %v8129_v0 = vld [vmem:[%s10847_s3 + $0xd0] sm:$0xff]  }
  0xc1   : > { %7697 = vmatpush3.bf16.msra.mxu0 %v722_v10  ;;  %7698 = vmatprep.mubr.msk.bf16.mxu0 %vm522_vm0, %v8103_v61  ;;  %v2537_v61 = vld [vmem:[%s10849_s4 + $0x10] sm:$0xff]  ;;  %v8130_v10 = vld [vmem:[%s10847_s3 + $0xd8] sm:$0xff]  }
  0xc2   : > { %7126 = vmatprep.subr.msk.bf16.mxu0 %vm535_vm1, %v917_v13  ;;  %2555 = vperm.xlu1 %8094, %v2537_v61   ;;  %v2346_v14 = vpop.permute.xlu0 %2345 }
  0xc3   : > { %2560 = vperm.xlu0 %8093, %v2538_v1  }
  0xc5   : > { %7709 = vmatmul.mubr.msk.bf16.vlgmr.msra.gmra.mxu1 %vm522_vm0, %v8111_v15 }
  0xc6   : > { %7712 = vmatprep.mubr.msk.bf16.mxu1 %vm522_vm0, %v8112_v12  ;;  %1193 = vmatpush1.bf16.msra.mxu1 %v1170_v17  ;;  %v8133_v17 = vld [vmem:[%s10847_s3 + $0xf0] sm:$0xff]  }
  0xc7   : > { %8034 = vmatprep.subr.msk.bf16.mxu1 %vm535_vm1, %v1392_v18  ;;  %2545 = vperm.xlu1 %8094, %v2535_v2   ;;  %v8134_v18 = vld [vmem:[%s10847_s3 + $0xf8] sm:$0xff]  }
  0xc8   : > { %7699 = vmatmul.mubr.msk.bf16.vlgmr.msra.gmra.mxu0 %vm522_vm0, %v8105_v5  ;;  %v1872_v5 = vsel %vm1871_vm8, %v8585_v34, %v8600_v41  ;;  %2550 = vperm.xlu0 %8093, %v2536_v9  }
  0xc9   : > { %954 = vmatpush1.bf16.msra.mxu0 %v931_v20  ;;  %7702 = vmatprep.mubr.msk.bf16.mxu0 %vm522_vm0, %v8107_v6  ;;  %v8136_v20 = vld [vmem:[%s10847_s3 + $0x108] sm:$0xff]  }
  0xca   : > { %8033 = vmatprep.subr.msk.bf16.mxu0 %vm535_vm1, %v8478_v62  ;;  %v2111_v62 = vsel %vm2110_vm7, %v2105_v56, %v2107_v46 }
  0xcb   : > { %v2126_v6 = vsel %vm535_vm1, %v2111_v62, 0 }
  0xcd   : > { %7713 = vmatmul.mubr.msk.bf16.gmra.mxu1 %vm522_vm0, %v8113_v21 }
  0xce   : > { %1210 = vmatprep.mubr.bf16.mxu1 %v10823_v7 }
  0xd0   : > { %7703 = vmatmul.mubr.msk.bf16.gmra.mxu0 %vm522_vm0, %v8108_v8  ;;  %v2348_v8 = vpop.permute.xlu1 %2347 }
  0xd1   : > { %971 = vmatprep.mubr.bf16.mxu0 %v10823_v7  ;;  %v2371_v13 = vsel %vm535_vm1, %v2348_v8, 0 }
  0xd5   : > { %7148 = vmatmul.mubr.msk.bf16.vlgmr.msra.gmra.mxu1 %vm522_vm0, %v8114_v23 }
  0xd6   : > { %1220 = vmatprep.mubr.bf16.mxu1 %v10823_v7  ;;  %7727 = vmatpush3.bf16.msra.mxu1 %v1415_v25 }
  0xd7   : > { %7189 = vmatprep.subr.msk.bf16.mxu1 %vm535_vm1, %v1634_v26 }
  0xd8   : > { %7127 = vmatmul.mubr.msk.bf16.vlgmr.msra.gmra.mxu0 %vm522_vm0, %v8110_v4  ;;  %v1887_v4 = vsel %vm535_vm1, %v1872_v5, 0 }
  0xd9   : > { %7717 = vmatpush3.bf16.msra.mxu0 %v1176_v27  ;;  %981 = vmatprep.mubr.bf16.mxu0 %v10823_v7 }
  0xda   : > { %7168 = vmatprep.subr.msk.bf16.mxu0 %vm535_vm1, %v1395_v28 }
  0xdd   : > { %7149 = vmatmul.mubr.msk.bf16.gmra.mxu1 %vm522_vm0, %v8116_v29 }
  0xde   : > { %1230 = vmatprep.mubr.bf16.mxu1 %v10823_v7 }
  0xe0   : > { %7128 = vmatmul.mubr.msk.bf16.gmra.mxu0 %vm522_vm0, %v8111_v15  ;;  %v2132_v15 = vsel %vm535_vm1, %v8612_v44, 0 }
  0xe1   : > { %991 = vmatprep.mubr.bf16.mxu0 %v10823_v7 }
  0xe5   : > { %7150 = vmatmul.mubr.msk.bf16.gmra.mxu1 %vm522_vm0, %v8117_v30 }
  0xe6   : > { %1240 = vmatprep.mubr.bf16.mxu1 %v10823_v7 }
  0xe8   : > { %7129 = vmatmul.mubr.msk.bf16.gmra.mxu0 %vm522_vm0, %v8112_v12  ;;  %v2351_v12 = vsel %vm2349_vm9, %v2346_v14, %v2348_v8 }
  0xe9   : > { %1001 = vmatprep.mubr.bf16.mxu0 %v10823_v7 }
  0xed   : > { %7151 = vmatmul.mubr.msk.bf16.gmra.mxu1 %vm522_vm0, %v8118_v31 }
  0xee   : > { %7728 = vmatprep.mubr.msk.bf16.mxu1 %vm522_vm0, %v8119_v32 }
  0xf0   : > { %7130 = vmatmul.mubr.msk.bf16.gmra.mxu0 %vm522_vm0, %v8113_v21  ;;  %v8137_v21 = vld [vmem:[%s10847_s3 + $0x110] sm:$0xff]   ;;  %s10967_s3 = smov 19  }
  0xf1   : > { %7718 = vmatprep.mubr.msk.bf16.mxu0 %vm522_vm0, %v8114_v23 }
  0xf5   : > { %7729 = vmatmul.mubr.msk.bf16.vlgmr.msra.gmra.mxu1 %vm522_vm0, %v8120_v36 }
  0xf6   : > { %7732 = vmatprep.mubr.msk.bf16.mxu1 %vm522_vm0, %v8121_v37  ;;  %1671 = vmatpush1.bf16.msra.mxu1 %v1648_v39 }
  0xf7   : > { %8036 = vmatprep.subr.msk.bf16.mxu1 %vm535_vm1, %v1870_v40 }
  0xf8   : > { %7719 = vmatmul.mubr.msk.bf16.vlgmr.msra.gmra.mxu0 %vm522_vm0, %v8116_v29 }
  0xf9   : > { %1432 = vmatpush1.bf16.msra.mxu0 %v1409_v42  ;;  %7722 = vmatprep.mubr.msk.bf16.mxu0 %vm522_vm0, %v8117_v30 }
  0xfa   : > { %8035 = vmatprep.subr.msk.bf16.mxu0 %vm535_vm1, %v8542_v22  ;;  %v2350_v22 = vsel %vm2349_vm9, %v8665_v59, %v2346_v14 }
  0xfb   : > { %v2365_v23 = vsel %vm535_vm1, %v2350_v22, 0 }
  0xfd   : > { %7733 = vmatmul.mubr.msk.bf16.gmra.mxu1 %vm522_vm0, %v8122_v43 }
  0xfe   : > { %1688 = vmatprep.mubr.bf16.mxu1 %v10823_v7 }
 0x100   : > { %7723 = vmatmul.mubr.msk.bf16.gmra.mxu0 %vm522_vm0, %v8118_v31 }
 0x101   : > { %1449 = vmatprep.mubr.bf16.mxu0 %v10823_v7 }
 0x105   : > { %7190 = vmatmul.mubr.msk.bf16.vlgmr.msra.gmra.mxu1 %vm522_vm0, %v8123_v45 }
 0x106   : > { %1698 = vmatprep.mubr.bf16.mxu1 %v10823_v7  ;;  %7747 = vmatpush3.bf16.msra.mxu1 %v1893_v47 }
 0x107   : > { %7231 = vmatprep.subr.msk.bf16.mxu1 %vm535_vm1, %v2112_v48 }
 0x108   : > { %7169 = vmatmul.mubr.msk.bf16.vlgmr.msra.gmra.mxu0 %vm522_vm0, %v8119_v32 }
 0x109   : > { %7737 = vmatpush3.bf16.msra.mxu0 %v1654_v49  ;;  %1459 = vmatprep.mubr.bf16.mxu0 %v10823_v7 }
 0x10a   : > { %7210 = vmatprep.subr.msk.bf16.mxu0 %vm535_vm1, %v1873_v50 }
 0x10d   : > { %7191 = vmatmul.mubr.msk.bf16.gmra.mxu1 %vm522_vm0, %v8124_v51 }
 0x10e   : > { %1708 = vmatprep.mubr.bf16.mxu1 %v10823_v7 }
 0x110   : > { %7170 = vmatmul.mubr.msk.bf16.gmra.mxu0 %vm522_vm0, %v8120_v36 }
 0x111   : > { %1469 = vmatprep.mubr.bf16.mxu0 %v10823_v7 }
 0x115   : > { %7192 = vmatmul.mubr.msk.bf16.gmra.mxu1 %vm522_vm0, %v8125_v52 }
 0x116   : > { %1718 = vmatprep.mubr.bf16.mxu1 %v10823_v7 }
 0x118   : > { %7171 = vmatmul.mubr.msk.bf16.gmra.mxu0 %vm522_vm0, %v8121_v37 }
 0x119   : > { %1479 = vmatprep.mubr.bf16.mxu0 %v10823_v7 }
 0x11d   : > { %7193 = vmatmul.mubr.msk.bf16.gmra.mxu1 %vm522_vm0, %v8126_v54 }
 0x11e   : > { %7748 = vmatprep.mubr.msk.bf16.mxu1 %vm522_vm0, %v8127_v55 }
 0x120   : > { %7172 = vmatmul.mubr.msk.bf16.gmra.mxu0 %vm522_vm0, %v8122_v43 }
 0x121   : > { %7738 = vmatprep.mubr.msk.bf16.mxu0 %vm522_vm0, %v8123_v45 }
 0x125   : > { %7749 = vmatmul.mubr.msk.bf16.vlgmr.msra.gmra.mxu1 %vm522_vm0, %v8128_v63 }
 0x126   : > { %7752 = vmatprep.mubr.msk.bf16.mxu1 %vm522_vm0, %v8129_v0  ;;  %2149 = vmatpush1.bf16.msra.mxu1 %v2126_v6 }
 0x127   : > { %8038 = vmatprep.subr.msk.bf16.mxu1 %vm535_vm1, %v2348_v8 }
 0x128   : > { %7739 = vmatmul.mubr.msk.bf16.vlgmr.msra.gmra.mxu0 %vm522_vm0, %v8124_v51 }
 0x129   : > { %1910 = vmatpush1.bf16.msra.mxu0 %v1887_v4  ;;  %7742 = vmatprep.mubr.msk.bf16.mxu0 %vm522_vm0, %v8125_v52 }
 0x12a   : > { %8037 = vmatprep.subr.msk.bf16.mxu0 %vm535_vm1, %v8612_v44 }
 0x12d   : > { %7753 = vmatmul.mubr.msk.bf16.gmra.mxu1 %vm522_vm0, %v8130_v10 }
 0x12e   : > { %2166 = vmatprep.mubr.bf16.mxu1 %v10823_v7 }
 0x130   : > { %7743 = vmatmul.mubr.msk.bf16.gmra.mxu0 %vm522_vm0, %v8126_v54 }
 0x131   : > { %1927 = vmatprep.mubr.bf16.mxu0 %v10823_v7 }
 0x135   : > { %7232 = vmatmul.mubr.msk.bf16.vlgmr.msra.gmra.mxu1 %vm522_vm0, %v8131_v11 }
 0x136   : > { %2176 = vmatprep.mubr.bf16.mxu1 %v10823_v7  ;;  %7767 = vmatpush3.bf16.msra.mxu1 %v2371_v13 }
 0x138   : > { %7211 = vmatmul.mubr.msk.bf16.vlgmr.msra.gmra.mxu0 %vm522_vm0, %v8127_v55 }
 0x139   : > { %7757 = vmatpush3.bf16.msra.mxu0 %v2132_v15  ;;  %1937 = vmatprep.mubr.bf16.mxu0 %v10823_v7 }
 0x13a   : > { %7252 = vmatprep.subr.msk.bf16.mxu0 %vm535_vm1, %v2351_v12 }
 0x13d   : > { %7233 = vmatmul.mubr.msk.bf16.gmra.mxu1 %vm522_vm0, %v8132_v16 }
 0x13e   : > { %2186 = vmatprep.mubr.bf16.mxu1 %v10823_v7 }
 0x140   : > { %7212 = vmatmul.mubr.msk.bf16.gmra.mxu0 %vm522_vm0, %v8128_v63 }
 0x141   : > { %1947 = vmatprep.mubr.bf16.mxu0 %v10823_v7 }
 0x145   : > { %7234 = vmatmul.mubr.msk.bf16.gmra.mxu1 %vm522_vm0, %v8133_v17 }
 0x146   : > { %2196 = vmatprep.mubr.bf16.mxu1 %v10823_v7 }
 0x148   : > { %7213 = vmatmul.mubr.msk.bf16.gmra.mxu0 %vm522_vm0, %v8129_v0 }
 0x149   : > { %1957 = vmatprep.mubr.bf16.mxu0 %v10823_v7 }
 0x14d   : > { %7235 = vmatmul.mubr.msk.bf16.gmra.mxu1 %vm522_vm0, %v8134_v18 }
 0x14e   : > { %7768 = vmatprep.mubr.msk.bf16.mxu1 %vm522_vm0, %v8135_v19 }
 0x150   : > { %7214 = vmatmul.mubr.msk.bf16.gmra.mxu0 %vm522_vm0, %v8130_v10 }
 0x151   : > { %7758 = vmatprep.mubr.msk.bf16.mxu0 %vm522_vm0, %v8131_v11 }
 0x155   : > { %7769 = vmatmul.mubr.msk.bf16.vlgmr.msra.gmra.mxu1 %vm522_vm0, %v8136_v20 }
 0x156   : > { %7772 = vmatprep.mubr.msk.bf16.mxu1 %vm522_vm0, %v8137_v21 }
 0x158   : > { %7759 = vmatmul.mubr.msk.bf16.vlgmr.msra.gmra.mxu0 %vm522_vm0, %v8132_v16 }
 0x159   : > { %2388 = vmatpush1.bf16.msra.mxu0 %v2365_v23  ;;  %7762 = vmatprep.mubr.msk.bf16.mxu0 %vm522_vm0, %v8133_v17 }
 0x15d   : > { %v8762_v25 = vpop.f32.mrf.mxu1  ;;  %7773 = vmatmul.mubr.msk.bf16.gmra.mxu1 %vm522_vm0, %v8138_v24 }
 0x15e   : > { %2998 = vmatprep.mubr.bf16.mxu1 %v10823_v7 }
 0x15f   : > { %v8766_v26 = vpop.f32.mrf.mxu1 }
 0x160   : > { %v579_v27 = vpop.f32.mrf.mxu0  ;;  %7763 = vmatmul.mubr.msk.bf16.gmra.mxu0 %vm522_vm0, %v8134_v18 }
 0x161   : > { %v8769_v28 = vpop.f32.mrf.mxu1  ;;  %2405 = vmatprep.mubr.bf16.mxu0 %v10823_v7 }
 0x162   : > { %v581_v29 = vpop.f32.mrf.mxu0 }
 0x163   : > { %v8772_v30 = vpop.f32.mrf.mxu1 }
 0x164   : > { %v583_v31 = vpop.f32.mrf.mxu0 }
 0x165   : > { %v758_v32 = vpop.f32.mrf.mxu1 }
 0x166   : > { %v8774_v33 = vadd.f32 %v758_v32, %v579_v27  ;;  %v8776_v34 = vpop.f32.mrf.mxu0 }
 0x167   : > { %v760_v35 = vpop.f32.mrf.mxu1 }
 0x168   : > { %v8778_v36 = vadd.f32 %v760_v35, %v581_v29  ;;  %v589_v37 = vpop.f32.mrf.mxu0  ;;  %7253 = vmatmul.mubr.msk.bf16.vlgmr.msra.gmra.mxu0 %vm522_vm0, %v8135_v19 }
 0x169   : > { %v762_v38 = vpop.f32.mrf.mxu1  ;;  %2415 = vmatprep.mubr.bf16.mxu0 %v10823_v7 }
 0x16a   : > { %v8782_v39 = vadd.f32 %v762_v38, %v583_v31  ;;  %v591_v40 = vpop.f32.mrf.mxu0 }
 0x16b   : > { %v8784_v41 = vpop.f32.mrf.mxu1 }
 0x16c   : > { %v593_v42 = vpop.f32.mrf.mxu0 }
 0x16d   : > { %v768_v43 = vpop.f32.mrf.mxu1 }
 0x16e   : > { %v8786_v44 = vadd.f32 %v768_v43, %v589_v37  ;;  %v8788_v45 = vpop.f32.mrf.mxu0 }
 0x16f   : > { %v770_v46 = vpop.f32.mrf.mxu1 }
 0x170   : > { %v8790_v47 = vadd.f32 %v770_v46, %v591_v40  ;;  %v599_v48 = vpop.f32.mrf.mxu0  ;;  %7254 = vmatmul.mubr.msk.bf16.gmra.mxu0 %vm522_vm0, %v8136_v20 }
 0x171   : > { %v772_v49 = vpop.f32.mrf.mxu1  ;;  %2425 = vmatprep.mubr.bf16.mxu0 %v10823_v7 }
 0x172   : > { %v8794_v50 = vadd.f32 %v772_v49, %v593_v42  ;;  %v601_v51 = vpop.f32.mrf.mxu0 }
 0x173   : > { %v8796_v52 = vpop.f32.mrf.mxu1 }
 0x174   : > { %v603_v53 = vpop.f32.mrf.mxu0 }
 0x175   : > { %v778_v54 = vpop.f32.mrf.mxu1 }
 0x176   : > { %v8798_v55 = vadd.f32 %v778_v54, %v599_v48  ;;  %v8800_v56 = vpop.f32.mrf.mxu0 }
 0x177   : > { %v780_v57 = vpop.f32.mrf.mxu1 }
 0x178   : > { %v8802_v58 = vadd.f32 %v780_v57, %v601_v51  ;;  %v609_v59 = vpop.f32.mrf.mxu0  ;;  %7255 = vmatmul.mubr.msk.bf16.gmra.mxu0 %vm522_vm0, %v8137_v21 }
 0x179   : > { %v782_v60 = vpop.f32.mrf.mxu1  ;;  %2435 = vmatprep.mubr.bf16.mxu0 %v10823_v7 }
 0x17a   : > { %v8806_v61 = vadd.f32 %v782_v60, %v603_v53  ;;  %v611_v62 = vpop.f32.mrf.mxu0 }
 0x17b   : > { %v8808_v63 = vpop.f32.mrf.mxu1 }
 0x17c   : > { %v613_v0 = vpop.f32.mrf.mxu0 }
 0x17d   : > { %v788_v1 = vpop.f32.mrf.mxu1 }
 0x17e   : > { %v8810_v2 = vadd.f32 %v788_v1, %v609_v59  ;;  %v8812_v5 = vpop.f32.mrf.mxu0 }
 0x17f   : > { %v790_v6 = vpop.f32.mrf.mxu1 }
 0x180   : > { %v8814_v8 = vadd.f32 %v790_v6, %v611_v62  ;;  %v7690_v4 = vpop.f32.mrf.mxu0  ;;  %7256 = vmatmul.mubr.msk.bf16.gmra.mxu0 %vm522_vm0, %v8138_v24  ;;  %vm2812_vm0 = vcmask 412672  }
 0x181   : > { %v792_v9 = vpop.f32.mrf.mxu1 }
 0x182   : > { %v8817_v10 = vadd.f32 %v792_v9, %v613_v0  ;;  %v652_v11 = vpop.f32.mrf.mxu0 }
 0x183   : > { %v8819_v13 = vpop.f32.mrf.mxu1 }
 0x184   : > { %v7691_v14 = vpop.f32.mrf.mxu0 }
 0x185   : > { %v7710_v15 = vpop.f32.mrf.mxu1 }
 0x186   : > { %v8821_v12 = vpop.f32.mrf.mxu0 }
 0x187   : > { %v1046_v16 = vpop.f32.mrf.mxu1 }
 0x188   : > { %v7700_v17 = vpop.f32.mrf.mxu0 }
 0x189   : > { %v840_v18 = vadd.f32 %v7700_v17, %v7690_v4  ;;  %v7711_v19 = vpop.f32.mrf.mxu1 }
 0x18a   : > { %v831_v20 = vpop.f32.mrf.mxu0 }
 0x18b   : > { %v832_v21 = vadd.f32 %v831_v20, %v652_v11  ;;  %v8823_v22 = vadd.f32 %v7710_v15, %v840_v18  ;;  %v8825_v23 = vpop.f32.mrf.mxu1 }
 0x18c   : > { %10850 = vst [vmem:[#allocation8_spill] sm:$0xff] %v8825_v23  ;;  %v7701_v24 = vpop.f32.mrf.mxu0 }
 0x18d   : > { %v843_v27 = vadd.f32 %v7701_v24, %v7691_v14  ;;  %v8827_v29 = vadd.f32 %v1046_v16, %v832_v21  ;;  %v7714_v31 = vpop.f32.mrf.mxu1 }
 0x18e   : > { %v8829_v32 = vpop.f32.mrf.mxu0 }
 0x18f   : > { %v8831_v35 = vadd.f32 %v7711_v19, %v843_v27  ;;  %v1062_v37 = vpop.f32.mrf.mxu1 }
 0x190   : > { %v7704_v38 = vpop.f32.mrf.mxu0 }
 0x191   : > { %v856_v40 = vadd.f32 %v7704_v38, %v8762_v25  ;;  %v7715_v42 = vpop.f32.mrf.mxu1 }
 0x192   : > { %v847_v43 = vpop.f32.mrf.mxu0 }
 0x193   : > { %v848_v46 = vadd.f32 %v847_v43, %v8766_v26  ;;  %v8835_v48 = vadd.f32 %v7714_v31, %v856_v40  ;;  %v8837_v49 = vpop.f32.mrf.mxu1 }
 0x194   : > { %v7705_v51 = vpop.f32.mrf.mxu0 }
 0x195   : > { %v859_v53 = vadd.f32 %v7705_v51, %v8769_v28  ;;  %v8840_v54 = vadd.f32 %v1062_v37, %v848_v46  ;;  %v1212_v57 = vpop.f32.mrf.mxu1 }
 0x196   : > { %v8842_v59 = vpop.f32.mrf.mxu0 }
 0x197   : > { %v8844_v60 = vadd.f32 %v7715_v42, %v859_v53  ;;  %v1214_v62 = vpop.f32.mrf.mxu1 }
 0x198   : > { %v973_v25 = vpop.f32.mrf.mxu0 }
 0x199   : > { %v1077_v0 = vadd.f32 %v973_v25, %v8774_v33  ;;  %v1216_v1 = vpop.f32.mrf.mxu1 }
 0x19a   : > { %v975_v26 = vpop.f32.mrf.mxu0 }
 0x19b   : > { %v1078_v6 = vadd.f32 %v975_v26, %v8778_v36  ;;  %v8848_v4 = vadd.f32 %v1212_v57, %v1077_v0  ;;  %v8850_v9 = vpop.f32.mrf.mxu1 }
 0x19c   : > { %v977_v28 = vpop.f32.mrf.mxu0 }
 0x19d   : > { %v1080_v11 = vadd.f32 %v977_v28, %v8782_v39  ;;  %v8853_v14 = vadd.f32 %v1214_v62, %v1078_v6  ;;  %v1222_v15 = vpop.f32.mrf.mxu1 }
 0x19e   : > { %v8855_v16 = vpop.f32.mrf.mxu0 }
 0x19f   : > { %v8857_v17 = vadd.f32 %v1216_v1, %v1080_v11  ;;  %v1224_v18 = vpop.f32.mrf.mxu1 }
 0x1a0   : > { %v983_v33 = vpop.f32.mrf.mxu0 }
 0x1a1   : > { %v1083_v19 = vadd.f32 %v983_v33, %v8786_v44  ;;  %v1226_v20 = vpop.f32.mrf.mxu1 }
 0x1a2   : > { %v985_v36 = vpop.f32.mrf.mxu0 }
 0x1a3   : > { %v1084_v21 = vadd.f32 %v985_v36, %v8790_v47  ;;  %v8861_v24 = vadd.f32 %v1222_v15, %v1083_v19  ;;  %v8863_v27 = vpop.f32.mrf.mxu1 }
 0x1a4   : > { %v987_v39 = vpop.f32.mrf.mxu0 }
 0x1a5   : > { %v1086_v31 = vadd.f32 %v987_v39, %v8794_v50  ;;  %v8866_v37 = vadd.f32 %v1224_v18, %v1084_v21  ;;  %v1232_v38 = vpop.f32.mrf.mxu1 }
 0x1a6   : > { %v8868_v40 = vpop.f32.mrf.mxu0 }
 0x1a7   : > { %v8870_v42 = vadd.f32 %v1226_v20, %v1086_v31  ;;  %v1234_v43 = vpop.f32.mrf.mxu1 }
 0x1a8   : > { %v993_v44 = vpop.f32.mrf.mxu0 }
 0x1a9   : > { %v1089_v46 = vadd.f32 %v993_v44, %v8798_v55  ;;  %v1236_v51 = vpop.f32.mrf.mxu1 }
 0x1aa   : > { %v995_v47 = vpop.f32.mrf.mxu0 }
 0x1ab   : > { %v1090_v53 = vadd.f32 %v995_v47, %v8802_v58  ;;  %v8874_v57 = vadd.f32 %v1232_v38, %v1089_v46  ;;  %v8876_v62 = vpop.f32.mrf.mxu1 }
 0x1ac   : > { %v997_v50 = vpop.f32.mrf.mxu0 }
 0x1ad   : > { %v1092_v25 = vadd.f32 %v997_v50, %v8806_v61  ;;  %v8879_v0 = vadd.f32 %v1234_v43, %v1090_v53  ;;  %v1242_v1 = vpop.f32.mrf.mxu1 }
 0x1ae   : > { %v8881_v26 = vpop.f32.mrf.mxu0 }
 0x1af   : > { %v8883_v6 = vadd.f32 %v1236_v51, %v1092_v25  ;;  %v1244_v28 = vpop.f32.mrf.mxu1 }
 0x1b0   : > { %v1003_v55 = vpop.f32.mrf.mxu0 }
 0x1b1   : > { %v1095_v11 = vadd.f32 %v1003_v55, %v8810_v2  ;;  %v1246_v15 = vpop.f32.mrf.mxu1 }
 0x1b2   : > { %v1005_v58 = vpop.f32.mrf.mxu0 }
 0x1b3   : > { %v1096_v18 = vadd.f32 %v1005_v58, %v8814_v8  ;;  %v8887_v33 = vadd.f32 %v1242_v1, %v1095_v11  ;;  %v8889_v19 = vpop.f32.mrf.mxu1 }
 0x1b4   : > { %10851 = vst [vmem:[#allocation9_spill] sm:$0xff] %v8889_v19  ;;  %v1007_v61 = vpop.f32.mrf.mxu0 }
 0x1b5   : > { %v1098_v20 = vadd.f32 %v1007_v61, %v8817_v10  ;;  %v8892_v36 = vadd.f32 %v1244_v28, %v1096_v18  ;;  %v7730_v21 = vpop.f32.mrf.mxu1 }
 0x1b6   : > { %v8894_v39 = vpop.f32.mrf.mxu0 }
 0x1b7   : > { %v8896_v31 = vadd.f32 %v1246_v15, %v1098_v20  ;;  %v1524_v38 = vpop.f32.mrf.mxu1 }
 0x1b8   : > { %v7720_v2 = vpop.f32.mrf.mxu0 }
 0x1b9   : > { %v1324_v43 = vadd.f32 %v7720_v2, %v8823_v22  ;;  %v7731_v44 = vpop.f32.mrf.mxu1 }
 0x1ba   : > { %v1285_v8 = vpop.f32.mrf.mxu0 }
 0x1bb   : > { %v1318_v46 = vadd.f32 %v1285_v8, %v8827_v29  ;;  %v8900_v51 = vadd.f32 %v7730_v21, %v1324_v43  ;;  %v8902_v47 = vpop.f32.mrf.mxu1 }
 0x1bc   : > { %10852 = vst [vmem:[#allocation10_spill] sm:$0xff] %v8902_v47  ;;  %v7721_v10 = vpop.f32.mrf.mxu0 }
 0x1bd   : > { %v1327_v53 = vadd.f32 %v7721_v10, %v8831_v35  ;;  %v8905_v50 = vadd.f32 %v1524_v38, %v1318_v46  ;;  %v7734_v25 = vpop.f32.mrf.mxu1 }
 0x1be   : > { %v8907_v1 = vpop.f32.mrf.mxu0 }
 0x1bf   : > { %10853 = vst [vmem:[#allocation11_spill] sm:$0xff] %v8907_v1  ;;  %v8909_v28 = vadd.f32 %v7731_v44, %v1327_v53  ;;  %v1540_v55 = vpop.f32.mrf.mxu1 }
 0x1c0   : > { %v7724_v22 = vpop.f32.mrf.mxu0 }
 0x1c1   : > { %v1336_v11 = vadd.f32 %v7724_v22, %v8835_v48  ;;  %v7735_v15 = vpop.f32.mrf.mxu1 }
 0x1c2   : > { %v1301_v29 = vpop.f32.mrf.mxu0 }
 0x1c3   : > { %v1330_v58 = vadd.f32 %v1301_v29, %v8840_v54  ;;  %v8913_v18 = vadd.f32 %v7734_v25, %v1336_v11  ;;  %v8915_v61 = vpop.f32.mrf.mxu1 }
 0x1c4   : > { %v7725_v35 = vpop.f32.mrf.mxu0 }
 0x1c5   : > { %v1339_v20 = vadd.f32 %v7725_v35, %v8844_v60  ;;  %v8918_v21 = vadd.f32 %v1540_v55, %v1330_v58  ;;  %v1690_v38 = vpop.f32.mrf.mxu1 }
 0x1c6   : > { %v8920_v2 = vpop.f32.mrf.mxu0 }
 0x1c7   : > { %v8922_v43 = vadd.f32 %v7735_v15, %v1339_v20  ;;  %v1692_v44 = vpop.f32.mrf.mxu1 }
 0x1c8   : > { %v1451_v48 = vpop.f32.mrf.mxu0 }
 0x1c9   : > { %v1555_v8 = vadd.f32 %v1451_v48, %v8848_v4  ;;  %v1694_v46 = vpop.f32.mrf.mxu1 }
 0x1ca   : > { %v1453_v54 = vpop.f32.mrf.mxu0 }
 0x1cb   : > { %v1556_v10 = vadd.f32 %v1453_v54, %v8853_v14  ;;  %v8926_v53 = vadd.f32 %v1690_v38, %v1555_v8  ;;  %v8928_v25 = vpop.f32.mrf.mxu1 }
 0x1cc   : > { %v1455_v60 = vpop.f32.mrf.mxu0 }
 0x1cd   : > { %v1558_v55 = vadd.f32 %v1455_v60, %v8857_v17  ;;  %v8931_v22 = vadd.f32 %v1692_v44, %v1556_v10  ;;  %v1700_v11 = vpop.f32.mrf.mxu1 }
 0x1ce   : > { %v8933_v15 = vpop.f32.mrf.mxu0 }
 0x1cf   : > { %v8935_v29 = vadd.f32 %v1694_v46, %v1558_v55  ;;  %v1702_v58 = vpop.f32.mrf.mxu1 }
 0x1d0   : > { %v1461_v4 = vpop.f32.mrf.mxu0 }
 0x1d1   : > { %v1561_v35 = vadd.f32 %v1461_v4, %v8861_v24  ;;  %v1704_v20 = vpop.f32.mrf.mxu1 }
 0x1d2   : > { %v1463_v14 = vpop.f32.mrf.mxu0 }
 0x1d3   : > { %v1562_v38 = vadd.f32 %v1463_v14, %v8866_v37  ;;  %v8939_v48 = vadd.f32 %v1700_v11, %v1561_v35  ;;  %v8941_v8 = vpop.f32.mrf.mxu1 }
 0x1d4   : > { %10854 = vst [vmem:[#allocation12_spill] sm:$0xff] %v8941_v8  ;;  %v1465_v17 = vpop.f32.mrf.mxu0 }
 0x1d5   : > { %v1564_v44 = vadd.f32 %v1465_v17, %v8870_v42  ;;  %v8944_v54 = vadd.f32 %v1702_v58, %v1562_v38  ;;  %v1710_v10 = vpop.f32.mrf.mxu1 }
 0x1d6   : > { %v8946_v46 = vpop.f32.mrf.mxu0 }
 0x1d7   : > { %v8948_v60 = vadd.f32 %v1704_v20, %v1564_v44  ;;  %v1712_v55 = vpop.f32.mrf.mxu1 }
 0x1d8   : > { %v1471_v24 = vpop.f32.mrf.mxu0 }
 0x1d9   : > { %v1567_v4 = vadd.f32 %v1471_v24, %v8874_v57  ;;  %v1714_v7 = vpop.f32.mrf.mxu1 }
 0x1da   : > { %v1473_v37 = vpop.f32.mrf.mxu0 }
 0x1db   : > { %v1568_v11 = vadd.f32 %v1473_v37, %v8879_v0  ;;  %v8952_v35 = vadd.f32 %v1710_v10, %v1567_v4  ;;  %v8954_v14 = vpop.f32.mrf.mxu1 }
 0x1dc   : > { %v1475_v42 = vpop.f32.mrf.mxu0 }
 0x1dd   : > { %v1570_v58 = vadd.f32 %v1475_v42, %v8883_v6  ;;  %v8957_v38 = vadd.f32 %v1712_v55, %v1568_v11  ;;  %v1720_v17 = vpop.f32.mrf.mxu1 }
 0x1de   : > { %v8959_v20 = vpop.f32.mrf.mxu0 }
 0x1df   : > { %v8961_v44 = vadd.f32 %v1714_v7, %v1570_v58  ;;  %v1722_v47 = vpop.f32.mrf.mxu1 }
 0x1e0   : > { %v1481_v57 = vpop.f32.mrf.mxu0 }
 0x1e1   : > { %10855 = vst [vmem:[#allocation13_spill] sm:$0xff] %v8961_v44  ;;  %v1573_v24 = vadd.f32 %v1481_v57, %v8887_v33  ;;  %v1724_v1 = vpop.f32.mrf.mxu1 }
 0x1e2   : > { %v1483_v0 = vpop.f32.mrf.mxu0 }
 0x1e3   : > { %v1574_v10 = vadd.f32 %v1483_v0, %v8892_v36  ;;  %v8965_v4 = vadd.f32 %v1720_v17, %v1573_v24  ;;  %v8967_v37 = vpop.f32.mrf.mxu1 }
 0x1e4   : > { %10857 = vst [vmem:[#allocation15_spill] sm:$0xff] %v8967_v37  ;;  %v1485_v6 = vpop.f32.mrf.mxu0 }
 0x1e5   : > { %10856 = vst [vmem:[#allocation14_spill] sm:$0xff] %v8965_v4  ;;  %v1576_v55 = vadd.f32 %v1485_v6, %v8896_v31  ;;  %v8970_v11 = vadd.f32 %v1722_v47, %v1574_v10  ;;  %v7750_v42 = vpop.f32.mrf.mxu1 }
 0x1e6   : > { %v8972_v7 = vpop.f32.mrf.mxu0 }
 0x1e7   : > { %10858 = vst [vmem:[#allocation16_spill] sm:$0xff] %v8970_v11  ;;  %10859 = vst [vmem:[#allocation17_spill] sm:$0xff] %v8972_v7  ;;  %v8974_v58 = vadd.f32 %v1724_v1, %v1576_v55  ;;  %v2002_v8 = vpop.f32.mrf.mxu1 }
 0x1e8   : > { %v7740_v33 = vpop.f32.mrf.mxu0 }
 0x1e9   : > { %10860 = vst [vmem:[#allocation18_spill] sm:$0xff] %v8974_v58  ;;  %v1802_v57 = vadd.f32 %v7740_v33, %v8900_v51  ;;  %v7751_v23 = vpop.f32.mrf.mxu1 }
 0x1ea   : > { %v1763_v36 = vpop.f32.mrf.mxu0 }
 0x1eb   : > { %v1796_v17 = vadd.f32 %v1763_v36, %v8905_v50  ;;  %v8978_v24 = vadd.f32 %v7750_v42, %v1802_v57  ;;  %v8980_v0 = vpop.f32.mrf.mxu1 }
 0x1ec   : > { %10862 = vst [vmem:[#allocation20_spill] sm:$0xff] %v8980_v0  ;;  %v7741_v31 = vpop.f32.mrf.mxu0 }
 0x1ed   : > { %10861 = vst [vmem:[#allocation19_spill] sm:$0xff] %v8978_v24  ;;  %v1805_v47 = vadd.f32 %v7741_v31, %v8909_v28  ;;  %v8983_v10 = vadd.f32 %v2002_v8, %v1796_v17  ;;  %v8985_v6 = vpop.f32.mrf.mxu1 }
 0x1ee   : > { %v8987_v1 = vpop.f32.mrf.mxu0 }
 0x1ef   : > { %10863 = vst [vmem:[#allocation21_spill] sm:$0xff] %v8983_v10  ;;  %10864 = vst [vmem:[#allocation22_spill] sm:$0xff] %v8987_v1  ;;  %v8989_v55 = vadd.f32 %v7751_v23, %v1805_v47  ;;  %v8991_v51 = vpop.f32.mrf.mxu1 }
 0x1f0   : > { %v7744_v33 = vpop.f32.mrf.mxu0 }
 0x1f1   : > { %10865 = vst [vmem:[#allocation23_spill] sm:$0xff] %v8989_v55  ;;  %v8993_v37 = vpop.f32.mrf.mxu1 }
 0x1f2   : > { %v1779_v50 = vpop.f32.mrf.mxu0 }
 0x1f3   : > { %v8995_v42 = vpop.f32.mrf.mxu1 }
 0x1f4   : > { %v8997_v57 = vpop.f32.mrf.mxu0 }
 0x1f5   : > { %v2168_v36 = vpop.f32.mrf.mxu1 }
 0x1f6   : > { %v8999_v28 = vpop.f32.mrf.mxu0 }
 0x1f7   : > { %v2170_v8 = vpop.f32.mrf.mxu1 }
 0x1f8   : > { %v1929_v17 = vpop.f32.mrf.mxu0 }
 0x1f9   : > { %v2033_v31 = vadd.f32 %v1929_v17, %v8926_v53  ;;  %v2172_v0 = vpop.f32.mrf.mxu1 }
 0x1fa   : > { %v1931_v23 = vpop.f32.mrf.mxu0 }
 0x1fb   : > { %v2034_v47 = vadd.f32 %v1931_v23, %v8931_v22  ;;  %v9003_v10 = vadd.f32 %v2168_v36, %v2033_v31  ;;  %v9005_v1 = vpop.f32.mrf.mxu1 }
 0x1fc   : > { %v1933_v55 = vpop.f32.mrf.mxu0 }
 0x1fd   : > { %v2036_v24 = vadd.f32 %v1933_v55, %v8935_v29  ;;  %v9008_v58 = vadd.f32 %v2170_v8, %v2034_v47  ;;  %v2178_v11 = vpop.f32.mrf.mxu1 }
 0x1fe   : > { %v9010_v4 = vpop.f32.mrf.mxu0 }
 0x1ff   : > { %v9012_v7 = vadd.f32 %v2172_v0, %v2036_v24  ;;  %v9014_v19 = vpop.f32.mrf.mxu1 }
 0x200   : > { %v1939_v53 = vpop.f32.mrf.mxu0 }
 0x201   : > { %v2039_v17 = vadd.f32 %v1939_v53, %v8939_v48  ;;  %v2182_v22 = vpop.f32.mrf.mxu1 }
 0x202   : > { %v1941_v36 = vpop.f32.mrf.mxu0 }
 0x203   : > { %v9018_v31 = vadd.f32 %v1941_v36, %v8944_v54  ;;  %v9020_v23 = vadd.f32 %v2178_v11, %v2039_v17  ;;  %v9022_v29 = vpop.f32.mrf.mxu1 }
 0x204   : > { %10866 = vst [vmem:[#allocation24_spill] sm:$0xff] %v9022_v29  ;;  %v1943_v55 = vpop.f32.mrf.mxu0 }
 0x205   : > { %v2042_v8 = vadd.f32 %v1943_v55, %v8948_v60  ;;  %v9025_v47 = vpop.f32.mrf.mxu1 }
 0x206   : > { %v9027_v24 = vpop.f32.mrf.mxu0 }
 0x207   : > { %10867 = vst [vmem:[#allocation25_spill] sm:$0xff] %v9027_v24  ;;  %v9029_v0 = vadd.f32 %v2182_v22, %v2042_v8  ;;  %v9031_v44 = vpop.f32.mrf.mxu1 }
 0x208   : > { %v9033_v48 = vpop.f32.mrf.mxu0 }
 0x209   : > { %10868 = vst [vmem:[#allocation26_spill] sm:$0xff] %v9029_v0  ;;  %v9035_v53 = vpop.f32.mrf.mxu1 }
 0x20a   : > { %10869 = vst [vmem:[#allocation27_spill] sm:$0xff] %v9035_v53  ;;  %v9037_v54 = vpop.f32.mrf.mxu0 }
 0x20b   : > { %v9039_v11 = vpop.f32.mrf.mxu1 }
 0x20c   : > { %10870 = vst [vmem:[#allocation28_spill] sm:$0xff] %v9039_v11  ;;  %v9041_v17 = vpop.f32.mrf.mxu0  ;;  %v851_v11 = vadd.f32 %v8842_v59, %v8772_v30  ;;  %v1814_v59 = vadd.f32 %v7744_v33, %v8913_v18  ;;  %v1817_v18 = vadd.f32 %v8997_v57, %v8922_v43 }
 0x20d   : > { %v9043_v36 = vpop.f32.mrf.mxu1 }
 0x20e   : > { %10871 = vst [vmem:[#allocation29_spill] sm:$0xff] %v9043_v36  ;;  %v9045_v60 = vpop.f32.mrf.mxu0 }
 0x20f   : > { %10872 = vst [vmem:[#allocation30_spill] sm:$0xff] %v9045_v60  ;;  %v9047_v55 = vpop.f32.mrf.mxu1 }
 0x210   : > { %10873 = vst [vmem:[#allocation31_spill] sm:$0xff] %v9047_v55  ;;  %v9049_v22 = vpop.f32.mrf.mxu0  ;;  %v9067_v55 = vpop.permute.xlu1 %2580 }
 0x211   : > { %10874 = vst [vmem:[#allocation32_spill] sm:$0xff] %v9049_v22  ;;  %v9051_v8 = vpop.f32.mrf.mxu1 }
 0x212   : > { %10875 = vst [vmem:[#allocation33_spill] sm:$0xff] %v9051_v8  ;;  %v9053_v0 = vpop.f32.mrf.mxu0  ;;  %v1094_v8 = vadd.f32 %v8837_v49, %v851_v11  ;;  %v1808_v49 = vadd.f32 %v1779_v50, %v8918_v21 }
 0x213   : > { %10876 = vst [vmem:[#allocation34_spill] sm:$0xff] %v9053_v0  ;;  %v9055_v29 = vpop.f32.mrf.mxu1 }
 0x214   : > { %10877 = vst [vmem:[#allocation35_spill] sm:$0xff] %v9055_v29  ;;  %v9057_v24 = vpop.f32.mrf.mxu0  ;;  %v765_v29 = vadd.f32 %v8784_v41, %v8776_v34  ;;  %v1333_v30 = vadd.f32 %v8920_v2, %v1094_v8  ;;  %v2053_v2 = vadd.f32 %v8985_v6, %v1814_v59  ;;  %v2642_v6 = vsub.s32 2, %v8372_v3 }
 0x215   : > { %10878 = vst [vmem:[#allocation36_spill] sm:$0xff] %v9057_v24  ;;  %v9061_v53 = vpop.f32.mrf.mxu1 }
 0x216   : > { %10879 = vst [vmem:[#allocation37_spill] sm:$0xff] %v9061_v53  ;;  %v9063_v36 = vpop.f32.mrf.mxu0  ;;  %v9080_v53 = vpop.permute.xlu0 %2575  ;;  %v1572_v41 = vadd.f32 %v8915_v61, %v1333_v30  ;;  %v2056_v30 = vadd.f32 %v8993_v37, %v1817_v18 }
 0x217   : > { %10880 = vst [vmem:[#allocation38_spill] sm:$0xff] %v9063_v36  ;;  %v9065_v60 = vpop.f32.mrf.mxu1  ;;  %v1081_v36 = vadd.f32 %v8855_v16, %v765_v29  ;;  %v2047_v29 = vadd.f32 %v8991_v51, %v1808_v49 }
 0x218   : > { %10881 = vst [vmem:[#allocation39_spill] sm:$0xff] %v9065_v60  ;;  %v9069_v22 = vpop.f32.mrf.mxu0  ;;  %v1811_v21 = vadd.f32 %v8999_v28, %v1572_v41 }
 0x219   : > { %10882 = vst [vmem:[#allocation40_spill] sm:$0xff] %v9069_v22  ;;  %v9072_v0 = vpop.f32.mrf.mxu1  ;;  %v1320_v8 = vadd.f32 %v8850_v9, %v1081_v36  ;;  %v457_v9 = vld [vmem:[%s10887_s1] sm:$0x7] }
 0x21a   : > { %10883 = vst [vmem:[#allocation41_spill] sm:$0xff] %v9072_v0  ;;  %v9076_v24 = vpop.f32.mrf.mxu0  ;;  %v9088_v0 = vpop.permute.xlu1 %2565  ;;  %v2050_v36 = vadd.f32 %v8995_v42, %v1811_v21  ;;  %v9112_v37 = vrot.slane %v457_v9, %v2642_v6  ;;  %v2638_v21 = vsub.s32 1, %v8372_v3 }
 0x21b   : > { %10884 = vst [vmem:[#allocation42_spill] sm:$0xff] %v9076_v24  ;;  %v9082_v60 = vpop.f32.mrf.mxu1  ;;  %v9099_v50 = vpop.permute.xlu0 %2570 }
 0x21c   : > { %10885 = vst [vmem:[#allocation43_spill] sm:$0xff] %v9082_v60  ;;  %v9085_v22 = vpop.f32.mrf.mxu0  ;;  %10888 = vst [vmem:[#allocation45_spill] sm:$0xff] %v9112_v37 }
 0x21d   : > { %v7774_v11 = vpop.f32.mrf.mxu1 }
 0x21e   : > { %v9090_v34 = vpop.f32.mrf.mxu0  ;;  %v9107_v51 = vpop.permute.xlu1 %2555 }
 0x21f   : > { %10886 = vst [vmem:[#allocation44_spill] sm:$0xff] %v9090_v34  ;;  %v2496_v33 = vpop.f32.mrf.mxu1  ;;  %v1559_v34 = vadd.f32 %v8933_v15, %v1320_v8 }
 0x220   : > { %v7764_v16 = vpop.f32.mrf.mxu0 }
 0x221   : > { %v2292_v60 = vadd.f32 %v7764_v16, %v2053_v2  ;;  %v7775_v61 = vpop.f32.mrf.mxu1  ;;  %v1798_v41 = vadd.f32 %v8928_v25, %v1559_v34 }
 0x222   : > { %v2257_v24 = vpop.f32.mrf.mxu0 }
 0x223   : > { %v2286_v43 = vadd.f32 %v2257_v24, %v2047_v29  ;;  %v2531_v57 = vadd.f32 %v7774_v11, %v2292_v60  ;;  %v2499_v8 = vpop.f32.mrf.mxu1  ;;  %v2037_v16 = vadd.f32 %v9010_v4, %v1798_v41  ;;  %v9116_v29 = vpop.permute.xlu0 %2560  ;;  %v775_v4 = vadd.f32 %v8796_v52, %v8788_v45 }
 0x224   : > { %v7765_v28 = vpop.f32.mrf.mxu0  ;;  %v9157_v45 = vrot.slane %v457_v9, %v2638_v21 }
 0x225   : > { %v2603_v59 = vadd.f32 %v9080_v53, %v2531_v57  ;;  %v2295_v15 = vadd.f32 %v7765_v28, %v2056_v30  ;;  %v2525_v49 = vadd.f32 %v2496_v33, %v2286_v43  ;;  %v10889_v30 = vmov 0  }
 0x226   : > { %v2260_v2 = vpop.f32.mrf.mxu0  ;;  %444 = vst.msk [vmem:[#allocation2 + $0x30] sm:$0xf] %vm439_vm10, %v10889_v30  ;;  %440 = vst.msk [vmem:[#allocation2] sm:$0xf] %vm439_vm10, %v10889_v30  ;;  %v2634_v43 = vsub.s32 0, %v8372_v3  ;;  %v2276_v3 = vadd.f32 %v9005_v1, %v2037_v16 }
 0x227   : > { %v2627_v24 = vmax.f32 %v2603_v59, 0.0  ;;  %v2597_v60 = vadd.f32 %v9088_v0, %v2525_v49  ;;  %v2289_v11 = vadd.f32 %v2260_v2, %v2050_v36  ;;  %v2534_v18 = vadd.f32 %v7775_v61, %v2295_v15  ;;  %453 = vst.msk [vmem:[#allocation2 + $0x38] sm:$0xf] %vm448_vm11, %v10889_v30  ;;  %449 = vst.msk [vmem:[#allocation2 + $0x8] sm:$0xf] %vm448_vm11, %v10889_v30  ;;  %v9149_v61 = vpop.permute.xlu1 %2545 }
 0x228   : > { %v2407_v42 = vpop.f32.mrf.mxu0  ;;  %441 = vst.msk [vmem:[#allocation2 + $0xc] sm:$0xf] %vm439_vm10, %v10889_v30  ;;  %442 = vst.msk [vmem:[#allocation2 + $0x18] sm:$0xf] %vm439_vm10, %v10889_v30 }
 0x229   : > { %v2621_v33 = vmax.f32 %v2597_v60, 0.0  ;;  %v2606_v25 = vadd.f32 %v9067_v55, %v2534_v18  ;;  %v2511_v34 = vadd.f32 %v2407_v42, %v9003_v10  ;;  %v2528_v6 = vadd.f32 %v2499_v8, %v2289_v11  ;;  %443 = vst.msk [vmem:[#allocation2 + $0x24] sm:$0xf] %vm439_vm10, %v10889_v30  ;;  %445 = vst.msk [vmem:[#allocation2 + $0x3c] sm:$0xf] %vm439_vm10, %v10889_v30  ;;  %v9163_v60 = vpop.permute.xlu0 %2550 }
 0x22a   : > { %446 = vst.msk [vmem:[#allocation2 + $0x48] sm:$0xf] %vm439_vm10, %v10889_v30  ;;  %447 = vst.msk [vmem:[#allocation2 + $0x54] sm:$0xf] %vm439_vm10, %v10889_v30  ;;  %v785_v10 = vadd.f32 %v8808_v63, %v8800_v56  ;;  %v2409_v57 = vpop.f32.mrf.mxu0  ;;  %v2667_v28 = vmul.f32 %v9112_v37, %v2627_v24  ;;  %v9165_v18 = vrot.slane %v457_v9, %v2634_v43  ;;  %vm2959_vm10 = vcmask 523264  }
 0x22b   : > { %450 = vst.msk [vmem:[#allocation2 + $0x14] sm:$0xf] %vm448_vm11, %v10889_v30  ;;  %451 = vst.msk [vmem:[#allocation2 + $0x20] sm:$0xf] %vm448_vm11, %v10889_v30  ;;  %v2630_v36 = vmax.f32 %v2606_v25, 0.0  ;;  %v2583_v59 = vadd.f32 %v9149_v61, %v2511_v34  ;;  %v2600_v15 = vadd.f32 %v9099_v50, %v2528_v6  ;;  %v2512_v49 = vadd.f32 %v2409_v57, %v9008_v58 }
 0x22c   : > { %452 = vst.msk [vmem:[#allocation2 + $0x2c] sm:$0xf] %vm448_vm11, %v10889_v30  ;;  %454 = vst.msk [vmem:[#allocation2 + $0x44] sm:$0xf] %vm448_vm11, %v10889_v30  ;;  %v1093_v41 = vadd.f32 %v8881_v26, %v785_v10  ;;  %v2411_v52 = vpop.f32.mrf.mxu0  ;;  %v7485_v56 = vpack.c.bf16 %v2667_v28, %v2667_v28  ;;  %v2661_v63 = vmul.f32 %v9112_v37, %v2621_v33 }
 0x22d   : > { %455 = vst.msk [vmem:[#allocation2 + $0x50] sm:$0xf] %vm448_vm11, %v10889_v30  ;;  %456 = vst.msk [vmem:[#allocation2 + $0x5c] sm:$0xf] %vm448_vm11, %v10889_v30  ;;  %v2624_v2 = vmax.f32 %v2600_v15, 0.0  ;;  %v2584_v8 = vadd.f32 %v9149_v61, %v2512_v49  ;;  %v2514_v24 = vadd.f32 %v2411_v52, %v9012_v7  ;;  %v2607_v11 = vmax.f32 %v2583_v59, 0.0 }
 0x22e   : > { %10890 = vst [vmem:[#allocation46_spill] sm:$0xff] %v9157_v45  ;;  %10891 = vst [vmem:[#allocation47_spill] sm:$0xff] %v9165_v18  ;;  %2761 = vrot.lane.b32.xlu1 %v7485_v56, %s10825_s22  ;;  %v2413_v26 = vpop.f32.mrf.mxu0  ;;  %v2670_v58 = vmul.f32 %v9112_v37, %v2630_v36  ;;  %v1087_v42 = vadd.f32 %v8868_v40, %v775_v4  ;;  %v1332_v33 = vadd.f32 %v8876_v62, %v1093_v41  ;;  %vm8249_vm11 = vmmov 0  }
 0x22f   : > { %v2608_v21 = vmax.f32 %v2584_v8, 0.0  ;;  %v2586_v1 = vadd.f32 %v9163_v60, %v2514_v24  ;;  %v2515_v16 = vadd.f32 %v2413_v26, %v2276_v3  ;;  %v7481_v34 = vpack.c.bf16 %v2661_v63, %v2661_v63  ;;  %v10893_v24 = vld [vmem:[#allocation9_spill] sm:$0xff]  ;;  %v10894_v26 = vld [vmem:[#allocation30_spill] sm:$0xff] }
 0x230   : > { %v2417_v7 = vpop.f32.mrf.mxu0  ;;  %v7487_v25 = vpack.c.bf16 %v2670_v58, %v2670_v58  ;;  %v2664_v9 = vmul.f32 %v9112_v37, %v2624_v2  ;;  %v2279_v6 = vadd.f32 %v9014_v19, %v9018_v31  ;;  %v795_v4 = vadd.f32 %v8819_v13, %v8812_v5 }
 0x231   : > { %v9176_v10 = vmul.f32 %v9157_v45, %v2608_v21  ;;  %v2587_v43 = vadd.f32 %v9163_v60, %v2515_v16  ;;  %v2517_v40 = vadd.f32 %v2417_v7, %v9020_v23  ;;  %v1571_v62 = vadd.f32 %v8959_v20, %v1332_v33  ;;  %v10895_v21 = vld [vmem:[#allocation8_spill] sm:$0xff] }
 0x232   : > { %v9184_v57 = vmul.f32 %v9165_v18, %v2607_v11  ;;  %v2610_v28 = vmax.f32 %v2586_v1, 0.0  ;;  %2765 = vrot.lane.b32.xlu0 %v7487_v25, %s10825_s22  ;;  %2753 = vrot.lane.b32.xlu1 %v7481_v34, %s10825_s22  ;;  %v2419_v19 = vpop.f32.mrf.mxu0  ;;  %v2045_v31 = vadd.f32 %v9033_v48, %v8952_v35  ;;  %v1326_v5 = vadd.f32 %v8863_v27, %v1087_v42  ;;  %v10896_v1 = vld [vmem:[#allocation12_spill] sm:$0xff]  ;;  %v10898_v34 = vld [vmem:[#allocation27_spill] sm:$0xff] }
 0x233   : > { %v2611_v36 = vmax.f32 %v2587_v43, 0.0  ;;  %v2589_v23 = vadd.f32 %v9107_v51, %v2517_v40  ;;  %v2518_v59 = vadd.f32 %v2419_v19, %v2279_v6  ;;  %v1099_v13 = vadd.f32 %v8894_v39, %v795_v4  ;;  %v10899_v6 = vld [vmem:[#allocation14_spill] sm:$0xff]  ;;  %v10902_v19 = vld [vmem:[#allocation25_spill] sm:$0xff] }
 0x234   : > { %v9193_v20 = vpop.f32.mrf.mxu0  ;;  %v7483_v15 = vpack.c.bf16 %v2664_v9, %v2664_v9  ;;  %v7472_v49 = vpack.c.bf16 %v9176_v10, %v9184_v57  ;;  %v2046_v41 = vadd.f32 %v9037_v54, %v8957_v38  ;;  %v835_v48 = vadd.f32 %v8829_v32, %v8821_v12  ;;  %v10892_v54 = vld [vmem:[#allocation13_spill] sm:$0xff] }
 0x235   : > { %v2590_v52 = vadd.f32 %v9107_v51, %v2518_v59  ;;  %v9201_v35 = vmul.f32 %v9157_v45, %v2611_v36  ;;  %v1565_v27 = vadd.f32 %v8946_v46, %v1326_v5  ;;  %v9207_v39 = vmul.f32 %v9165_v18, %v2610_v28  ;;  %v10903_v36 = vld [vmem:[#allocation16_spill] sm:$0xff] }
 0x236   : > { %v2613_v56 = vmax.f32 %v2589_v23, 0.0  ;;  %2757 = vrot.lane.b32.xlu0 %v7483_v15, %s10825_s22  ;;  %v2423_v63 = vpop.f32.mrf.mxu0  ;;  %v1810_v3 = vadd.f32 %v8954_v14, %v1571_v62  ;;  %v2284_v38 = vadd.f32 %v9025_v47, %v2045_v31  ;;  %v2048_v2 = vadd.f32 %v9041_v17, %v10892_v54  ;;  %v10897_v17 = vld [vmem:[#allocation17_spill] sm:$0xff]  ;;  %v10901_v62 = vld [vmem:[#allocation11_spill] sm:$0xff]  ;;  %v10904_v23 = vld [vmem:[#allocation34_spill] sm:$0xff] }
 0x237   : > { %v2614_v8 = vmax.f32 %v2590_v52, 0.0  ;;  %v1338_v11 = vadd.f32 %v10893_v24, %v1099_v13  ;;  %v7474_v32 = vpack.c.bf16 %v9201_v35, %v9207_v39  ;;  %v2285_v46 = vadd.f32 %v9031_v44, %v2046_v41  ;;  %v10900_v44 = vld [vmem:[#allocation32_spill] sm:$0xff]  ;;  %v10906_v52 = vld [vmem:[#allocation18_spill] sm:$0xff] }
 0x238   : > { %v2427_v12 = vpop.f32.mrf.mxu0  ;;  %v2049_v58 = vadd.f32 %v10894_v26, %v1810_v3  ;;  %v1082_v47 = vadd.f32 %v10895_v21, %v835_v48  ;;  %v1804_v16 = vadd.f32 %v10896_v1, %v1565_v27  ;;  %v9226_v7 = vmul.f32 %v9165_v18, %v2613_v56  ;;  %v10905_v15 = vld [vmem:[#allocation28_spill] sm:$0xff] }
 0x239   : > { %v9220_v42 = vmul.f32 %v9157_v45, %v2614_v8  ;;  %v2523_v14 = vadd.f32 %v2427_v12, %v2284_v38  ;;  %v1577_v33 = vadd.f32 %v10897_v17, %v1338_v11  ;;  %v2287_v9 = vadd.f32 %v10898_v34, %v2048_v2  ;;  %v10907_v48 = vld [vmem:[#allocation36_spill] sm:$0xff]  ;;  %v10908_v38 = vld [vmem:[#allocation15_spill] sm:$0xff]  ;;  %v10915_v34 = vld [vmem:[#allocation38_spill] sm:$0xff] }
 0x23a   : > { %v2429_v25 = vpop.f32.mrf.mxu0  ;;  %v2051_v43 = vadd.f32 %v10900_v44, %v10899_v6  ;;  %v1321_v28 = vadd.f32 %v10901_v62, %v1082_v47  ;;  %v2043_v31 = vadd.f32 %v10902_v19, %v1804_v16  ;;  %v2052_v59 = vadd.f32 %v10904_v23, %v10903_v36  ;;  %v10909_v2 = vld [vmem:[#allocation19_spill] sm:$0xff]  ;;  %v10910_v8 = vld [vmem:[#allocation40_spill] sm:$0xff]  ;;  %v10916_v6 = vld [vmem:[#allocation33_spill] sm:$0xff] }
 0x23b   : > { %v2595_v40 = vadd.f32 %v9088_v0, %v2523_v14  ;;  %v2524_v4 = vadd.f32 %v2429_v25, %v2285_v46  ;;  %v7476_v13 = vpack.c.bf16 %v9220_v42, %v9226_v7  ;;  %v2288_v41 = vadd.f32 %v10905_v15, %v2049_v58  ;;  %v10911_v46 = vld [vmem:[#allocation29_spill] sm:$0xff]  ;;  %v10912_v58 = vld [vmem:[#allocation10_spill] sm:$0xff]  ;;  %v10913_v16 = vld [vmem:[#allocation24_spill] sm:$0xff] }
 0x23c   : > { %v2431_v5 = vpop.f32.mrf.mxu0  ;;  %v2054_v27 = vadd.f32 %v10907_v48, %v10906_v52  ;;  %v1816_v54 = vadd.f32 %v10908_v38, %v1577_v33  ;;  %v2280_v24 = vadd.f32 %v10910_v8, %v10909_v2  ;;  %v2290_v26 = vadd.f32 %v10911_v46, %v2051_v43  ;;  %v10914_v25 = vld [vmem:[#allocation31_spill] sm:$0xff]  ;;  %v10917_v62 = vld [vmem:[#allocation37_spill] sm:$0xff]  ;;  %v10919_v48 = vld [vmem:[#allocation22_spill] sm:$0xff] }
 0x23d   : > { %v2596_v56 = vadd.f32 %v9088_v0, %v2524_v4  ;;  %v2526_v3 = vadd.f32 %v2431_v5, %v2287_v9  ;;  %v2619_v11 = vmax.f32 %v2595_v40, 0.0  ;;  %v1560_v1 = vadd.f32 %v10912_v58, %v1321_v28  ;;  %v10918_v36 = vld [vmem:[#allocation23_spill] sm:$0xff]  ;;  %v10923_v46 = vld [vmem:[#allocation42_spill] sm:$0xff] }
 0x23e   : > { %v2433_v12 = vpop.f32.mrf.mxu0  ;;  %v2282_v17 = vadd.f32 %v10913_v16, %v2043_v31  ;;  %v2291_v0 = vadd.f32 %v10914_v25, %v2052_v59  ;;  %v2055_v9 = vadd.f32 %v10915_v34, %v1816_v54  ;;  %v2293_v44 = vadd.f32 %v10916_v6, %v2054_v27 }
 0x23f   : > { %v2620_v14 = vmax.f32 %v2596_v56, 0.0  ;;  %v2598_v21 = vadd.f32 %v9099_v50, %v2526_v3  ;;  %v2527_v47 = vadd.f32 %v2433_v12, %v2288_v41  ;;  %v2519_v19 = vadd.f32 %v10917_v62, %v2280_v24  ;;  %v10920_v56 = vld [vmem:[#allocation35_spill] sm:$0xff]  ;;  %v10922_v12 = vld [vmem:[#allocation21_spill] sm:$0xff] }
 0x240   : > { %v2437_v33 = vpop.f32.mrf.mxu0  ;;  %v2283_v23 = vadd.f32 %v9085_v22, %v10918_v36  ;;  %v2659_v28 = vmul.f32 %v9165_v18, %v2619_v11  ;;  %v2521_v59 = vadd.f32 %v2423_v63, %v2282_v17  ;;  %v1799_v27 = vadd.f32 %v10919_v48, %v1560_v1  ;;  %v10925_v17 = vld [vmem:[#allocation20_spill] sm:$0xff] }
 0x241   : > { %v2660_v40 = vmul.f32 %v9157_v45, %v2620_v14  ;;  %v2599_v4 = vadd.f32 %v9099_v50, %v2527_v47  ;;  %v2529_v43 = vadd.f32 %v2437_v33, %v2290_v26  ;;  %v2622_v31 = vmax.f32 %v2598_v21, 0.0  ;;  %v10921_v50 = vld [vmem:[#allocation26_spill] sm:$0xff]  ;;  %v10924_v14 = vld [vmem:[#allocation41_spill] sm:$0xff] }
 0x242   : > { %v2439_v5 = vpop.f32.mrf.mxu0  ;;  %v2294_v3 = vadd.f32 %v10920_v56, %v2055_v9  ;;  %v2520_v38 = vadd.f32 %v9193_v20, %v10921_v50  ;;  %v2591_v63 = vadd.f32 %v9107_v51, %v2519_v19  ;;  %v2274_v26 = vadd.f32 %v10923_v46, %v10922_v12 }
 0x243   : > { %v2623_v15 = vmax.f32 %v2599_v4, 0.0  ;;  %v2601_v41 = vadd.f32 %v9080_v53, %v2529_v43  ;;  %v2530_v52 = vadd.f32 %v2439_v5, %v2291_v0  ;;  %v7480_v2 = vpack.c.bf16 %v2660_v40, %v2659_v28  ;;  %v10926_v40 = vld [vmem:[#allocation39_spill] sm:$0xff]  ;;  %v10927_v43 = vld [vmem:[#allocation44_spill] sm:$0xff] }
 0x244   : > { %v2441_v54 = vpop.f32.mrf.mxu0  ;;  %v2522_v21 = vadd.f32 %v10924_v14, %v2283_v23  ;;  %v2662_v47 = vmul.f32 %v9165_v18, %v2622_v31  ;;  %v2593_v58 = vadd.f32 %v9116_v29, %v2521_v59  ;;  %v2038_v25 = vadd.f32 %v10925_v17, %v1799_v27 }
 0x245   : > { %v2625_v8 = vmax.f32 %v2601_v41, 0.0  ;;  %v2602_v22 = vadd.f32 %v9080_v53, %v2530_v52  ;;  %v2532_v24 = vadd.f32 %v2441_v54, %v2293_v44  ;;  %v2663_v11 = vmul.f32 %v9157_v45, %v2623_v15  ;;  %2751 = vrot.lane.b32.xlu1 %v7480_v2, %s10825_s22  ;;  %v10928_v15 = vld [vmem:[#allocation43_spill] sm:$0xff] }
 0x246   : > { %v2443_v20 = vpop.f32.mrf.mxu0  ;;  %v2592_v51 = vadd.f32 %v9116_v29, %v2520_v38  ;;  %v2615_v44 = vmax.f32 %v2591_v63, 0.0  ;;  %v2513_v4 = vadd.f32 %v10926_v40, %v2274_v26  ;;  %v2277_v62 = vadd.f32 %v10927_v43, %v2038_v25 }
 0x247   : > { %v2626_v1 = vmax.f32 %v2602_v22, 0.0  ;;  %v2604_v53 = vadd.f32 %v9067_v55, %v2532_v24  ;;  %v2533_v16 = vadd.f32 %v2443_v20, %v2294_v3  ;;  %v7482_v0 = vpack.c.bf16 %v2663_v11, %v2662_v47 }
 0x248   : > { %v2665_v34 = vmul.f32 %v9165_v18, %v2625_v8  ;;  %v2594_v19 = vadd.f32 %v9116_v29, %v2522_v21  ;;  %v2617_v36 = vmax.f32 %v2593_v58, 0.0  ;;  %v2616_v31 = vmax.f32 %v2592_v51, 0.0 }
 0x249   : > { %v2666_v9 = vmul.f32 %v9157_v45, %v2626_v1  ;;  %v2628_v33 = vmax.f32 %v2604_v53, 0.0  ;;  %v2605_v6 = vadd.f32 %v9067_v55, %v2533_v16  ;;  %2755 = vrot.lane.b32.xlu0 %v7482_v0, %s10825_s22  ;;  %v2585_v55 = vadd.f32 %v9149_v61, %v2513_v4 }
 0x24a   : > { %v2516_v41 = vadd.f32 %v10928_v15, %v2277_v62  ;;  %v2618_v52 = vmax.f32 %v2594_v19, 0.0  ;;  %v2657_v27 = vmul.f32 %v9157_v45, %v2617_v36  ;;  %v2655_v29 = vmul.f32 %v9112_v37, %v2615_v44 }
 0x24b   : > { %v2629_v23 = vmax.f32 %v2605_v6, 0.0  ;;  %v7484_v28 = vpack.c.bf16 %v2666_v9, %v2665_v34  ;;  %v2668_v5 = vmul.f32 %v9165_v18, %v2628_v33  ;;  %v2656_v56 = vmul.f32 %v9165_v18, %v2616_v31 }
 0x24c   : > { %v2609_v3 = vmax.f32 %v2585_v55, 0.0  ;;  %v2588_v61 = vadd.f32 %v9163_v60, %v2516_v41  ;;  %v7477_v38 = vpack.c.bf16 %v2655_v29, %v2655_v29  ;;  %v2658_v54 = vmul.f32 %v9112_v37, %v2618_v52 }
 0x24d   : > { %2759 = vrot.lane.b32.xlu1 %v7484_v28, %s10825_s22  ;;  %v2669_v59 = vmul.f32 %v9157_v45, %v2629_v23  ;;  %v7478_v50 = vpack.c.bf16 %v2657_v27, %v2656_v56 }
 0x24e   : > { %v2612_v2 = vmax.f32 %v2588_v61, 0.0  ;;  %v7479_v8 = vpack.c.bf16 %v2658_v54, %v2658_v54  ;;  %v2649_v22 = vmul.f32 %v9112_v37, %v2609_v3 }
 0x24f   : > { %v7486_v48 = vpack.c.bf16 %v2669_v59, %v2668_v5 }
 0x250   : > { %v7473_v60 = vpack.c.bf16 %v2649_v22, %v2649_v22  ;;  %v2652_v42 = vmul.f32 %v9112_v37, %v2612_v2 }
 0x251   : > { %2763 = vrot.lane.b32.xlu0 %v7486_v48, %s10825_s22  ;;  %2743 = vrot.lane.b32.xlu1 %v7476_v13, %s10825_s22 }
 0x252   : > { %v7475_v7 = vpack.c.bf16 %v2652_v42, %v2652_v42 }
 0x255   : > { %2747 = vrot.lane.b32.xlu0 %v7478_v50, %s10825_s22  ;;  %2745 = vrot.lane.b32.xlu1 %v7477_v38, %s10825_s22 }
 0x259   : > { %2749 = vrot.lane.b32.xlu0 %v7479_v8, %s10825_s22  ;;  %2735 = vrot.lane.b32.xlu1 %v7472_v49, %s10825_s22  ;;  %v10929_v49 = vmov 0 }
 0x25a   : > { %v10930_v49 = vsel %vm9312_vm15, 4294967295, %v10929_v49 }
 0x25b   : > { %10931 = vst [vmem:[#allocation13_spill] sm:$0xff] %v10930_v49 }
 0x25d   : > { %2739 = vrot.lane.b32.xlu0 %v7474_v32, %s10825_s22  ;;  %2737 = vrot.lane.b32.xlu1 %v7473_v60, %s10825_s22 }
 0x261   : > { %2741 = vrot.lane.b32.xlu0 %v7475_v7, %s10825_s22  ;;  %s10939_s22 = smov 90  }
 0x2a0   : > { %v2762_v13 = vpop.permute.xlu1 %2761 }
 0x2a4   : > { %v2766_v24 = vpop.permute.xlu0 %2765  ;;  %v2754_v11 = vpop.permute.xlu1 %2753 }
 0x2a8   : > { %v2758_v10 = vpop.permute.xlu0 %2757 }
 0x2b7   : > { %v2752_v57 = vpop.permute.xlu1 %2751 }
 0x2b8   : > { %v2771_v35 = vrot.slane %v2752_v57, 4 }
 0x2ba   : > { %v2784_v39 = vsel %vm2775_vm14, %v2771_v35, %v2752_v57  ;;  %v2785_v32 = vsel %vm2775_vm14, %v2771_v35, %v2754_v11 }
 0x2bb   : > { %2820 = vst.msk [vmem:[#allocation2 + $0x30] sm:$0xff] %vm9312_vm15, %v2784_v39  ;;  %v2756_v63 = vpop.permute.xlu0 %2755 }
 0x2bc   : > { %2821 = vst.msk [vmem:[#allocation2 + $0x38] sm:$0xf] %vm2812_vm0, %v2785_v32  ;;  %v2772_v12 = vrot.slane %v2756_v63, 4 }
 0x2be   : > { %v2786_v46 = vsel %vm2775_vm14, %v2772_v12, %v2756_v63  ;;  %v2787_v26 = vsel %vm2775_vm14, %v2772_v12, %v2758_v10  ;;  %v9429_v63 = vld [vmem:[%s10798_s5 + $0x10] sm:$0xff]  }
 0x2bf   : > { %v2760_v14 = vpop.permute.xlu1 %2759  ;;  %2822 = vst.msk [vmem:[#allocation2 + $0x3c] sm:$0xff] %vm9312_vm15, %v2786_v46  ;;  %7784 = vmatprep.mubr.msk.bf16.mxu0 %vm2959_vm10, %v9429_v63 }
 0x2c0   : > { %2823 = vst.msk [vmem:[#allocation2 + $0x44] sm:$0xf] %vm2812_vm0, %v2787_v26  ;;  %v2773_v21 = vrot.slane %v2760_v14, 4 }
 0x2c2   : > { %v2788_v47 = vsel %vm2775_vm14, %v2773_v21, %v2760_v14  ;;  %v2789_v20 = vsel %vm2775_vm14, %v2773_v21, %v2762_v13  ;;  %v2836_v22 = vld [vmem:[#allocation2 + $0x30] sm:$0xff] }
 0x2c3   : > { %2824 = vst.msk [vmem:[#allocation2 + $0x48] sm:$0xff] %vm9312_vm15, %v2788_v47  ;;  %v2764_v58 = vpop.permute.xlu0 %2763  ;;  %v2744_v1 = vpop.permute.xlu1 %2743  ;;  %v2837_v7 = vld [vmem:[#allocation2 + $0x38] sm:$0xf] }
 0x2c4   : > { %2825 = vst.msk [vmem:[#allocation2 + $0x50] sm:$0xf] %vm2812_vm0, %v2789_v20  ;;  %v2774_v53 = vrot.slane %v2764_v58, 4  ;;  %v2769_v16 = vrot.slane %v2744_v1, 4 }
 0x2c6   : > { %v2790_v17 = vsel %vm2775_vm14, %v2774_v53, %v2764_v58  ;;  %v2791_v25 = vsel %vm2775_vm14, %v2774_v53, %v2766_v24  ;;  %v2780_v51 = vsel %vm2775_vm14, %v2769_v16, %v2744_v1  ;;  %v2838_v8 = vld [vmem:[#allocation2 + $0x3c] sm:$0xff] }
 0x2c7   : > { %2826 = vst.msk [vmem:[#allocation2 + $0x54] sm:$0xff] %vm9312_vm15, %v2790_v17  ;;  %2816 = vst.msk [vmem:[#allocation2 + $0x18] sm:$0xff] %vm9312_vm15, %v2780_v51  ;;  %v2748_v0 = vpop.permute.xlu0 %2747  ;;  %v2746_v34 = vpop.permute.xlu1 %2745  ;;  %v2839_v60 = vld [vmem:[#allocation2 + $0x44] sm:$0xf]  ;;  %v9390_v42 = vcombine.high %v2836_v22, %v2838_v8  ;;  %v9398_v24 = vcombine.low %v2836_v22, %v2838_v8 }
 0x2c8   : > { %2827 = vst.msk [vmem:[#allocation2 + $0x5c] sm:$0xf] %vm2812_vm0, %v2791_v25  ;;  %v2770_v9 = vrot.slane %v2748_v0, 4  ;;  %v2781_v33 = vsel %vm2775_vm14, %v2769_v16, %v2746_v34  ;;  %v9394_v13 = vcombine.low %v2837_v7, %v2839_v60  ;;  %v8141_v60 = vld [vmem:[%s10798_s5] sm:$0xff]  }
 0x2c9   : > { %2817 = vst.msk [vmem:[#allocation2 + $0x20] sm:$0xf] %vm2812_vm0, %v2781_v33 }
 0x2ca   : > { %v2782_v6 = vsel %vm2775_vm14, %v2770_v9, %v2748_v0  ;;  %v2840_v10 = vld [vmem:[#allocation2 + $0x48] sm:$0xff] }
 0x2cb   : > { %2818 = vst.msk [vmem:[#allocation2 + $0x24] sm:$0xff] %vm9312_vm15, %v2782_v6  ;;  %v2750_v44 = vpop.permute.xlu0 %2749  ;;  %v2736_v40 = vpop.permute.xlu1 %2735  ;;  %v2841_v39 = vld [vmem:[#allocation2 + $0x50] sm:$0xf] }
 0x2cc   : > { %v2783_v4 = vsel %vm2775_vm14, %v2770_v9, %v2750_v44  ;;  %v2767_v43 = vrot.slane %v2736_v40, 4 }
 0x2cd   : > { %2819 = vst.msk [vmem:[#allocation2 + $0x2c] sm:$0xf] %vm2812_vm0, %v2783_v4 }
 0x2ce   : > { %v2776_v62 = vsel %vm2775_vm14, %v2767_v43, %v2736_v40  ;;  %v2832_v3 = vld [vmem:[#allocation2 + $0x18] sm:$0xff] }
 0x2cf   : > { %2811 = vst.msk [vmem:[#allocation2] sm:$0xff] %vm9312_vm15, %v2776_v62  ;;  %v2740_v19 = vpop.permute.xlu0 %2739  ;;  %v2738_v36 = vpop.permute.xlu1 %2737  ;;  %v2842_v11 = vld [vmem:[#allocation2 + $0x54] sm:$0xff]  ;;  %v2843_v35 = vld [vmem:[#allocation2 + $0x5c] sm:$0xf] }
 0x2d0   : > { %v2768_v23 = vrot.slane %v2740_v19, 4  ;;  %v2777_v28 = vsel %vm2775_vm14, %v2767_v43, %v2738_v36  ;;  %v2833_v54 = vld [vmem:[#allocation2 + $0x20] sm:$0xf]  ;;  %v9410_v57 = vcombine.high %v2840_v10, %v2842_v11  ;;  %v9418_v32 = vcombine.low %v2841_v39, %v2843_v35 }
 0x2d1   : > { %2813 = vst.msk [vmem:[#allocation2 + $0x8] sm:$0xf] %vm2812_vm0, %v2777_v28  ;;  %v9431_v12 = vcombine.low %v2840_v10, %v2842_v11 }
 0x2d2   : > { %v2778_v31 = vsel %vm2775_vm14, %v2768_v23, %v2740_v19  ;;  %v2834_v56 = vld [vmem:[#allocation2 + $0x24] sm:$0xff] }
 0x2d3   : > { %2814 = vst.msk [vmem:[#allocation2 + $0xc] sm:$0xff] %vm9312_vm15, %v2778_v31  ;;  %v2742_v5 = vpop.permute.xlu0 %2741  ;;  %v9372_v61 = vcombine.high %v2832_v3, %v2834_v56  ;;  %v9378_v38 = vcombine.low %v2832_v3, %v2834_v56  ;;  %v8140_v3 = vld [vmem:[%s10798_s5 + $0x18] sm:$0xff]  }
 0x2d4   : > { %v2779_v59 = vsel %vm2775_vm14, %v2768_v23, %v2742_v5  ;;  %v2835_v50 = vld [vmem:[#allocation2 + $0x2c] sm:$0xf] }
 0x2d5   : > { %2815 = vst.msk [vmem:[#allocation2 + $0x14] sm:$0xf] %vm2812_vm0, %v2779_v59  ;;  %v9380_v2 = vcombine.low %v2833_v54, %v2835_v50 }
 0x2d6   : > { %v2828_v55 = vld [vmem:[#allocation2] sm:$0xff] }
 0x2d8   : > { %v2829_v52 = vld [vmem:[#allocation2 + $0x8] sm:$0xf] }
 0x2da   : > { %v2830_v15 = vld [vmem:[#allocation2 + $0xc] sm:$0xff] }
 0x2db   : > { %v9356_v41 = vcombine.high %v2828_v55, %v2830_v15  ;;  %v9364_v29 = vcombine.low %v2828_v55, %v2830_v15 }
 0x2dc   : > { %v2831_v48 = vld [vmem:[#allocation2 + $0x14] sm:$0xf] }
 0x2dd   : > { %v9358_v27 = vcombine.low %v2829_v52, %v2831_v48  ;;  %2917 = vrot.lane.b32.xlu0 %v9356_v41, %s10932_s23 }
 0x2df   : > { %2919 = vrot.lane.b32.xlu1 %v9358_v27, %s10932_s23 }
 0x2e1   : > { %2915 = vrot.lane.b32.xlu0 %v9364_v29, %s10932_s23 }
 0x2e3   : > { %3217 = vrot.lane.b32.xlu1 %v9358_v27, %s10933_s16 }
 0x2e5   : > { %3215 = vrot.lane.b32.xlu0 %v9356_v41, %s10933_s16 }
 0x2e7   : > { %2923 = vrot.lane.b32.xlu1 %v9372_v61, %s10932_s23 }
 0x2e9   : > { %3213 = vrot.lane.b32.xlu0 %v9364_v29, %s10933_s16 }
 0x2eb   : > { %2921 = vrot.lane.b32.xlu1 %v9378_v38, %s10932_s23 }
 0x2ed   : > { %2925 = vrot.lane.b32.xlu0 %v9380_v2, %s10932_s23 }
 0x2ef   : > { %3221 = vrot.lane.b32.xlu1 %v9372_v61, %s10933_s16 }
 0x2f1   : > { %3223 = vrot.lane.b32.xlu0 %v9380_v2, %s10933_s16 }
 0x2f3   : > { %3219 = vrot.lane.b32.xlu1 %v9378_v38, %s10933_s16 }
 0x2f5   : > { %2929 = vrot.lane.b32.xlu0 %v9390_v42, %s10932_s23 }
 0x2f7   : > { %2931 = vrot.lane.b32.xlu1 %v9394_v13, %s10932_s23 }
 0x2f9   : > { %2927 = vrot.lane.b32.xlu0 %v9398_v24, %s10932_s23 }
 0x2fb   : > { %3229 = vrot.lane.b32.xlu1 %v9394_v13, %s10933_s16 }
 0x2fd   : > { %3227 = vrot.lane.b32.xlu0 %v9390_v42, %s10933_s16 }
 0x2ff   : > { %3408 = vrot.lane.b32.xlu1 %v9394_v13, %s10934_s24 }
 0x301   : > { %3225 = vrot.lane.b32.xlu0 %v9398_v24, %s10933_s16 }
 0x303   : > { %2935 = vrot.lane.b32.xlu1 %v9410_v57, %s10932_s23 }
 0x305   : > { %3406 = vrot.lane.b32.xlu0 %v9390_v42, %s10934_s24 }
 0x307   : > { %3400 = vrot.lane.b32.xlu1 %v9372_v61, %s10934_s24 }
 0x309   : > { %2937 = vrot.lane.b32.xlu0 %v9418_v32, %s10932_s23 }
 0x30b   : > { %3398 = vrot.lane.b32.xlu1 %v9378_v38, %s10934_s24 }
 0x30d   : > { %3404 = vrot.lane.b32.xlu0 %v9398_v24, %s10934_s24 }
 0x30f   : > { %2933 = vrot.lane.b32.xlu1 %v9431_v12, %s10932_s23 }
 0x311   : > { %3402 = vrot.lane.b32.xlu0 %v9380_v2, %s10934_s24 }
 0x313   : > { %3396 = vrot.lane.b32.xlu1 %v9358_v27, %s10934_s24 }
 0x315   : > { %3394 = vrot.lane.b32.xlu0 %v9356_v41, %s10934_s24 }
 0x317   : > { %3587 = vrot.lane.b32.xlu1 %v9394_v13, %s10935_s21 }
 0x319   : > { %3392 = vrot.lane.b32.xlu0 %v9364_v29, %s10934_s24 }
 0x31b   : > { %3579 = vrot.lane.b32.xlu1 %v9372_v61, %s10935_s21 }
 0x31d   : > { %3585 = vrot.lane.b32.xlu0 %v9390_v42, %s10935_s21 }
 0x31f   : > { %3577 = vrot.lane.b32.xlu1 %v9378_v38, %s10935_s21 }
 0x321   : > { %3583 = vrot.lane.b32.xlu0 %v9398_v24, %s10935_s21 }
 0x323   : > { %3233 = vrot.lane.b32.xlu1 %v9410_v57, %s10933_s16 }
 0x325   : > { %3581 = vrot.lane.b32.xlu0 %v9380_v2, %s10935_s21 }
 0x327   : > { %3575 = vrot.lane.b32.xlu1 %v9358_v27, %s10935_s21 }
 0x329   : > { %3235 = vrot.lane.b32.xlu0 %v9418_v32, %s10933_s16 }
 0x32b   : > { %3766 = vrot.lane.b32.xlu1 %v9394_v13, %s10936_s20 }
 0x32d   : > { %3573 = vrot.lane.b32.xlu0 %v9356_v41, %s10935_s21 }
 0x32f   : > { %3231 = vrot.lane.b32.xlu1 %v9431_v12, %s10933_s16 }
 0x331   : > { %3571 = vrot.lane.b32.xlu0 %v9364_v29, %s10935_s21 }
 0x333   : > { %3412 = vrot.lane.b32.xlu1 %v9410_v57, %s10934_s24 }
 0x335   : > { %3764 = vrot.lane.b32.xlu0 %v9390_v42, %s10936_s20 }
 0x337   : > { %3758 = vrot.lane.b32.xlu1 %v9372_v61, %s10936_s20 }
 0x339   : > { %3414 = vrot.lane.b32.xlu0 %v9418_v32, %s10934_s24 }
 0x33b   : > { %3756 = vrot.lane.b32.xlu1 %v9378_v38, %s10936_s20 }
 0x33d   : > { %3762 = vrot.lane.b32.xlu0 %v9398_v24, %s10936_s20 }
 0x33f   : > { %3410 = vrot.lane.b32.xlu1 %v9431_v12, %s10934_s24 }
 0x341   : > { %3760 = vrot.lane.b32.xlu0 %v9380_v2, %s10936_s20 }
 0x343   : > { %3754 = vrot.lane.b32.xlu1 %v9358_v27, %s10936_s20 }
 0x345   : > { %3752 = vrot.lane.b32.xlu0 %v9356_v41, %s10936_s20 }
 0x347   : > { %3591 = vrot.lane.b32.xlu1 %v9410_v57, %s10935_s21 }
 0x349   : > { %3593 = vrot.lane.b32.xlu0 %v9418_v32, %s10935_s21 }
 0x34b   : > { %3945 = vrot.lane.b32.xlu1 %v9394_v13, %s10937_s30 }
 0x34d   : > { %3750 = vrot.lane.b32.xlu0 %v9364_v29, %s10936_s20 }
 0x34f   : > { %v9501_v46 = vpop.permute.xlu0 %2917  ;;  %3589 = vrot.lane.b32.xlu1 %v9431_v12, %s10935_s21 }
 0x351   : > { %3943 = vrot.lane.b32.xlu0 %v9390_v42, %s10937_s30  ;;  %v9507_v26 = vpop.permute.xlu1 %2919 }
 0x352   : > { %v2940_v8 = vsel %vm519_vm2, %v9501_v46, %v9507_v26 }
 0x353   : > { %v9509_v14 = vpop.permute.xlu0 %2915  ;;  %3937 = vrot.lane.b32.xlu1 %v9372_v61, %s10937_s30 }
 0x354   : > { %v2939_v7 = vsel %vm519_vm2, %v9509_v14, %v9501_v46 }
 0x355   : > { %3941 = vrot.lane.b32.xlu0 %v9398_v24, %s10937_s30  ;;  %v9515_v21 = vpop.permute.xlu1 %3217 }
 0x357   : > { %v9517_v47 = vpop.permute.xlu0 %3215  ;;  %3770 = vrot.lane.b32.xlu1 %v9410_v57, %s10936_s20 }
 0x359   : > { %3772 = vrot.lane.b32.xlu0 %v9418_v32, %s10936_s20  ;;  %v9523_v20 = vpop.permute.xlu1 %2923 }
 0x35b   : > { %v9525_v58 = vpop.permute.xlu0 %3213  ;;  %3935 = vrot.lane.b32.xlu1 %v9378_v38, %s10937_s30 }
 0x35d   : > { %3939 = vrot.lane.b32.xlu0 %v9380_v2, %s10937_s30  ;;  %v9531_v1 = vpop.permute.xlu1 %2921 }
 0x35e   : > { %v2941_v50 = vsel %vm519_vm2, %v9531_v1, %v9523_v20 }
 0x35f   : > { %v2926_v53 = vpop.permute.xlu0 %2925  ;;  %3768 = vrot.lane.b32.xlu1 %v9431_v12, %s10936_s20 }
 0x360   : > { %v2942_v48 = vsel %vm519_vm2, %v9523_v20, %v2926_v53 }
 0x361   : > { %3931 = vrot.lane.b32.xlu0 %v9356_v41, %s10937_s30  ;;  %v9537_v16 = vpop.permute.xlu1 %3221 }
 0x363   : > { %v9539_v17 = vpop.permute.xlu0 %3223  ;;  %3933 = vrot.lane.b32.xlu1 %v9358_v27, %s10937_s30 }
 0x365   : > { %3929 = vrot.lane.b32.xlu0 %v9364_v29, %s10937_s30  ;;  %v9545_v25 = vpop.permute.xlu1 %3219 }
 0x367   : > { %v2930_v51 = vpop.permute.xlu0 %2929  ;;  %3949 = vrot.lane.b32.xlu1 %v9410_v57, %s10937_s30 }
 0x369   : > { %3951 = vrot.lane.b32.xlu0 %v9418_v32, %s10937_s30  ;;  %v2932_v0 = vpop.permute.xlu1 %2931 }
 0x36a   : > { %v2944_v59 = vsel %vm519_vm2, %v2930_v51, %v2932_v0 }
 0x36b   : > { %v2928_v34 = vpop.permute.xlu0 %2927  ;;  %4124 = vrot.lane.b32.xlu1 %v9394_v13, %s10938_s15 }
 0x36c   : > { %v2943_v15 = vsel %vm519_vm2, %v2928_v34, %v2930_v51  ;;  %v3240_v51 = vsel %vm915_vm4, %v9537_v16, %v9539_v17  ;;  %v8144_v34 = vld [vmem:[%s10798_s5 + $0x28] sm:$0xff]  }
 0x36d   : > { %4122 = vrot.lane.b32.xlu0 %v9390_v42, %s10938_s15  ;;  %v9555_v9 = vpop.permute.xlu1 %3229 }
 0x36f   : > { %v9557_v33 = vpop.permute.xlu0 %3227  ;;  %3947 = vrot.lane.b32.xlu1 %v9431_v12, %s10937_s30 }
 0x371   : > { %4120 = vrot.lane.b32.xlu0 %v9398_v24, %s10938_s15  ;;  %v9563_v6 = vpop.permute.xlu1 %3408 }
 0x373   : > { %v9565_v44 = vpop.permute.xlu0 %3225  ;;  %4116 = vrot.lane.b32.xlu1 %v9372_v61, %s10938_s15 }
 0x375   : > { %4118 = vrot.lane.b32.xlu0 %v9380_v2, %s10938_s15  ;;  %v2936_v40 = vpop.permute.xlu1 %2935 }
 0x377   : > { %v9571_v4 = vpop.permute.xlu0 %3406  ;;  %4114 = vrot.lane.b32.xlu1 %v9378_v38, %s10938_s15 }
 0x379   : > { %4130 = vrot.lane.b32.xlu0 %v9418_v32, %s10938_s15  ;;  %v9577_v43 = vpop.permute.xlu1 %3400 }
 0x37b   : > { %v2938_v62 = vpop.permute.xlu0 %2937  ;;  %4128 = vrot.lane.b32.xlu1 %v9410_v57, %s10938_s15 }
 0x37c   : > { %7776 = vmatprep.subr.bf16.mxu0 %v2938_v62  ;;  %v2946_v19 = vsel %vm519_vm2, %v2936_v40, %v2938_v62 }
 0x37d   : > { %4110 = vrot.lane.b32.xlu0 %v9356_v41, %s10938_s15  ;;  %2974 = vmatprep.subr.bf16.mxu1 %v2946_v19  ;;  %v9584_v36 = vpop.permute.xlu1 %3398 }
 0x37e   : > { %7777 = vmatpush3.bf16.msra.mxu0 %v2938_v62 }
 0x37f   : > { %7778 = vmatprep.subr.bf16.mxu0 %v2932_v0  ;;  %v9586_v23 = vpop.permute.xlu0 %3404  ;;  %4126 = vrot.lane.b32.xlu1 %v9431_v12, %s10938_s15 }
 0x381   : > { %4108 = vrot.lane.b32.xlu0 %v9364_v29, %s10938_s15  ;;  %v2934_v28 = vpop.permute.xlu1 %2933 }
 0x382   : > { %7779 = vmatpush3.bf16.msra.mxu0 %v2932_v0  ;;  %v2945_v31 = vsel %vm519_vm2, %v2934_v28, %v2936_v40 }
 0x383   : > { %7780 = vmatprep.subr.bf16.mxu0 %v2926_v53  ;;  %v9593_v5 = vpop.permute.xlu0 %3402  ;;  %4112 = vrot.lane.b32.xlu1 %v9358_v27, %s10938_s15 }
 0x384   : > { %2975 = vmatpush1.bf16.msra.mxu1 %v2945_v31 }
 0x385   : > { %2976 = vmatprep.subr.bf16.mxu1 %v2944_v59  ;;  %4301 = vrot.lane.b32.xlu0 %v9390_v42, %s10939_s22  ;;  %v9600_v55 = vpop.permute.xlu1 %3396  ;;  %v3420_v59 = vsel %vm1154_vm3, %v9586_v23, %v9571_v4  ;;  %v3418_v23 = vsel %vm1154_vm3, %v9584_v36, %v9577_v43 }
 0x386   : > { %7781 = vmatpush3.bf16.msra.mxu0 %v2926_v53  ;;  %v3241_v53 = vsel %vm915_vm4, %v9565_v44, %v9557_v33  ;;  %v3239_v44 = vsel %vm915_vm4, %v9545_v25, %v9537_v16  ;;  %v3237_v16 = vsel %vm915_vm4, %v9525_v58, %v9517_v47 }
 0x387   : > { %7782 = vmatprep.subr.bf16.mxu0 %v9507_v26  ;;  %v9604_v52 = vpop.permute.xlu0 %3394  ;;  %4303 = vrot.lane.b32.xlu1 %v9394_v13, %s10939_s22 }
 0x388   : > { %2977 = vmatpush1.bf16.msra.mxu1 %v2943_v15 }
 0x389   : > { %2978 = vmatprep.subr.bf16.mxu1 %v2942_v48  ;;  %4309 = vrot.lane.b32.xlu0 %v9418_v32, %s10939_s22  ;;  %v9612_v56 = vpop.permute.xlu1 %3587  ;;  %v8146_v48 = vld [vmem:[%s10798_s5 + $0x38] sm:$0xff]  }
 0x38a   : > { %7783 = vmatpush3.bf16.msra.mxu0 %v9507_v26  ;;  %v4451_v26 = vld [vmem:[%s10799_s6] sm:$0xff] }
 0x38b   : > { %7788 = vmatprep.subr.bf16.mxu0 %v9418_v32  ;;  %v9622_v54 = vpop.permute.xlu0 %3392  ;;  %4307 = vrot.lane.b32.xlu1 %v9410_v57, %s10939_s22 }
 0x38c   : > { %2979 = vmatpush1.bf16.msra.mxu1 %v2941_v50 }
 0x38d   : > { %2980 = vmatprep.subr.bf16.mxu1 %v2940_v8  ;;  %4299 = vrot.lane.b32.xlu0 %v9398_v24, %s10939_s22  ;;  %v9631_v22 = vpop.permute.xlu1 %3579 }
 0x38e   : > { %7785 = vmatmul.mubr.msk.bf16.vlgmr.msra.gmra.mxu0 %vm2959_vm10, %v8140_v3 }
 0x38f   : > { %7789 = vmatpush3.bf16.msra.mxu0 %v9418_v32  ;;  %v9641_v11 = vpop.permute.xlu0 %3585  ;;  %4305 = vrot.lane.b32.xlu1 %v9431_v12, %s10939_s22  ;;  %v4453_v32 = vld [vmem:[%s10799_s6 + $0x10] sm:$0xff] }
 0x390   : > { %7790 = vmatprep.subr.bf16.mxu0 %v9394_v13  ;;  %2981 = vmatpush1.bf16.msra.mxu1 %v2939_v7 }
 0x391   : > { %3104 = vmatprep.subr.bf16.mxu1 %v9410_v57  ;;  %4297 = vrot.lane.b32.xlu0 %v9380_v2, %s10939_s22  ;;  %v9649_v10 = vpop.permute.xlu1 %3577 }
 0x392   : > { %7796 = vmatprep.mubr.msk.bf16.mxu0 %vm2959_vm10, %v8141_v60 }
 0x393   : > { %7791 = vmatpush3.bf16.msra.mxu0 %v9394_v13  ;;  %7295 = vmatmul.mubr.msk.bf16.vlgmr.msra.gmra.mxu1 %vm2959_vm10, %v9429_v63  ;;  %v9655_v35 = vpop.permute.xlu0 %3583  ;;  %v4452_v63 = vld [vmem:[%s10799_s6 + $0x8] sm:$0xff] }
 0x394   : > { %7792 = vmatprep.subr.bf16.mxu0 %v9380_v2  ;;  %4295 = vrot.lane.b32.xlu1 %v9372_v61, %s10939_s22 }
 0x395   : > { %3105 = vmatpush1.bf16.msra.mxu1 %v9431_v12  ;;  %4289 = vrot.lane.b32.xlu0 %v9356_v41, %s10939_s22  ;;  %v3234_v57 = vpop.permute.xlu1 %3233 }
 0x396   : > { %3106 = vmatprep.subr.bf16.mxu1 %v9390_v42  ;;  %3008 = vmatprep.mubr.bf16.mxu1 %v10889_v30  ;;  %v4454_v42 = vld [vmem:[%s10799_s6 + $0x18] sm:$0xff] }
 0x397   : > { %7793 = vmatpush3.bf16.msra.mxu0 %v9380_v2  ;;  %v9666_v13 = vpop.permute.xlu0 %3581  ;;  %v8142_v2 = vld [vmem:[%s10798_s5 + $0x8] sm:$0xff]  }
 0x398   : > { %7794 = vmatprep.subr.bf16.mxu0 %v9358_v27  ;;  %4293 = vrot.lane.b32.xlu1 %v9378_v38, %s10939_s22 }
 0x399   : > { %3107 = vmatpush1.bf16.msra.mxu1 %v9398_v24  ;;  %4287 = vrot.lane.b32.xlu0 %v9364_v29, %s10939_s22  ;;  %v9674_v39 = vpop.permute.xlu1 %3575 }
 0x39a   : > { %3108 = vmatprep.subr.bf16.mxu1 %v9372_v61 }
 0x39b   : > { %7795 = vmatpush3.bf16.msra.mxu0 %v9358_v27  ;;  %7296 = vmatmul.mubr.msk.bf16.gmra.mxu1 %vm2959_vm10, %v8140_v3  ;;  %v3236_v24 = vpop.permute.xlu0 %3235 }
 0x39c   : > { %4291 = vrot.lane.b32.xlu1 %v9358_v27, %s10939_s22  ;;  %7800 = vmatprep.subr.bf16.mxu0 %v3236_v24  ;;  %v8143_v27 = vld [vmem:[%s10798_s5 + $0x20] sm:$0xff]  }
 0x39d   : > { %3109 = vmatpush1.bf16.msra.mxu1 %v9378_v38  ;;  %4472 = vperm.xlu0 %8093, %v4454_v42   ;;  %v9688_v61 = vpop.permute.xlu1 %3766 }
 0x39e   : > { %3110 = vmatprep.subr.bf16.mxu1 %v9356_v41  ;;  %7797 = vmatmul.mubr.msk.bf16.vlgmr.msra.gmra.mxu0 %vm2959_vm10, %v8142_v2  ;;  %v3244_v41 = vsel %vm915_vm4, %v3234_v57, %v3236_v24 }
 0x39f   : > { %7801 = vmatpush3.bf16.msra.mxu0 %v3236_v24  ;;  %v9701_v38 = vpop.permute.xlu0 %3573  ;;  %3128 = vmatprep.mubr.bf16.mxu1 %v10889_v30  ;;  %v8148_v24 = vld [vmem:[%s10798_s5 + $0x48] sm:$0xff]  }
 0x3a0   : > { %7802 = vmatprep.subr.bf16.mxu0 %v9555_v9  ;;  %4467 = vperm.xlu1 %8094, %v4453_v32  }
 0x3a1   : > { %3111 = vmatpush1.bf16.msra.mxu1 %v9364_v29  ;;  %4462 = vperm.xlu0 %8093, %v4452_v63   ;;  %v3232_v12 = vpop.permute.xlu1 %3231  ;;  %v3242_v29 = vsel %vm915_vm4, %v9557_v33, %v9555_v9  ;;  %v8145_v33 = vld [vmem:[%s10798_s5 + $0x30] sm:$0xff]  }
 0x3a2   : > { %3271 = vmatprep.subr.bf16.mxu1 %v3244_v41  ;;  %v3243_v46 = vsel %vm915_vm4, %v3232_v12, %v3234_v57  ;;  %7808 = vmatprep.mubr.msk.bf16.mxu0 %vm2959_vm10, %v8143_v27 }
 0x3a3   : > { %7803 = vmatpush3.bf16.msra.mxu0 %v9555_v9  ;;  %v9713_v14 = vpop.permute.xlu0 %3571 }
 0x3a4   : > { %7301 = vmatmul.mubr.msk.bf16.vlgmr.msra.gmra.mxu1 %vm2959_vm10, %v8141_v60  ;;  %7804 = vmatprep.subr.bf16.mxu0 %v9539_v17 }
 0x3a5   : > { %4457 = vperm.xlu1 %8094, %v4451_v26   ;;  %3272 = vmatpush1.bf16.msra.mxu1 %v3243_v46  ;;  %v3413_v20 = vpop.permute.xlu1 %3412 }
 0x3a6   : > { %3273 = vmatprep.subr.bf16.mxu1 %v3242_v29  ;;  %3138 = vmatprep.mubr.bf16.mxu1 %v10889_v30 }
 0x3a7   : > { %7805 = vmatpush3.bf16.msra.mxu0 %v9539_v17  ;;  %v9722_v1 = vpop.permute.xlu0 %3764  ;;  %v3238_v17 = vsel %vm915_vm4, %v9517_v47, %v9515_v21  ;;  %v3421_v47 = vsel %vm1154_vm3, %v9571_v4, %v9563_v6  ;;  %v8147_v4 = vld [vmem:[%s10798_s5 + $0x40] sm:$0xff]  }
 0x3a8   : > { %7806 = vmatprep.subr.bf16.mxu0 %v9515_v21 }
 0x3a9   : > { %3274 = vmatpush1.bf16.msra.mxu1 %v3241_v53  ;;  %v9731_v0 = vpop.permute.xlu1 %3758 }
 0x3aa   : > { %3275 = vmatprep.subr.bf16.mxu1 %v3240_v51 }
 0x3ab   : > { %7807 = vmatpush3.bf16.msra.mxu0 %v9515_v21  ;;  %v3415_v9 = vpop.permute.xlu0 %3414 }
 0x3ac   : > { %7302 = vmatmul.mubr.msk.bf16.gmra.mxu1 %vm2959_vm10, %v8142_v2  ;;  %7812 = vmatprep.subr.bf16.mxu0 %v3415_v9  ;;  %v3423_v21 = vsel %vm1154_vm3, %v3413_v20, %v3415_v9  ;;  %v3599_v2 = vsel %vm1393_vm6, %v9655_v35, %v9641_v11  ;;  %v3597_v35 = vsel %vm1393_vm6, %v9649_v10, %v9631_v22 }
 0x3ad   : > { %3276 = vmatpush1.bf16.msra.mxu1 %v3239_v44  ;;  %v9747_v40 = vpop.permute.xlu1 %3756  ;;  %3295 = vmatprep.mubr.bf16.mxu1 %v10889_v30 }
 0x3ae   : > { %3277 = vmatprep.subr.bf16.mxu1 %v3238_v17  ;;  %7809 = vmatmul.mubr.msk.bf16.vlgmr.msra.gmra.mxu0 %vm2959_vm10, %v8144_v34  ;;  %v3776_v51 = vsel %vm1632_vm5, %v9747_v40, %v9731_v0 }
 0x3af   : > { %7813 = vmatpush3.bf16.msra.mxu0 %v3415_v9  ;;  %v9751_v62 = vpop.permute.xlu0 %3762  ;;  %7820 = vmatprep.mubr.msk.bf16.mxu0 %vm2959_vm10, %v8145_v33 }
 0x3b0   : > { %7814 = vmatprep.subr.bf16.mxu0 %v9563_v6 }
 0x3b1   : > { %3278 = vmatpush1.bf16.msra.mxu1 %v3237_v16  ;;  %v3411_v25 = vpop.permute.xlu1 %3410 }
 0x3b2   : > { %3450 = vmatprep.subr.bf16.mxu1 %v3423_v21  ;;  %v3422_v19 = vsel %vm1154_vm3, %v3411_v25, %v3413_v20  ;;  %v8150_v20 = vld [vmem:[%s10798_s5 + $0x58] sm:$0xff]  }
 0x3b3   : > { %7815 = vmatpush3.bf16.msra.mxu0 %v9563_v6  ;;  %v9761_v28 = vpop.permute.xlu0 %3760  ;;  %v3419_v6 = vsel %vm1154_vm3, %v9577_v43, %v9593_v5  ;;  %v3416_v43 = vsel %vm1154_vm3, %v9622_v54, %v9604_v52 }
 0x3b4   : > { %7311 = vmatmul.mubr.msk.bf16.vlgmr.msra.gmra.mxu1 %vm2959_vm10, %v8143_v27  ;;  %7816 = vmatprep.subr.bf16.mxu0 %v9593_v5  ;;  %v3777_v29 = vsel %vm1632_vm5, %v9731_v0, %v9761_v28 }
 0x3b5   : > { %3451 = vmatpush1.bf16.msra.mxu1 %v3422_v19  ;;  %v9768_v58 = vpop.permute.xlu1 %3754  ;;  %3305 = vmatprep.mubr.bf16.mxu1 %v10889_v30 }
 0x3b6   : > { %3452 = vmatprep.subr.bf16.mxu1 %v3421_v47 }
 0x3b7   : > { %7817 = vmatpush3.bf16.msra.mxu0 %v9593_v5  ;;  %v9772_v31 = vpop.permute.xlu0 %3752  ;;  %v3417_v5 = vsel %vm1154_vm3, %v9604_v52, %v9600_v55  ;;  %v3600_v52 = vsel %vm1393_vm6, %v9641_v11, %v9612_v56  ;;  %v8149_v11 = vld [vmem:[%s10798_s5 + $0x50] sm:$0xff]  }
 0x3b8   : > { %7818 = vmatprep.subr.bf16.mxu0 %v9600_v55 }
 0x3b9   : > { %3453 = vmatpush1.bf16.msra.mxu1 %v3420_v59  ;;  %v3592_v15 = vpop.permute.xlu1 %3591  ;;  %v8153_v59 = vld [vmem:[%s10798_s5 + $0x70] sm:$0xff]  }
 0x3ba   : > { %3454 = vmatprep.subr.bf16.mxu1 %v3419_v6 }
 0x3bb   : > { %7819 = vmatpush3.bf16.msra.mxu0 %v9600_v55  ;;  %v3594_v3 = vpop.permute.xlu0 %3593 }
 0x3bc   : > { %7312 = vmatmul.mubr.msk.bf16.gmra.mxu1 %vm2959_vm10, %v8144_v34  ;;  %7824 = vmatprep.subr.bf16.mxu0 %v3594_v3  ;;  %v3602_v36 = vsel %vm1393_vm6, %v3592_v15, %v3594_v3  ;;  %v3775_v34 = vsel %vm1632_vm5, %v9772_v31, %v9768_v58 }
 0x3bd   : > { %3455 = vmatpush1.bf16.msra.mxu1 %v3418_v23  ;;  %v9795_v50 = vpop.permute.xlu1 %3945  ;;  %3474 = vmatprep.mubr.bf16.mxu1 %v10889_v30 }
 0x3be   : > { %3456 = vmatprep.subr.bf16.mxu1 %v3417_v5  ;;  %7821 = vmatmul.mubr.msk.bf16.vlgmr.msra.gmra.mxu0 %vm2959_vm10, %v8146_v48 }
 0x3bf   : > { %7825 = vmatpush3.bf16.msra.mxu0 %v3594_v3  ;;  %v9799_v8 = vpop.permute.xlu0 %3750  ;;  %7832 = vmatprep.mubr.msk.bf16.mxu0 %vm2959_vm10, %v8147_v4 }
 0x3c0   : > { %7826 = vmatprep.subr.bf16.mxu0 %v9612_v56  ;;  %v3774_v0 = vsel %vm1632_vm5, %v9799_v8, %v9772_v31 }
 0x3c1   : > { %3457 = vmatpush1.bf16.msra.mxu1 %v3416_v43  ;;  %v3590_v55 = vpop.permute.xlu1 %3589 }
 0x3c2   : > { %3629 = vmatprep.subr.bf16.mxu1 %v3602_v36  ;;  %v3601_v60 = vsel %vm1393_vm6, %v3590_v55, %v3592_v15 }
 0x3c3   : > { %7827 = vmatpush3.bf16.msra.mxu0 %v9612_v56  ;;  %v9809_v7 = vpop.permute.xlu0 %3943  ;;  %v3598_v56 = vsel %vm1393_vm6, %v9631_v22, %v9666_v13  ;;  %v3595_v22 = vsel %vm1393_vm6, %v9713_v14, %v9701_v38  ;;  %v3778_v14 = vsel %vm1632_vm5, %v9751_v62, %v9722_v1 }
 0x3c4   : > { %7321 = vmatmul.mubr.msk.bf16.vlgmr.msra.gmra.mxu1 %vm2959_vm10, %v8145_v33  ;;  %7828 = vmatprep.subr.bf16.mxu0 %v9666_v13  ;;  %v3958_v16 = vsel %vm1871_vm8, %v9809_v7, %v9795_v50 }
 0x3c5   : > { %3630 = vmatpush1.bf16.msra.mxu1 %v3601_v60  ;;  %v9816_v54 = vpop.permute.xlu1 %3937  ;;  %3484 = vmatprep.mubr.bf16.mxu1 %v10889_v30 }
 0x3c6   : > { %3631 = vmatprep.subr.bf16.mxu1 %v3600_v52 }
 0x3c7   : > { %7829 = vmatpush3.bf16.msra.mxu0 %v9666_v13  ;;  %v9820_v57 = vpop.permute.xlu0 %3941  ;;  %v3596_v13 = vsel %vm1393_vm6, %v9701_v38, %v9674_v39  ;;  %v3779_v38 = vsel %vm1632_vm5, %v9722_v1, %v9688_v61  ;;  %v8151_v1 = vld [vmem:[%s10798_s5 + $0x60] sm:$0xff]  }
 0x3c8   : > { %7830 = vmatprep.subr.bf16.mxu0 %v9674_v39  ;;  %v3957_v19 = vsel %vm1871_vm8, %v9820_v57, %v9809_v7 }
 0x3c9   : > { %3632 = vmatpush1.bf16.msra.mxu1 %v3599_v2  ;;  %v3771_v42 = vpop.permute.xlu1 %3770  ;;  %v8155_v2 = vld [vmem:[%s10798_s5 + $0x80] sm:$0xff]  }
 0x3ca   : > { %3633 = vmatprep.subr.bf16.mxu1 %v3598_v56 }
 0x3cb   : > { %7831 = vmatpush3.bf16.msra.mxu0 %v9674_v39  ;;  %v3773_v32 = vpop.permute.xlu0 %3772 }
 0x3cc   : > { %7322 = vmatmul.mubr.msk.bf16.gmra.mxu1 %vm2959_vm10, %v8146_v48  ;;  %7836 = vmatprep.subr.bf16.mxu0 %v3773_v32  ;;  %v3781_v10 = vsel %vm1632_vm5, %v3771_v42, %v3773_v32 }
 0x3cd   : > { %3634 = vmatpush1.bf16.msra.mxu1 %v3597_v35  ;;  %v9843_v63 = vpop.permute.xlu1 %3935  ;;  %3653 = vmatprep.mubr.bf16.mxu1 %v10889_v30 }
 0x3ce   : > { %3635 = vmatprep.subr.bf16.mxu1 %v3596_v13  ;;  %7833 = vmatmul.mubr.msk.bf16.vlgmr.msra.gmra.mxu0 %vm2959_vm10, %v8148_v24  ;;  %v3955_v6 = vsel %vm1871_vm8, %v9843_v63, %v9816_v54 }
 0x3cf   : > { %7837 = vmatpush3.bf16.msra.mxu0 %v3773_v32  ;;  %v9847_v27 = vpop.permute.xlu0 %3939  ;;  %7844 = vmatprep.mubr.msk.bf16.mxu0 %vm2959_vm10, %v8149_v11 }
 0x3d0   : > { %7838 = vmatprep.subr.bf16.mxu0 %v9688_v61 }
 0x3d1   : > { %3636 = vmatpush1.bf16.msra.mxu1 %v3595_v22  ;;  %v3769_v39 = vpop.permute.xlu1 %3768 }
 0x3d2   : > { %3808 = vmatprep.subr.bf16.mxu1 %v3781_v10  ;;  %v3780_v41 = vsel %vm1632_vm5, %v3769_v39, %v3771_v42 }
 0x3d3   : > { %7839 = vmatpush3.bf16.msra.mxu0 %v9688_v61  ;;  %v9857_v12 = vpop.permute.xlu0 %3931 }
 0x3d4   : > { %7331 = vmatmul.mubr.msk.bf16.vlgmr.msra.gmra.mxu1 %vm2959_vm10, %v8147_v4  ;;  %7840 = vmatprep.subr.bf16.mxu0 %v9761_v28 }
 0x3d5   : > { %3809 = vmatpush1.bf16.msra.mxu1 %v3780_v41  ;;  %v3934_v46 = vpop.permute.xlu1 %3933  ;;  %3663 = vmatprep.mubr.bf16.mxu1 %v10889_v30 }
 0x3d6   : > { %3810 = vmatprep.subr.bf16.mxu1 %v3779_v38  ;;  %v3954_v15 = vsel %vm1871_vm8, %v9857_v12, %v3934_v46 }
 0x3d7   : > { %7841 = vmatpush3.bf16.msra.mxu0 %v9761_v28  ;;  %v9866_v26 = vpop.permute.xlu0 %3929  ;;  %v3956_v28 = vsel %vm1871_vm8, %v9816_v54, %v9847_v27  ;;  %v8154_v54 = vld [vmem:[%s10798_s5 + $0x78] sm:$0xff]  }
 0x3d8   : > { %7842 = vmatprep.subr.bf16.mxu0 %v9768_v58  ;;  %v3953_v23 = vsel %vm1871_vm8, %v9866_v26, %v9857_v12 }
 0x3d9   : > { %3811 = vmatpush1.bf16.msra.mxu1 %v3778_v14  ;;  %v3950_v61 = vpop.permute.xlu1 %3949 }
 0x3da   : > { %3812 = vmatprep.subr.bf16.mxu1 %v3777_v29 }
 0x3db   : > { %7843 = vmatpush3.bf16.msra.mxu0 %v9768_v58  ;;  %v3952_v53 = vpop.permute.xlu0 %3951  ;;  %v8152_v58 = vld [vmem:[%s10798_s5 + $0x68] sm:$0xff]  }
 0x3dc   : > { %7332 = vmatmul.mubr.msk.bf16.gmra.mxu1 %vm2959_vm10, %v8148_v24  ;;  %7848 = vmatprep.subr.bf16.mxu0 %v3952_v53  ;;  %v3960_v44 = vsel %vm1871_vm8, %v3950_v61, %v3952_v53 }
 0x3dd   : > { %3813 = vmatpush1.bf16.msra.mxu1 %v3776_v51  ;;  %v4125_v9 = vpop.permute.xlu1 %4124  ;;  %3832 = vmatprep.mubr.bf16.mxu1 %v10889_v30 }
 0x3de   : > { %3814 = vmatprep.subr.bf16.mxu1 %v3775_v34  ;;  %7845 = vmatmul.mubr.msk.bf16.vlgmr.msra.gmra.mxu0 %vm2959_vm10, %v8150_v20 }
 0x3df   : > { %7849 = vmatpush3.bf16.msra.mxu0 %v3952_v53  ;;  %v4123_v33 = vpop.permute.xlu0 %4122  ;;  %7856 = vmatprep.mubr.msk.bf16.mxu0 %vm2959_vm10, %v8151_v1 }
 0x3e0   : > { %7850 = vmatprep.subr.bf16.mxu0 %v9795_v50  ;;  %v4137_v43 = vsel %vm2110_vm7, %v4123_v33, %v4125_v9 }
 0x3e1   : > { %3815 = vmatpush1.bf16.msra.mxu1 %v3774_v0  ;;  %v3948_v17 = vpop.permute.xlu1 %3947 }
 0x3e2   : > { %3987 = vmatprep.subr.bf16.mxu1 %v3960_v44  ;;  %v3959_v40 = vsel %vm1871_vm8, %v3948_v17, %v3950_v61  ;;  %v8156_v61 = vld [vmem:[%s10798_s5 + $0x88] sm:$0xff]  }
 0x3e3   : > { %7851 = vmatpush3.bf16.msra.mxu0 %v9795_v50  ;;  %v4121_v62 = vpop.permute.xlu0 %4120 }
 0x3e4   : > { %7341 = vmatmul.mubr.msk.bf16.vlgmr.msra.gmra.mxu1 %vm2959_vm10, %v8149_v11  ;;  %7852 = vmatprep.subr.bf16.mxu0 %v9847_v27  ;;  %v4136_v60 = vsel %vm2110_vm7, %v4121_v62, %v4123_v33 }
 0x3e5   : > { %3988 = vmatpush1.bf16.msra.mxu1 %v3959_v40  ;;  %v4117_v21 = vpop.permute.xlu1 %4116  ;;  %3842 = vmatprep.mubr.bf16.mxu1 %v10889_v30 }
 0x3e6   : > { %3989 = vmatprep.subr.bf16.mxu1 %v3958_v16 }
 0x3e7   : > { %7853 = vmatpush3.bf16.msra.mxu0 %v9847_v27  ;;  %v4119_v25 = vpop.permute.xlu0 %4118 }
 0x3e8   : > { %7854 = vmatprep.subr.bf16.mxu0 %v3934_v46  ;;  %v4135_v7 = vsel %vm2110_vm7, %v4117_v21, %v4119_v25 }
 0x3e9   : > { %3990 = vmatpush1.bf16.msra.mxu1 %v3957_v19  ;;  %v4115_v47 = vpop.permute.xlu1 %4114 }
 0x3ea   : > { %3991 = vmatprep.subr.bf16.mxu1 %v3956_v28  ;;  %v4134_v56 = vsel %vm2110_vm7, %v4115_v47, %v4117_v21 }
 0x3eb   : > { %7855 = vmatpush3.bf16.msra.mxu0 %v3934_v46  ;;  %v4131_v31 = vpop.permute.xlu0 %4130 }
 0x3ec   : > { %7342 = vmatmul.mubr.msk.bf16.gmra.mxu1 %vm2959_vm10, %v8150_v20  ;;  %7860 = vmatprep.subr.bf16.mxu0 %v4131_v31 }
 0x3ed   : > { %3992 = vmatpush1.bf16.msra.mxu1 %v3955_v6  ;;  %v4129_v48 = vpop.permute.xlu1 %4128  ;;  %4011 = vmatprep.mubr.bf16.mxu1 %v10889_v30 }
 0x3ee   : > { %3993 = vmatprep.subr.bf16.mxu1 %v3954_v15  ;;  %7857 = vmatmul.mubr.msk.bf16.vlgmr.msra.gmra.mxu0 %vm2959_vm10, %v8152_v58  ;;  %v4139_v4 = vsel %vm2110_vm7, %v4129_v48, %v4131_v31 }
 0x3ef   : > { %7861 = vmatpush3.bf16.msra.mxu0 %v4131_v31  ;;  %v4111_v3 = vpop.permute.xlu0 %4110  ;;  %7868 = vmatprep.mubr.msk.bf16.mxu0 %vm2959_vm10, %v8153_v59 }
 0x3f0   : > { %7862 = vmatprep.subr.bf16.mxu0 %v4125_v9 }
 0x3f1   : > { %3994 = vmatpush1.bf16.msra.mxu1 %v3953_v23  ;;  %v4127_v5 = vpop.permute.xlu1 %4126 }
 0x3f2   : > { %4166 = vmatprep.subr.bf16.mxu1 %v4139_v4  ;;  %v4138_v50 = vsel %vm2110_vm7, %v4127_v5, %v4129_v48 }
 0x3f3   : > { %7863 = vmatpush3.bf16.msra.mxu0 %v4125_v9  ;;  %v4109_v8 = vpop.permute.xlu0 %4108 }
 0x3f4   : > { %7351 = vmatmul.mubr.msk.bf16.vlgmr.msra.gmra.mxu1 %vm2959_vm10, %v8151_v1  ;;  %7864 = vmatprep.subr.bf16.mxu0 %v4119_v25  ;;  %v4132_v35 = vsel %vm2110_vm7, %v4109_v8, %v4111_v3 }
 0x3f5   : > { %4167 = vmatpush1.bf16.msra.mxu1 %v4138_v50  ;;  %v4113_v36 = vpop.permute.xlu1 %4112  ;;  %4021 = vmatprep.mubr.bf16.mxu1 %v10889_v30 }
 0x3f6   : > { %4168 = vmatprep.subr.bf16.mxu1 %v4137_v43  ;;  %v4133_v42 = vsel %vm2110_vm7, %v4111_v3, %v4113_v36 }
 0x3f7   : > { %7865 = vmatpush3.bf16.msra.mxu0 %v4119_v25  ;;  %v4302_v55 = vpop.permute.xlu0 %4301 }
 0x3f8   : > { %7866 = vmatprep.subr.bf16.mxu0 %v4113_v36 }
 0x3f9   : > { %4169 = vmatpush1.bf16.msra.mxu1 %v4136_v60  ;;  %v4304_v52 = vpop.permute.xlu1 %4303 }
 0x3fa   : > { %4170 = vmatprep.subr.bf16.mxu1 %v4135_v7  ;;  %v4316_v22 = vsel %vm2349_vm9, %v4302_v55, %v4304_v52 }
 0x3fb   : > { %7867 = vmatpush3.bf16.msra.mxu0 %v4113_v36  ;;  %v4310_v57 = vpop.permute.xlu0 %4309 }
 0x3fc   : > { %7352 = vmatmul.mubr.msk.bf16.gmra.mxu1 %vm2959_vm10, %v8152_v58  ;;  %7872 = vmatprep.subr.bf16.mxu0 %v4310_v57 }
 0x3fd   : > { %4171 = vmatpush1.bf16.msra.mxu1 %v4134_v56  ;;  %v4308_v24 = vpop.permute.xlu1 %4307  ;;  %4190 = vmatprep.mubr.bf16.mxu1 %v10889_v30 }
 0x3fe   : > { %4172 = vmatprep.subr.bf16.mxu1 %v4133_v42  ;;  %7869 = vmatmul.mubr.msk.bf16.vlgmr.msra.gmra.mxu0 %vm2959_vm10, %v8154_v54  ;;  %v4318_v11 = vsel %vm2349_vm9, %v4308_v24, %v4310_v57 }
 0x3ff   : > { %7873 = vmatpush3.bf16.msra.mxu0 %v4310_v57  ;;  %v4300_v32 = vpop.permute.xlu0 %4299  ;;  %7880 = vmatprep.mubr.msk.bf16.mxu0 %vm2959_vm10, %v8155_v2 }
 0x400   : > { %7874 = vmatprep.subr.bf16.mxu0 %v4304_v52  ;;  %v4315_v12 = vsel %vm2349_vm9, %v4300_v32, %v4302_v55 }
 0x401   : > { %4173 = vmatpush1.bf16.msra.mxu1 %v4132_v35  ;;  %v4306_v13 = vpop.permute.xlu1 %4305 }
 0x402   : > { %4345 = vmatprep.subr.bf16.mxu1 %v4318_v11  ;;  %v4317_v63 = vsel %vm2349_vm9, %v4306_v13, %v4308_v24 }
 0x403   : > { %7875 = vmatpush3.bf16.msra.mxu0 %v4304_v52  ;;  %v4298_v27 = vpop.permute.xlu0 %4297 }
 0x404   : > { %7361 = vmatmul.mubr.msk.bf16.vlgmr.msra.gmra.mxu1 %vm2959_vm10, %v8153_v59  ;;  %7876 = vmatprep.subr.bf16.mxu0 %v4298_v27 }
 0x405   : > { %4346 = vmatpush1.bf16.msra.mxu1 %v4317_v63  ;;  %4200 = vmatprep.mubr.bf16.mxu1 %v10889_v30 }
 0x406   : > { %4347 = vmatprep.subr.bf16.mxu1 %v4316_v22  ;;  %v4296_v10 = vpop.permute.xlu1 %4295 }
 0x407   : > { %7877 = vmatpush3.bf16.msra.mxu0 %v4298_v27  ;;  %v4290_v39 = vpop.permute.xlu0 %4289  ;;  %v4314_v41 = vsel %vm2349_vm9, %v4296_v10, %v4298_v27 }
 0x409   : > { %4348 = vmatpush1.bf16.msra.mxu1 %v4315_v12 }
 0x40a   : > { %4349 = vmatprep.subr.bf16.mxu1 %v4314_v41  ;;  %v4294_v38 = vpop.permute.xlu1 %4293 }
 0x40b   : > { %v4313_v46 = vsel %vm2349_vm9, %v4294_v38, %v4296_v10  ;;  %v4288_v26 = vpop.permute.xlu0 %4287 }
 0x40c   : > { %7362 = vmatmul.mubr.msk.bf16.gmra.mxu1 %vm2959_vm10, %v8154_v54  ;;  %v4311_v20 = vsel %vm2349_vm9, %v4288_v26, %v4290_v39 }
 0x40d   : > { %4350 = vmatpush1.bf16.msra.mxu1 %v4313_v46  ;;  %4369 = vmatprep.mubr.bf16.mxu1 %v10889_v30 }
 0x40e   : > { %v4292_v14 = vpop.permute.xlu1 %4291 }
 0x40f   : > { %7878 = vmatprep.subr.bf16.mxu0 %v4292_v14  ;;  %v4312_v29 = vsel %vm2349_vm9, %v4290_v39, %v4292_v14 }
 0x410   : > { %4351 = vmatprep.subr.bf16.mxu1 %v4312_v29  ;;  %7879 = vmatpush3.bf16.msra.mxu0 %v4292_v14 }
 0x411   : > { %4352 = vmatpush1.bf16.msra.mxu1 %v4311_v20 }
 0x413   : > { %7881 = vmatmul.mubr.msk.bf16.vlgmr.msra.gmra.mxu0 %vm2959_vm10, %v8156_v61 }
 0x414   : > { %7371 = vmatmul.mubr.msk.bf16.vlgmr.msra.gmra.mxu1 %vm2959_vm10, %v8155_v2 }
 0x415   : > { %4379 = vmatprep.mubr.bf16.mxu1 %v10889_v30 }
 0x41c   : > { %7372 = vmatmul.mubr.msk.bf16.gmra.mxu1 %vm2959_vm10, %v8156_v61 }
 0x41d   : > { %4689 = vmatprep.mubr.bf16.mxu1 %v10889_v30 }
 0x44e   : > { %v9972_v44 = vpop.f32.mrf.mxu0 }
 0x450   : > { %v9976_v62 = vpop.f32.mrf.mxu0 }
 0x452   : > { %v9978_v28 = vpop.f32.mrf.mxu0 }
 0x453   : > { %v3000_v53 = vpop.f32.mrf.mxu1 }
 0x454   : > { %v9982_v59 = vpop.f32.mrf.mxu0 }
 0x455   : > { %v3002_v1 = vpop.f32.mrf.mxu1 }
 0x457   : > { %v3004_v51 = vpop.f32.mrf.mxu1 }
 0x459   : > { %v9970_v34 = vpop.f32.mrf.mxu1 }
 0x45b   : > { %v3010_v9 = vpop.f32.mrf.mxu1 }
 0x45d   : > { %v3012_v33 = vpop.f32.mrf.mxu1 }
 0x45e   : > { %v9984_v4 = vpop.f32.mrf.mxu0 }
 0x45f   : > { %v3014_v0 = vpop.f32.mrf.mxu1 }
 0x460   : > { %v9988_v8 = vpop.f32.mrf.mxu0 }
 0x461   : > { %v9974_v17 = vpop.f32.mrf.mxu1 }
 0x462   : > { %v9990_v7 = vpop.f32.mrf.mxu0 }
 0x464   : > { %v3130_v40 = vpop.f32.mrf.mxu1  ;;  %v9994_v2 = vpop.f32.mrf.mxu0 }
 0x465   : > { %v3131_v16 = vadd.f32 %v3130_v40, %v3000_v53 }
 0x466   : > { %v3132_v21 = vpop.f32.mrf.mxu1 }
 0x467   : > { %v3133_v25 = vadd.f32 %v3132_v21, %v3002_v1 }
 0x468   : > { %v3134_v19 = vpop.f32.mrf.mxu1 }
 0x469   : > { %v3135_v47 = vadd.f32 %v3134_v19, %v3004_v51 }
 0x46a   : > { %v9980_v58 = vpop.f32.mrf.mxu1 }
 0x46c   : > { %v3140_v31 = vpop.f32.mrf.mxu1 }
 0x46d   : > { %v3141_v6 = vadd.f32 %v3140_v31, %v3010_v9 }
 0x46e   : > { %v3142_v15 = vpop.f32.mrf.mxu1  ;;  %v9996_v24 = vpop.f32.mrf.mxu0 }
 0x46f   : > { %v3143_v48 = vadd.f32 %v3142_v15, %v3012_v33 }
 0x470   : > { %v3144_v3 = vpop.f32.mrf.mxu1  ;;  %v10000_v63 = vpop.f32.mrf.mxu0 }
 0x471   : > { %v3145_v23 = vadd.f32 %v3144_v3, %v3014_v0 }
 0x472   : > { %v9986_v5 = vpop.f32.mrf.mxu1  ;;  %v10002_v39 = vpop.f32.mrf.mxu0 }
 0x474   : > { %v3297_v50 = vpop.f32.mrf.mxu1  ;;  %v10006_v26 = vpop.f32.mrf.mxu0 }
 0x475   : > { %v3365_v43 = vadd.f32 %v3297_v50, %v3131_v16 }
 0x476   : > { %v3299_v36 = vpop.f32.mrf.mxu1 }
 0x477   : > { %v3366_v55 = vadd.f32 %v3299_v36, %v3133_v25 }
 0x478   : > { %v3301_v60 = vpop.f32.mrf.mxu1 }
 0x479   : > { %v3368_v52 = vadd.f32 %v3301_v60, %v3135_v47 }
 0x47a   : > { %v9992_v54 = vpop.f32.mrf.mxu1 }
 0x47c   : > { %v3307_v57 = vpop.f32.mrf.mxu1 }
 0x47d   : > { %v3371_v56 = vadd.f32 %v3307_v57, %v3141_v6 }
 0x47e   : > { %v3309_v42 = vpop.f32.mrf.mxu1  ;;  %v7822_v29 = vpop.f32.mrf.mxu0 }
 0x47f   : > { %v3372_v32 = vadd.f32 %v3309_v42, %v3143_v48 }
 0x480   : > { %v3311_v11 = vpop.f32.mrf.mxu1  ;;  %v10012_v51 = vpop.f32.mrf.mxu0 }
 0x481   : > { %v3374_v35 = vadd.f32 %v3311_v11, %v3145_v23 }
 0x482   : > { %v9998_v13 = vpop.f32.mrf.mxu1  ;;  %v7823_v40 = vpop.f32.mrf.mxu0 }
 0x484   : > { %v3476_v27 = vpop.f32.mrf.mxu1  ;;  %v10022_v47 = vpop.f32.mrf.mxu0 }
 0x485   : > { %v3544_v22 = vadd.f32 %v3476_v27, %v3365_v43 }
 0x486   : > { %v3478_v10 = vpop.f32.mrf.mxu1 }
 0x487   : > { %v3545_v41 = vadd.f32 %v3478_v10, %v3366_v55 }
 0x488   : > { %v3480_v12 = vpop.f32.mrf.mxu1 }
 0x489   : > { %v3547_v38 = vadd.f32 %v3480_v12, %v3368_v52 }
 0x48a   : > { %v10004_v46 = vpop.f32.mrf.mxu1 }
 0x48c   : > { %v3486_v14 = vpop.f32.mrf.mxu1 }
 0x48d   : > { %v10008_v61 = vadd.f32 %v3486_v14, %v3371_v56 }
 0x48e   : > { %v3488_v20 = vpop.f32.mrf.mxu1  ;;  %v7834_v15 = vpop.f32.mrf.mxu0 }
 0x48f   : > { %v10010_v53 = vadd.f32 %v3488_v20, %v3372_v32 }
 0x490   : > { %v3490_v1 = vpop.f32.mrf.mxu1  ;;  %v3708_v23 = vpop.f32.mrf.mxu0 }
 0x491   : > { %v10014_v9 = vadd.f32 %v3490_v1, %v3374_v35 }
 0x492   : > { %v10016_v33 = vpop.f32.mrf.mxu1  ;;  %v7835_v36 = vpop.f32.mrf.mxu0 }
 0x494   : > { %v3655_v0 = vpop.f32.mrf.mxu1  ;;  %v3711_v52 = vpop.f32.mrf.mxu0 }
 0x495   : > { %v10018_v16 = vadd.f32 %v3655_v0, %v3544_v22 }
 0x496   : > { %v3657_v21 = vpop.f32.mrf.mxu1 }
 0x497   : > { %v10020_v25 = vadd.f32 %v3657_v21, %v3545_v41 }
 0x498   : > { %v3659_v19 = vpop.f32.mrf.mxu1 }
 0x499   : > { %v10024_v31 = vadd.f32 %v3659_v19, %v3547_v38 }
 0x49a   : > { %v10026_v6 = vpop.f32.mrf.mxu1 }
 0x49c   : > { %v10028_v48 = vpop.f32.mrf.mxu1 }
 0x49e   : > { %v10030_v3 = vpop.f32.mrf.mxu1  ;;  %v7846_v56 = vpop.f32.mrf.mxu0 }
 0x4a0   : > { %v10032_v50 = vpop.f32.mrf.mxu1  ;;  %v10042_v11 = vpop.f32.mrf.mxu0 }
 0x4a2   : > { %v10034_v43 = vpop.f32.mrf.mxu1  ;;  %v7847_v22 = vpop.f32.mrf.mxu0 }
 0x4a4   : > { %v3834_v55 = vpop.f32.mrf.mxu1  ;;  %v10050_v12 = vpop.f32.mrf.mxu0 }
 0x4a6   : > { %v3836_v60 = vpop.f32.mrf.mxu1 }
 0x4a8   : > { %v10036_v57 = vpop.f32.mrf.mxu1 }
 0x4aa   : > { %v10038_v42 = vpop.f32.mrf.mxu1 }
 0x4ac   : > { %v10040_v32 = vpop.f32.mrf.mxu1 }
 0x4ae   : > { %v10044_v35 = vpop.f32.mrf.mxu1  ;;  %v7858_v14 = vpop.f32.mrf.mxu0 }
 0x4af   : > { %10940 = vst [vmem:[#allocation9_spill] sm:$0xff] %v10044_v35 }
 0x4b0   : > { %v10046_v27 = vpop.f32.mrf.mxu1  ;;  %v10056_v0 = vpop.f32.mrf.mxu0 }
 0x4b1   : > { %10941 = vst [vmem:[#allocation30_spill] sm:$0xff] %v10046_v27  ;;  %10945 = vst [vmem:[#allocation27_spill] sm:$0xff] %v10056_v0 }
 0x4b2   : > { %v10048_v10 = vpop.f32.mrf.mxu1  ;;  %v7859_v30 = vpop.f32.mrf.mxu0 }
 0x4b3   : > { %10942 = vst [vmem:[#allocation8_spill] sm:$0xff] %v10048_v10 }
 0x4b4   : > { %v4013_v41 = vpop.f32.mrf.mxu1  ;;  %v10066_v18 = vpop.f32.mrf.mxu0 }
 0x4b5   : > { %10950 = vst [vmem:[#allocation16_spill] sm:$0xff] %v10066_v18  ;;  %v3187_v18 = vadd.f32 %v9994_v2, %v9982_v59 }
 0x4b6   : > { %v4015_v38 = vpop.f32.mrf.mxu1 }
 0x4b8   : > { %v10052_v20 = vpop.f32.mrf.mxu1 }
 0x4b9   : > { %10943 = vst [vmem:[#allocation12_spill] sm:$0xff] %v10052_v20  ;;  %v3192_v20 = vadd.f32 %v9984_v4, %v9972_v44  ;;  %v3137_v44 = vadd.f32 %v9980_v58, %v9970_v34  ;;  %v3902_v58 = vadd.f32 %v3834_v55, %v10018_v16 }
 0x4ba   : > { %v10054_v1 = vpop.f32.mrf.mxu1 }
 0x4bb   : > { %10944 = vst [vmem:[#allocation17_spill] sm:$0xff] %v10054_v1  ;;  %v3373_v1 = vadd.f32 %v9996_v24, %v3192_v20 }
 0x4bc   : > { %v10058_v21 = vpop.f32.mrf.mxu1 }
 0x4bd   : > { %10946 = vst [vmem:[#allocation14_spill] sm:$0xff] %v10058_v21 }
 0x4be   : > { %v10060_v19 = vpop.f32.mrf.mxu1  ;;  %v7870_v10 = vpop.f32.mrf.mxu0 }
 0x4bf   : > { %10947 = vst [vmem:[#allocation32_spill] sm:$0xff] %v10060_v19  ;;  %v3195_v19 = vadd.f32 %v9990_v7, %v9978_v28  ;;  %v3147_v28 = vadd.f32 %v9986_v5, %v9974_v17 }
 0x4c0   : > { %v10062_v49 = vpop.f32.mrf.mxu1  ;;  %v10073_v21 = vpop.f32.mrf.mxu0 }
 0x4c1   : > { %10948 = vst [vmem:[#allocation11_spill] sm:$0xff] %v10062_v49  ;;  %v3552_v49 = vadd.f32 %v7822_v29, %v3373_v1  ;;  %v3376_v4 = vadd.f32 %v10002_v39, %v3195_v19  ;;  %v3370_v29 = vadd.f32 %v10006_v26, %v3187_v18  ;;  %v10098_v39 = vpop.permute.xlu1 %4467  ;;  %v10953_v19 = vld [vmem:[#allocation30_spill] sm:$0xff] }
 0x4c2   : > { %v10064_v45 = vpop.f32.mrf.mxu1  ;;  %v7871_v7 = vpop.f32.mrf.mxu0 }
 0x4c3   : > { %10949 = vst [vmem:[#allocation25_spill] sm:$0xff] %v10064_v45  ;;  %v3184_v45 = vadd.f32 %v9988_v8, %v9976_v62  ;;  %v3731_v24 = vadd.f32 %v7834_v15, %v3552_v49  ;;  %v3369_v62 = vadd.f32 %v9992_v54, %v3137_v44  ;;  %v3555_v8 = vadd.f32 %v7823_v40, %v3376_v4  ;;  %v10954_v4 = vld [vmem:[#allocation27_spill] sm:$0xff] }
 0x4c4   : > { %v4192_v37 = vpop.f32.mrf.mxu1  ;;  %v3375_v49 = vadd.f32 %v9998_v13, %v3147_v28  ;;  %v3903_v40 = vadd.f32 %v3836_v60, %v10020_v25  ;;  %v10106_v15 = vpop.f32.mrf.mxu0  ;;  %v3732_v25 = vadd.f32 %v10032_v50, %v10014_v9 }
 0x4c5   : > { %v3910_v59 = vadd.f32 %v7846_v56, %v3731_v24  ;;  %v3548_v17 = vadd.f32 %v10004_v46, %v3369_v62  ;;  %v3734_v5 = vadd.f32 %v7835_v36, %v3555_v8  ;;  %v3729_v46 = vadd.f32 %v10028_v48, %v10008_v61  ;;  %v10956_v62 = vld [vmem:[#allocation14_spill] sm:$0xff] }
 0x4c6   : > { %v4194_v27 = vpop.f32.mrf.mxu1  ;;  %v3554_v26 = vadd.f32 %v10016_v33, %v3375_v49  ;;  %v4082_v36 = vadd.f32 %v4015_v38, %v3903_v40  ;;  %v3911_v44 = vadd.f32 %v10953_v19, %v3732_v25 }
 0x4c7   : > { %v4089_v18 = vadd.f32 %v7858_v14, %v3910_v59  ;;  %v3727_v16 = vadd.f32 %v10026_v6, %v3548_v17  ;;  %v3913_v55 = vadd.f32 %v7847_v22, %v3734_v5  ;;  %v3908_v50 = vadd.f32 %v10040_v32, %v3729_v46  ;;  %v10959_v17 = vld [vmem:[#allocation45_spill] sm:$0xff] }
 0x4c8   : > { %v10071_v0 = vpop.f32.mrf.mxu1  ;;  %v4261_v1 = vadd.f32 %v4194_v27, %v4082_v36 }
 0x4c9   : > { %10951 = vst [vmem:[#allocation34_spill] sm:$0xff] %v10071_v0  ;;  %v3367_v0 = vadd.f32 %v10000_v63, %v3184_v45  ;;  %v3549_v45 = vadd.f32 %v10022_v47, %v3370_v29  ;;  %v4268_v56 = vadd.f32 %v7870_v10, %v4089_v18  ;;  %v3733_v10 = vadd.f32 %v10034_v43, %v3554_v26  ;;  %v10960_v26 = vld [vmem:[#allocation17_spill] sm:$0xff] }
 0x4ca   : > { %v10077_v35 = vpop.f32.mrf.mxu1  ;;  %v4087_v8 = vadd.f32 %v10956_v62, %v3908_v50 }
 0x4cb   : > { %v3546_v34 = vadd.f32 %v10012_v51, %v3367_v0  ;;  %v4081_v51 = vadd.f32 %v4013_v41, %v3902_v58  ;;  %v3728_v13 = vadd.f32 %v3711_v52, %v3549_v45  ;;  %v4092_v52 = vadd.f32 %v7859_v30, %v3913_v55  ;;  %v10120_v0 = vpop.permute.xlu1 %4457  ;;  %v10958_v58 = vld [vmem:[#allocation12_spill] sm:$0xff] }
 0x4cc   : > { %v10086_v20 = vpop.f32.mrf.mxu1 }
 0x4cd   : > { %v3725_v54 = vadd.f32 %v3708_v23, %v3546_v34  ;;  %v3730_v23 = vadd.f32 %v10030_v3, %v10010_v53  ;;  %v4260_v33 = vadd.f32 %v4192_v37, %v4081_v51  ;;  %v3907_v41 = vadd.f32 %v10050_v12, %v3728_v13  ;;  %v10957_v34 = vld [vmem:[#allocation16_spill] sm:$0xff] }
 0x4ce   : > { %v10093_v2 = vpop.f32.mrf.mxu1  ;;  %v3905_v37 = vadd.f32 %v10036_v57, %v10024_v31  ;;  %v3906_v53 = vadd.f32 %v10038_v42, %v3727_v16  ;;  %v4271_v9 = vadd.f32 %v7871_v7, %v4092_v52  ;;  %v4473_v42 = vpop.permute.xlu0 %4472  ;;  %v10955_v7 = vld [vmem:[#allocation8_spill] sm:$0xff]  ;;  %v4266_v16 = vadd.f32 %v10086_v20, %v4087_v8 }
 0x4cf   : > { %v3904_v60 = vadd.f32 %v10042_v11, %v3725_v54  ;;  %v10952_v11 = vld [vmem:[#allocation9_spill] sm:$0xff]  ;;  %v3912_v29 = vadd.f32 %v10955_v7, %v3733_v10  ;;  %v4086_v49 = vadd.f32 %v10957_v34, %v3907_v41  ;;  %v10961_v51 = vld [vmem:[#allocation32_spill] sm:$0xff] }
 0x4d0   : > { %v10102_v63 = vpop.f32.mrf.mxu1  ;;  %v3909_v43 = vadd.f32 %v10952_v11, %v3730_v23  ;;  %v4084_v45 = vadd.f32 %v10958_v58, %v3905_v37  ;;  %v4085_v40 = vadd.f32 %v10960_v26, %v3906_v53  ;;  %v10965_v41 = vld [vmem:[#allocation25_spill] sm:$0xff] }
 0x4d1   : > { %v4083_v24 = vadd.f32 %v10954_v4, %v3904_v60  ;;  %v10963_v60 = vld [vmem:[#allocation47_spill] sm:$0xff] }
 0x4d2   : > { %v10109_v47 = vpop.f32.mrf.mxu1  ;;  %v4088_v13 = vadd.f32 %v10961_v51, %v3909_v43  ;;  %v4264_v25 = vadd.f32 %v10077_v35, %v4085_v40  ;;  %v4463_v4 = vpop.permute.xlu0 %4462 }
 0x4d3   : > { %v7882_v14 = vpop.f32.mrf.mxu0  ;;  %v4262_v23 = vadd.f32 %v10073_v21, %v4083_v24 }
 0x4d4   : > { %v4447_v6 = vadd.f32 %v7882_v14, %v4268_v56  ;;  %v4371_v22 = vpop.f32.mrf.mxu1  ;;  %v10962_v56 = vld [vmem:[#allocation11_spill] sm:$0xff]  ;;  %v4267_v20 = vadd.f32 %v10093_v2, %v4088_v13 }
 0x4d5   : > { %v4439_v61 = vadd.f32 %v4371_v22, %v4260_v33  ;;  %v4424_v48 = vpop.f32.mrf.mxu0  ;;  %v4090_v46 = vadd.f32 %v10962_v56, %v3911_v44 }
 0x4d6   : > { %v4483_v3 = vadd.f32 %v10098_v39, %v4447_v6  ;;  %v4373_v30 = vpop.f32.mrf.mxu1  ;;  %v10964_v6 = vld [vmem:[#allocation46_spill] sm:$0xff]  ;;  %v4441_v50 = vadd.f32 %v4424_v48, %v4262_v23 }
 0x4d7   : > { %v4475_v12 = vadd.f32 %v10120_v0, %v4439_v61  ;;  %v4440_v27 = vadd.f32 %v4373_v30, %v4261_v1  ;;  %v7883_v38 = vpop.f32.mrf.mxu0  ;;  %v4091_v1 = vadd.f32 %v10965_v41, %v3912_v29  ;;  %v10966_v61 = vld [vmem:[#allocation34_spill] sm:$0xff]  ;;  %v4269_v21 = vadd.f32 %v10102_v63, %v4090_v46 }
 0x4d8   : > { %v4495_v28 = vmax.f32 %v4483_v3, 0.0  ;;  %v4450_v31 = vadd.f32 %v7883_v38, %v4271_v9  ;;  %v4375_v57 = vpop.f32.mrf.mxu1  ;;  %v4263_v37 = vadd.f32 %v10966_v61, %v4084_v45  ;;  %v4265_v38 = vadd.f32 %v10106_v15, %v4086_v49 }
 0x4d9   : > { %v4487_v59 = vmax.f32 %v4475_v12, 0.0  ;;  %v4476_v32 = vadd.f32 %v10120_v0, %v4440_v27  ;;  %v4427_v43 = vpop.f32.mrf.mxu0  ;;  %v4270_v2 = vadd.f32 %v10109_v47, %v4091_v1  ;;  %v4477_v62 = vadd.f32 %v10120_v0, %v4441_v50 }
 0x4da   : > { %v4507_v5 = vmul.f32 %v4495_v28, %v10959_v17  ;;  %v4486_v18 = vadd.f32 %v4473_v42, %v4450_v31  ;;  %v4377_v54 = vpop.f32.mrf.mxu1  ;;  %v4442_v19 = vadd.f32 %v4375_v57, %v4263_v37  ;;  %v4444_v31 = vadd.f32 %v4427_v43, %v4265_v38 }
 0x4db   : > { %v4488_v55 = vmax.f32 %v4476_v32, 0.0  ;;  %v4499_v52 = vmul.f32 %v4487_v59, %v10963_v60  ;;  %v4443_v35 = vadd.f32 %v4377_v54, %v4264_v25  ;;  %v4489_v58 = vmax.f32 %v4477_v62, 0.0 }
 0x4dc   : > { %v7493_v36 = vpack.c.bf16 %v4507_v5, %v4507_v5  ;;  %v4498_v33 = vmax.f32 %v4486_v18, 0.0  ;;  %v4381_v14 = vpop.f32.mrf.mxu1  ;;  %v4478_v59 = vadd.f32 %v4463_v4, %v4442_v19  ;;  %v4480_v34 = vadd.f32 %v4463_v4, %v4444_v31 }
 0x4dd   : > { %v4500_v22 = vmul.f32 %v4488_v55, %v10964_v6  ;;  %v4445_v10 = vadd.f32 %v4381_v14, %v4266_v16  ;;  %v4479_v7 = vadd.f32 %v4463_v4, %v4443_v35  ;;  %v4501_v40 = vmul.f32 %v4489_v58, %v10959_v17 }
 0x4de   : > { %v4510_v53 = vmul.f32 %v4498_v33, %v10959_v17  ;;  %v4383_v9 = vpop.f32.mrf.mxu1  ;;  %4553 = vrot.lane.b32.xlu1 %v7493_v36, %s10967_s3  ;;  %v4490_v5 = vmax.f32 %v4478_v59, 0.0  ;;  %v4492_v0 = vmax.f32 %v4480_v34, 0.0 }
 0x4df   : > { %v7488_v3 = vpack.c.bf16 %v4500_v22, %v4499_v52  ;;  %v4481_v30 = vadd.f32 %v10098_v39, %v4445_v10  ;;  %v4446_v12 = vadd.f32 %v4383_v9, %v4267_v20  ;;  %v4491_v49 = vmax.f32 %v4479_v7, 0.0  ;;  %v5701_v7 = vld [vmem:[%s10801_s8 + $0x8] sm:$0xff]  ;;  %v6671_v22 = vld [vmem:[%s10803_s10] sm:$0xff] }
 0x4e0   : > { %v7495_v11 = vpack.c.bf16 %v4510_v53, %v4510_v53  ;;  %v4385_v27 = vpop.f32.mrf.mxu1  ;;  %v4502_v51 = vmul.f32 %v4490_v5, %v10963_v60  ;;  %v4504_v13 = vmul.f32 %v4492_v0, %v10959_v17  ;;  %v7489_v55 = vpack.c.bf16 %v4501_v40, %v4501_v40  ;;  %v8158_v0 = vld [vmem:[%s10800_s7 + $0x8] sm:$0xff]  }
 0x4e1   : > { %v4448_v44 = vadd.f32 %v4385_v27, %v4269_v21  ;;  %v4493_v24 = vmax.f32 %v4481_v30, 0.0  ;;  %v4482_v28 = vadd.f32 %v10098_v39, %v4446_v12  ;;  %v4503_v26 = vmul.f32 %v4491_v49, %v10964_v6 }
 0x4e2   : > { %4557 = vrot.lane.b32.xlu0 %v7495_v11, %s10967_s3  ;;  %v4387_v63 = vpop.f32.mrf.mxu1  ;;  %v7491_v56 = vpack.c.bf16 %v4504_v13, %v4504_v13 }
 0x4e3   : > { %v4484_v48 = vadd.f32 %v4473_v42, %v4448_v44  ;;  %v4449_v29 = vadd.f32 %v4387_v63, %v4270_v2  ;;  %v4494_v8 = vmax.f32 %v4482_v28, 0.0  ;;  %v4505_v47 = vmul.f32 %v4493_v24, %v10963_v60 }
 0x4e4   : > { %v7490_v16 = vpack.c.bf16 %v4503_v26, %v4502_v51  ;;  %v10837_v44 = vmov 0.0  }
 0x4e5   : > { %v4496_v15 = vmax.f32 %v4484_v48, 0.0  ;;  %v4485_v32 = vadd.f32 %v4473_v42, %v4449_v29  ;;  %v4506_v57 = vmul.f32 %v4494_v8, %v10964_v6  ;;  %7884 = vmatprep.subr.bf16.mxu0 %v10837_v44  ;;  %7888 = vmatprep.mubr.msk.bf16.mxu0 %vm8249_vm11, %v10837_v44  ;;  %v5700_v48 = vld [vmem:[%s10801_s8] sm:$0xff] }
 0x4e7   : > { %v4497_v39 = vmax.f32 %v4485_v32, 0.0  ;;  %v7492_v45 = vpack.c.bf16 %v4506_v57, %v4505_v47  ;;  %v4508_v18 = vmul.f32 %v4496_v15, %v10963_v60 }
 0x4e9   : > { %v4509_v54 = vmul.f32 %v4497_v39, %v10964_v6  ;;  %4551 = vrot.lane.b32.xlu1 %v7492_v45, %s10967_s3 }
 0x4eb   : > { %v7494_v42 = vpack.c.bf16 %v4509_v54, %v4508_v18 }
 0x4ed   : > { %4555 = vrot.lane.b32.xlu0 %v7494_v42, %s10967_s3  ;;  %4543 = vrot.lane.b32.xlu1 %v7488_v3, %s10967_s3 }
 0x4f1   : > { %4547 = vrot.lane.b32.xlu0 %v7490_v16, %s10967_s3  ;;  %4545 = vrot.lane.b32.xlu1 %v7489_v55, %s10967_s3  ;;  %v8159_v16 = vld [vmem:[%s10800_s7] sm:$0xff]   ;;  %v10969_v55 = vmov 0  }
 0x4f5   : > { %4549 = vrot.lane.b32.xlu0 %v7491_v56, %s10967_s3 }
 0x550   : > { %v4554_v46 = vpop.permute.xlu1 %4553 }
 0x554   : > { %v4558_v23 = vpop.permute.xlu0 %4557 }
 0x55b   : > { %v4552_v36 = vpop.permute.xlu1 %4551 }
 0x55c   : > { %v4561_v33 = vrot.slane %v4552_v36, 4 }
 0x55e   : > { %v4567_v14 = vsel %vm2775_vm14, %v4561_v33, %v4552_v36  ;;  %v4568_v25 = vsel %vm2775_vm14, %v4561_v33, %v4554_v46 }
 0x55f   : > { %v4556_v52 = vpop.permute.xlu0 %4555  ;;  %4583 = vst.msk [vmem:[#allocation2 + $0x18] sm:$0xff] %vm9312_vm15, %v4567_v14  ;;  %v4544_v41 = vpop.permute.xlu1 %4543 }
 0x560   : > { %4584 = vst.msk [vmem:[#allocation2 + $0x20] sm:$0xf] %vm2812_vm0, %v4568_v25  ;;  %v4562_v10 = vrot.slane %v4556_v52, 4  ;;  %v4559_v1 = vrot.slane %v4544_v41, 4 }
 0x562   : > { %v4569_v61 = vsel %vm2775_vm14, %v4562_v10, %v4556_v52  ;;  %v4570_v37 = vsel %vm2775_vm14, %v4562_v10, %v4558_v23  ;;  %v4563_v20 = vsel %vm2775_vm14, %v4559_v1, %v4544_v41  ;;  %v8160_v52 = vld [vmem:[%s10800_s7 + $0x10] sm:$0xff]  }
 0x563   : > { %4585 = vst.msk [vmem:[#allocation2 + $0x24] sm:$0xff] %vm9312_vm15, %v4569_v61  ;;  %v4548_v53 = vpop.permute.xlu0 %4547  ;;  %4579 = vst.msk [vmem:[#allocation2] sm:$0xff] %vm9312_vm15, %v4563_v20  ;;  %v4546_v21 = vpop.permute.xlu1 %4545 }
 0x564   : > { %4586 = vst.msk [vmem:[#allocation2 + $0x2c] sm:$0xf] %vm2812_vm0, %v4570_v37  ;;  %v4560_v9 = vrot.slane %v4548_v53, 4  ;;  %v4564_v3 = vsel %vm2775_vm14, %v4559_v1, %v4546_v21  ;;  %v8161_v21 = vld [vmem:[%s10800_s7 + $0x18] sm:$0xff]  }
 0x565   : > { %4580 = vst.msk [vmem:[#allocation2 + $0x8] sm:$0xf] %vm2812_vm0, %v4564_v3 }
 0x566   : > { %v4565_v35 = vsel %vm2775_vm14, %v4560_v9, %v4548_v53  ;;  %v4591_v24 = vld [vmem:[#allocation2 + $0x18] sm:$0xff] }
 0x567   : > { %4581 = vst.msk [vmem:[#allocation2 + $0xc] sm:$0xff] %vm9312_vm15, %v4565_v35  ;;  %v4550_v30 = vpop.permute.xlu0 %4549 }
 0x568   : > { %v4566_v50 = vsel %vm2775_vm14, %v4560_v9, %v4550_v30 }
 0x569   : > { %4582 = vst.msk [vmem:[#allocation2 + $0x14] sm:$0xf] %vm2812_vm0, %v4566_v50 }
 0x56a   : > { %v4587_v11 = vld [vmem:[#allocation2] sm:$0xff] }
 0x56b   : > { %v4593_v4 = vld [vmem:[#allocation2 + $0x24] sm:$0xff]  ;;  %v10222_v63 = vld [vmem:[#allocation2 + $0x20] ss:$12 sps:$4 sm:$0xff]  }
 0x56c   : > { %v4588_v27 = vld [vmem:[#allocation2 + $0x8] sm:$0xf]  ;;  %v10210_v28 = vcombine.high %v4591_v24, %v4593_v4  ;;  %v10224_v31 = vcombine.low %v4591_v24, %v4593_v4 }
 0x56e   : > { %v4589_v43 = vld [vmem:[#allocation2 + $0xc] sm:$0xff] }
 0x56f   : > { %v10191_v12 = vcombine.high %v4587_v11, %v4589_v43  ;;  %v10199_v19 = vcombine.low %v4587_v11, %v4589_v43 }
 0x570   : > { %v4590_v38 = vld [vmem:[#allocation2 + $0x14] sm:$0xf] }
 0x571   : > { %v10193_v2 = vcombine.low %v4588_v27, %v4590_v38  ;;  %4633 = vrot.lane.b32.xlu0 %v10191_v12, %s10932_s23  ;;  %v8162_v38 = vld [vmem:[%s10800_s7 + $0x20] sm:$0xff]  }
 0x573   : > { %4635 = vrot.lane.b32.xlu1 %v10193_v2, %s10932_s23 }
 0x575   : > { %4631 = vrot.lane.b32.xlu0 %v10199_v19, %s10932_s23 }
 0x577   : > { %4851 = vrot.lane.b32.xlu1 %v10193_v2, %s10933_s16 }
 0x579   : > { %4849 = vrot.lane.b32.xlu0 %v10191_v12, %s10933_s16 }
 0x57b   : > { %4974 = vrot.lane.b32.xlu1 %v10193_v2, %s10934_s24 }
 0x57d   : > { %4847 = vrot.lane.b32.xlu0 %v10199_v19, %s10933_s16 }
 0x57f   : > { %4639 = vrot.lane.b32.xlu1 %v10210_v28, %s10932_s23 }
 0x581   : > { %4972 = vrot.lane.b32.xlu0 %v10191_v12, %s10934_s24 }
 0x583   : > { %5097 = vrot.lane.b32.xlu1 %v10193_v2, %s10935_s21 }
 0x585   : > { %4641 = vrot.lane.b32.xlu0 %v10222_v63, %s10932_s23 }
 0x587   : > { %4637 = vrot.lane.b32.xlu1 %v10224_v31, %s10932_s23 }
 0x589   : > { %4970 = vrot.lane.b32.xlu0 %v10199_v19, %s10934_s24 }
 0x58b   : > { %4855 = vrot.lane.b32.xlu1 %v10210_v28, %s10933_s16 }
 0x58d   : > { %5095 = vrot.lane.b32.xlu0 %v10191_v12, %s10935_s21 }
 0x58f   : > { %5220 = vrot.lane.b32.xlu1 %v10193_v2, %s10936_s20 }
 0x591   : > { %5093 = vrot.lane.b32.xlu0 %v10199_v19, %s10935_s21 }
 0x593   : > { %4853 = vrot.lane.b32.xlu1 %v10224_v31, %s10933_s16 }
 0x595   : > { %4857 = vrot.lane.b32.xlu0 %v10222_v63, %s10933_s16 }
 0x597   : > { %4978 = vrot.lane.b32.xlu1 %v10210_v28, %s10934_s24 }
 0x599   : > { %5218 = vrot.lane.b32.xlu0 %v10191_v12, %s10936_s20 }
 0x59b   : > { %4976 = vrot.lane.b32.xlu1 %v10224_v31, %s10934_s24 }
 0x59d   : > { %4980 = vrot.lane.b32.xlu0 %v10222_v63, %s10934_s24 }
 0x59f   : > { %5101 = vrot.lane.b32.xlu1 %v10210_v28, %s10935_s21 }
 0x5a1   : > { %5216 = vrot.lane.b32.xlu0 %v10199_v19, %s10936_s20 }
 0x5a3   : > { %5343 = vrot.lane.b32.xlu1 %v10193_v2, %s10937_s30 }
 0x5a5   : > { %5103 = vrot.lane.b32.xlu0 %v10222_v63, %s10935_s21 }
 0x5a7   : > { %5099 = vrot.lane.b32.xlu1 %v10224_v31, %s10935_s21 }
 0x5a9   : > { %5341 = vrot.lane.b32.xlu0 %v10191_v12, %s10937_s30 }
 0x5ab   : > { %5224 = vrot.lane.b32.xlu1 %v10210_v28, %s10936_s20 }
 0x5ad   : > { %5226 = vrot.lane.b32.xlu0 %v10222_v63, %s10936_s20 }
 0x5af   : > { %5222 = vrot.lane.b32.xlu1 %v10224_v31, %s10936_s20 }
 0x5b1   : > { %5339 = vrot.lane.b32.xlu0 %v10199_v19, %s10937_s30 }
 0x5b3   : > { %5347 = vrot.lane.b32.xlu1 %v10210_v28, %s10937_s30 }
 0x5b5   : > { %5349 = vrot.lane.b32.xlu0 %v10222_v63, %s10937_s30 }
 0x5b7   : > { %5466 = vrot.lane.b32.xlu1 %v10193_v2, %s10938_s15 }
 0x5b9   : > { %5464 = vrot.lane.b32.xlu0 %v10191_v12, %s10938_s15 }
 0x5bb   : > { %5345 = vrot.lane.b32.xlu1 %v10224_v31, %s10937_s30 }
 0x5bd   : > { %5472 = vrot.lane.b32.xlu0 %v10222_v63, %s10938_s15 }
 0x5bf   : > { %5470 = vrot.lane.b32.xlu1 %v10210_v28, %s10938_s15 }
 0x5c1   : > { %5462 = vrot.lane.b32.xlu0 %v10199_v19, %s10938_s15 }
 0x5c3   : > { %5468 = vrot.lane.b32.xlu1 %v10224_v31, %s10938_s15 }
 0x5c5   : > { %5595 = vrot.lane.b32.xlu0 %v10222_v63, %s10939_s22 }
 0x5c7   : > { %5593 = vrot.lane.b32.xlu1 %v10210_v28, %s10939_s22 }
 0x5c9   : > { %5587 = vrot.lane.b32.xlu0 %v10191_v12, %s10939_s22 }
 0x5cb   : > { %5591 = vrot.lane.b32.xlu1 %v10224_v31, %s10939_s22 }
 0x5cd   : > { %5585 = vrot.lane.b32.xlu0 %v10199_v19, %s10939_s22 }
 0x5cf   : > { %5589 = vrot.lane.b32.xlu1 %v10193_v2, %s10939_s22 }
 0x5d1   : > { %5709 = vperm.xlu0 %8093, %v5701_v7  }
 0x5d3   : > { %5704 = vperm.xlu1 %8094, %v5700_v48   ;;  %v8163_v48 = vld [vmem:[%s10800_s7 + $0x28] sm:$0xff]  }
 0x5e3   : > { %v4634_v29 = vpop.permute.xlu0 %4633 }
 0x5e5   : > { %v4636_v62 = vpop.permute.xlu1 %4635 }
 0x5e6   : > { %v4644_v54 = vsel %vm519_vm2, %v4634_v29, %v4636_v62 }
 0x5e7   : > { %v4632_v8 = vpop.permute.xlu0 %4631 }
 0x5e8   : > { %v4643_v42 = vsel %vm519_vm2, %v4632_v8, %v4634_v29 }
 0x5e9   : > { %v4852_v59 = vpop.permute.xlu1 %4851 }
 0x5eb   : > { %v4850_v15 = vpop.permute.xlu0 %4849 }
 0x5ec   : > { %v4860_v25 = vsel %vm915_vm4, %v4850_v15, %v4852_v59 }
 0x5ed   : > { %v10308_v32 = vpop.permute.xlu1 %4974 }
 0x5ef   : > { %v4848_v47 = vpop.permute.xlu0 %4847 }
 0x5f0   : > { %v4859_v41 = vsel %vm915_vm4, %v4848_v47, %v4850_v15  ;;  %v8164_v47 = vld [vmem:[%s10800_s7 + $0x30] sm:$0xff]  }
 0x5f1   : > { %v4640_v57 = vpop.permute.xlu1 %4639 }
 0x5f3   : > { %v10310_v34 = vpop.permute.xlu0 %4972 }
 0x5f4   : > { %v4983_v9 = vsel %vm1154_vm3, %v10310_v34, %v10308_v32 }
 0x5f5   : > { %v10312_v49 = vpop.permute.xlu1 %5097 }
 0x5f7   : > { %v4642_v39 = vpop.permute.xlu0 %4641 }
 0x5f8   : > { %7885 = vmatpush3.bf16.msra.mxu0 %v4642_v39  ;;  %v4646_v58 = vsel %vm519_vm2, %v4640_v57, %v4642_v39 }
 0x5f9   : > { %4669 = vmatprep.subr.bf16.mxu1 %v4646_v58  ;;  %v4638_v45 = vpop.permute.xlu1 %4637  ;;  %7886 = vmatprep.subr.bf16.mxu0 %v10837_v44 }
 0x5fa   : > { %v4645_v5 = vsel %vm519_vm2, %v4638_v45, %v4640_v57 }
 0x5fb   : > { %v10317_v18 = vpop.permute.xlu0 %4970  ;;  %4670 = vmatpush1.bf16.msra.mxu1 %v4645_v5 }
 0x5fc   : > { %4671 = vmatprep.subr.bf16.mxu1 %v4644_v54  ;;  %7887 = vmatpush3.bf16.msra.mxu0 %v4636_v62  ;;  %v4982_v35 = vsel %vm1154_vm3, %v10317_v18, %v10310_v34  ;;  %v8165_v54 = vld [vmem:[%s10800_s7 + $0x38] sm:$0xff]  }
 0x5fd   : > { %v4856_v26 = vpop.permute.xlu1 %4855  ;;  %7892 = vmatprep.subr.bf16.mxu0 %v10837_v44 }
 0x5ff   : > { %v10325_v40 = vpop.permute.xlu0 %5095  ;;  %4672 = vmatpush1.bf16.msra.mxu1 %v4643_v42  ;;  %7889 = vmatmul.mubr.msk.bf16.vlgmr.msra.gmra.mxu0 %vm4653_vm12, %v8158_v0 }
 0x600   : > { %4767 = vmatprep.subr.bf16.mxu1 %v10210_v28  ;;  %7893 = vmatpush3.bf16.msra.mxu0 %v10222_v63  ;;  %v5106_v27 = vsel %vm1393_vm6, %v10325_v40, %v10312_v49 }
 0x601   : > { %v10330_v51 = vpop.permute.xlu1 %5220  ;;  %7894 = vmatprep.subr.bf16.mxu0 %v10837_v44  ;;  %7896 = vmatprep.mubr.msk.bf16.mxu0 %vm8249_vm11, %v10837_v44 }
 0x602   : > { %7392 = vmatmul.mubr.msk.bf16.vlgmr.msra.gmra.mxu1 %vm4653_vm12, %v8158_v0 }
 0x603   : > { %v10336_v13 = vpop.permute.xlu0 %5093  ;;  %4768 = vmatpush1.bf16.msra.mxu1 %v10224_v31  ;;  %4787 = vmatprep.mubr.bf16.mxu1 %v10969_v55 }
 0x604   : > { %4769 = vmatprep.subr.bf16.mxu1 %v10191_v12  ;;  %7895 = vmatpush3.bf16.msra.mxu0 %v10193_v2 }
 0x605   : > { %v4854_v56 = vpop.permute.xlu1 %4853  ;;  %7900 = vmatprep.subr.bf16.mxu0 %v10837_v44 }
 0x606   : > { %v4861_v33 = vsel %vm915_vm4, %v4854_v56, %v4856_v26 }
 0x607   : > { %v4858_v46 = vpop.permute.xlu0 %4857  ;;  %4770 = vmatpush1.bf16.msra.mxu1 %v10199_v19  ;;  %7897 = vmatmul.mubr.msk.bf16.vlgmr.msra.gmra.mxu0 %vm4653_vm12, %v8159_v16  ;;  %v5105_v19 = vsel %vm1393_vm6, %v10336_v13, %v10325_v40 }
 0x608   : > { %7901 = vmatpush3.bf16.msra.mxu0 %v4858_v46  ;;  %v4862_v23 = vsel %vm915_vm4, %v4856_v26, %v4858_v46  ;;  %7904 = vmatprep.mubr.msk.bf16.mxu0 %vm8249_vm11, %v10837_v44 }
 0x609   : > { %4884 = vmatprep.subr.bf16.mxu1 %v4862_v23  ;;  %v4979_v36 = vpop.permute.xlu1 %4978  ;;  %7902 = vmatprep.subr.bf16.mxu0 %v10837_v44 }
 0x60a   : > { %7395 = vmatmul.mubr.msk.bf16.vlgmr.msra.gmra.mxu1 %vm4653_vm12, %v8159_v16 }
 0x60b   : > { %v10354_v14 = vpop.permute.xlu0 %5218  ;;  %4885 = vmatpush1.bf16.msra.mxu1 %v4861_v33  ;;  %4904 = vmatprep.mubr.bf16.mxu1 %v10969_v55 }
 0x60c   : > { %4886 = vmatprep.subr.bf16.mxu1 %v4860_v25  ;;  %7903 = vmatpush3.bf16.msra.mxu0 %v4852_v59  ;;  %v5229_v7 = vsel %vm1632_vm5, %v10354_v14, %v10330_v51 }
 0x60d   : > { %v4977_v10 = vpop.permute.xlu1 %4976  ;;  %7908 = vmatprep.subr.bf16.mxu0 %v10837_v44 }
 0x60e   : > { %v4984_v20 = vsel %vm1154_vm3, %v4977_v10, %v4979_v36 }
 0x60f   : > { %v4981_v1 = vpop.permute.xlu0 %4980  ;;  %4887 = vmatpush1.bf16.msra.mxu1 %v4859_v41  ;;  %7905 = vmatmul.mubr.msk.bf16.vlgmr.msra.gmra.mxu0 %vm4653_vm12, %v8160_v52 }
 0x610   : > { %7909 = vmatpush3.bf16.msra.mxu0 %v4981_v1  ;;  %v4985_v61 = vsel %vm1154_vm3, %v4979_v36, %v4981_v1  ;;  %7912 = vmatprep.mubr.msk.bf16.mxu0 %vm8249_vm11, %v10837_v44 }
 0x611   : > { %5007 = vmatprep.subr.bf16.mxu1 %v4985_v61  ;;  %v5102_v37 = vpop.permute.xlu1 %5101  ;;  %7910 = vmatprep.subr.bf16.mxu0 %v10837_v44 }
 0x612   : > { %7400 = vmatmul.mubr.msk.bf16.vlgmr.msra.gmra.mxu1 %vm4653_vm12, %v8160_v52 }
 0x613   : > { %v5217_v53 = vpop.permute.xlu0 %5216  ;;  %5008 = vmatpush1.bf16.msra.mxu1 %v4984_v20  ;;  %5027 = vmatprep.mubr.bf16.mxu1 %v10969_v55 }
 0x614   : > { %5009 = vmatprep.subr.bf16.mxu1 %v4983_v9  ;;  %7911 = vmatpush3.bf16.msra.mxu0 %v10308_v32  ;;  %v5228_v62 = vsel %vm1632_vm5, %v5217_v53, %v10354_v14  ;;  %v8166_v14 = vld [vmem:[%s10800_s7 + $0x40] sm:$0xff]  }
 0x615   : > { %v10378_v3 = vpop.permute.xlu1 %5343  ;;  %7916 = vmatprep.subr.bf16.mxu0 %v10837_v44 }
 0x617   : > { %v5104_v30 = vpop.permute.xlu0 %5103  ;;  %5010 = vmatpush1.bf16.msra.mxu1 %v4982_v35  ;;  %7913 = vmatmul.mubr.msk.bf16.vlgmr.msra.gmra.mxu0 %vm4653_vm12, %v8161_v21 }
 0x618   : > { %7917 = vmatpush3.bf16.msra.mxu0 %v5104_v30  ;;  %v5108_v50 = vsel %vm1393_vm6, %v5102_v37, %v5104_v30  ;;  %7920 = vmatprep.mubr.msk.bf16.mxu0 %vm8249_vm11, %v10837_v44 }
 0x619   : > { %5130 = vmatprep.subr.bf16.mxu1 %v5108_v50  ;;  %v5100_v11 = vpop.permute.xlu1 %5099  ;;  %7918 = vmatprep.subr.bf16.mxu0 %v10837_v44 }
 0x61a   : > { %v5107_v43 = vsel %vm1393_vm6, %v5100_v11, %v5102_v37  ;;  %7405 = vmatmul.mubr.msk.bf16.vlgmr.msra.gmra.mxu1 %vm4653_vm12, %v8161_v21 }
 0x61b   : > { %v5342_v12 = vpop.permute.xlu0 %5341  ;;  %5131 = vmatpush1.bf16.msra.mxu1 %v5107_v43  ;;  %5150 = vmatprep.mubr.bf16.mxu1 %v10969_v55 }
 0x61c   : > { %5132 = vmatprep.subr.bf16.mxu1 %v5106_v27  ;;  %7919 = vmatpush3.bf16.msra.mxu0 %v10312_v49  ;;  %v5352_v39 = vsel %vm1871_vm8, %v5342_v12, %v10378_v3 }
 0x61d   : > { %v5225_v2 = vpop.permute.xlu1 %5224  ;;  %7924 = vmatprep.subr.bf16.mxu0 %v10837_v44 }
 0x61f   : > { %v5227_v4 = vpop.permute.xlu0 %5226  ;;  %5133 = vmatpush1.bf16.msra.mxu1 %v5105_v19  ;;  %7921 = vmatmul.mubr.msk.bf16.vlgmr.msra.gmra.mxu0 %vm4653_vm12, %v8162_v38 }
 0x620   : > { %7925 = vmatpush3.bf16.msra.mxu0 %v5227_v4  ;;  %v5231_v24 = vsel %vm1632_vm5, %v5225_v2, %v5227_v4  ;;  %7928 = vmatprep.mubr.msk.bf16.mxu0 %vm8249_vm11, %v10837_v44 }
 0x621   : > { %5253 = vmatprep.subr.bf16.mxu1 %v5231_v24  ;;  %v5223_v28 = vpop.permute.xlu1 %5222  ;;  %7926 = vmatprep.subr.bf16.mxu0 %v10837_v44 }
 0x622   : > { %v5230_v63 = vsel %vm1632_vm5, %v5223_v28, %v5225_v2  ;;  %7410 = vmatmul.mubr.msk.bf16.vlgmr.msra.gmra.mxu1 %vm4653_vm12, %v8162_v38 }
 0x623   : > { %v5340_v31 = vpop.permute.xlu0 %5339  ;;  %5254 = vmatpush1.bf16.msra.mxu1 %v5230_v63  ;;  %5273 = vmatprep.mubr.bf16.mxu1 %v10969_v55 }
 0x624   : > { %5255 = vmatprep.subr.bf16.mxu1 %v5229_v7  ;;  %7927 = vmatpush3.bf16.msra.mxu0 %v10330_v51  ;;  %v5351_v45 = vsel %vm1871_vm8, %v5340_v31, %v5342_v12 }
 0x625   : > { %v5348_v29 = vpop.permute.xlu1 %5347  ;;  %7932 = vmatprep.subr.bf16.mxu0 %v10837_v44 }
 0x627   : > { %v5350_v8 = vpop.permute.xlu0 %5349  ;;  %5256 = vmatpush1.bf16.msra.mxu1 %v5228_v62  ;;  %7929 = vmatmul.mubr.msk.bf16.vlgmr.msra.gmra.mxu0 %vm4653_vm12, %v8163_v48 }
 0x628   : > { %7933 = vmatpush3.bf16.msra.mxu0 %v5350_v8  ;;  %v5354_v59 = vsel %vm1871_vm8, %v5348_v29, %v5350_v8  ;;  %7936 = vmatprep.mubr.msk.bf16.mxu0 %vm8249_vm11, %v10837_v44 }
 0x629   : > { %5376 = vmatprep.subr.bf16.mxu1 %v5354_v59  ;;  %v5467_v15 = vpop.permute.xlu1 %5466  ;;  %7934 = vmatprep.subr.bf16.mxu0 %v10837_v44 }
 0x62a   : > { %7415 = vmatmul.mubr.msk.bf16.vlgmr.msra.gmra.mxu1 %vm4653_vm12, %v8163_v48 }
 0x62b   : > { %v5465_v32 = vpop.permute.xlu0 %5464  ;;  %5396 = vmatprep.mubr.bf16.mxu1 %v10969_v55 }
 0x62c   : > { %7935 = vmatpush3.bf16.msra.mxu0 %v10378_v3  ;;  %v5475_v40 = vsel %vm2110_vm7, %v5465_v32, %v5467_v15 }
 0x62d   : > { %v5346_v57 = vpop.permute.xlu1 %5345  ;;  %7940 = vmatprep.subr.bf16.mxu0 %v10837_v44 }
 0x62e   : > { %v5353_v34 = vsel %vm1871_vm8, %v5346_v57, %v5348_v29 }
 0x62f   : > { %v5473_v49 = vpop.permute.xlu0 %5472  ;;  %5377 = vmatpush1.bf16.msra.mxu1 %v5353_v34  ;;  %7937 = vmatmul.mubr.msk.bf16.vlgmr.msra.gmra.mxu0 %vm4653_vm12, %v8164_v47 }
 0x630   : > { %5378 = vmatprep.subr.bf16.mxu1 %v5352_v39  ;;  %7941 = vmatpush3.bf16.msra.mxu0 %v5473_v49 }
 0x631   : > { %v5471_v58 = vpop.permute.xlu1 %5470  ;;  %7942 = vmatprep.subr.bf16.mxu0 %v10837_v44  ;;  %7944 = vmatprep.mubr.msk.bf16.mxu0 %vm8249_vm11, %v10837_v44 }
 0x632   : > { %v5477_v5 = vsel %vm2110_vm7, %v5471_v58, %v5473_v49 }
 0x633   : > { %v5463_v18 = vpop.permute.xlu0 %5462  ;;  %5379 = vmatpush1.bf16.msra.mxu1 %v5351_v45 }
 0x634   : > { %5499 = vmatprep.subr.bf16.mxu1 %v5477_v5  ;;  %7943 = vmatpush3.bf16.msra.mxu0 %v5467_v15  ;;  %v5474_v13 = vsel %vm2110_vm7, %v5463_v18, %v5465_v32 }
 0x635   : > { %v5469_v0 = vpop.permute.xlu1 %5468  ;;  %7948 = vmatprep.subr.bf16.mxu0 %v10837_v44 }
 0x636   : > { %v5476_v26 = vsel %vm2110_vm7, %v5469_v0, %v5471_v58  ;;  %7420 = vmatmul.mubr.msk.bf16.vlgmr.msra.gmra.mxu1 %vm4653_vm12, %v8164_v47 }
 0x637   : > { %v5596_v42 = vpop.permute.xlu0 %5595  ;;  %5500 = vmatpush1.bf16.msra.mxu1 %v5476_v26  ;;  %7945 = vmatmul.mubr.msk.bf16.vlgmr.msra.gmra.mxu0 %vm4653_vm12, %v8165_v54 }
 0x638   : > { %5501 = vmatprep.subr.bf16.mxu1 %v5475_v40  ;;  %7949 = vmatpush3.bf16.msra.mxu0 %v5596_v42 }
 0x639   : > { %v5594_v51 = vpop.permute.xlu1 %5593  ;;  %5519 = vmatprep.mubr.bf16.mxu1 %v10969_v55  ;;  %7950 = vmatprep.subr.bf16.mxu0 %v10837_v44 }
 0x63a   : > { %v5600_v16 = vsel %vm2349_vm9, %v5594_v51, %v5596_v42  ;;  %7952 = vmatprep.mubr.msk.bf16.mxu0 %vm8249_vm11, %v10837_v44 }
 0x63b   : > { %v5588_v56 = vpop.permute.xlu0 %5587  ;;  %5502 = vmatpush1.bf16.msra.mxu1 %v5474_v13 }
 0x63c   : > { %5622 = vmatprep.subr.bf16.mxu1 %v5600_v16 }
 0x63d   : > { %v5592_v46 = vpop.permute.xlu1 %5591 }
 0x63e   : > { %v5599_v23 = vsel %vm2349_vm9, %v5592_v46, %v5594_v51  ;;  %7425 = vmatmul.mubr.msk.bf16.vlgmr.msra.gmra.mxu1 %vm4653_vm12, %v8165_v54 }
 0x63f   : > { %5623 = vmatpush1.bf16.msra.mxu1 %v5599_v23  ;;  %5642 = vmatprep.mubr.bf16.mxu1 %v10969_v55  ;;  %v5586_v36 = vpop.permute.xlu0 %5585 }
 0x640   : > { %v5597_v52 = vsel %vm2349_vm9, %v5586_v36, %v5588_v56 }
 0x641   : > { %v5590_v33 = vpop.permute.xlu1 %5589 }
 0x642   : > { %7951 = vmatpush3.bf16.msra.mxu0 %v5590_v33  ;;  %v5598_v25 = vsel %vm2349_vm9, %v5588_v56, %v5590_v33 }
 0x643   : > { %5624 = vmatprep.subr.bf16.mxu1 %v5598_v25  ;;  %7956 = vmatprep.subr.bf16.mxu0 %v10837_v44 }
 0x644   : > { %5625 = vmatpush1.bf16.msra.mxu1 %v5597_v52 }
 0x645   : > { %7953 = vmatmul.mubr.msk.bf16.vlgmr.msra.gmra.mxu0 %vm4653_vm12, %v8166_v14 }
 0x646   : > { %7958 = vmatprep.mubr.msk.bf16.mxu0 %vm8249_vm11, %v10837_v44 }
 0x647   : > { %7430 = vmatmul.mubr.msk.bf16.vlgmr.msra.gmra.mxu1 %vm4653_vm12, %v8166_v14 }
 0x648   : > { %5835 = vmatprep.mubr.bf16.mxu1 %v10969_v55 }
 0x6bf   : > { %v4734_v10 = vpop.f32.mrf.mxu0 }
 0x6c1   : > { %v7890_v41 = vpop.f32.mrf.mxu0 }
 0x6c2   : > { %v4691_v1 = vpop.f32.mrf.mxu1 }
 0x6c3   : > { %v4737_v61 = vpop.f32.mrf.mxu0 }
 0x6c4   : > { %v4693_v37 = vpop.f32.mrf.mxu1 }
 0x6c5   : > { %v7891_v20 = vpop.f32.mrf.mxu0 }
 0x6c6   : > { %v10470_v53 = vpop.f32.mrf.mxu1 }
 0x6c7   : > { %v4832_v9 = vpop.f32.mrf.mxu0 }
 0x6c8   : > { %v10472_v21 = vpop.f32.mrf.mxu1  ;;  %v4833_v23 = vadd.f32 %v4832_v9, %v4734_v10 }
 0x6c9   : > { %v7898_v3 = vpop.f32.mrf.mxu0 }
 0x6ca   : > { %v4789_v35 = vpop.f32.mrf.mxu1 }
 0x6cb   : > { %v4835_v30 = vpop.f32.mrf.mxu0  ;;  %v4790_v52 = vadd.f32 %v4789_v35, %v4691_v1 }
 0x6cc   : > { %v4791_v50 = vpop.f32.mrf.mxu1 }
 0x6cd   : > { %v7899_v11 = vpop.f32.mrf.mxu0 }
 0x6ce   : > { %v4793_v43 = vpop.f32.mrf.mxu1  ;;  %v4792_v11 = vadd.f32 %v4791_v50, %v4693_v37 }
 0x6cf   : > { %v4949_v12 = vpop.f32.mrf.mxu0  ;;  %v4794_v10 = vadd.f32 %v4793_v43, %v10470_v53 }
 0x6d0   : > { %v4795_v27 = vpop.f32.mrf.mxu1  ;;  %v4958_v41 = vadd.f32 %v4949_v12, %v4833_v23 }
 0x6d1   : > { %v7906_v38 = vpop.f32.mrf.mxu0  ;;  %v4796_v35 = vadd.f32 %v4795_v27, %v10472_v21 }
 0x6d2   : > { %v4906_v2 = vpop.f32.mrf.mxu1 }
 0x6d3   : > { %v4952_v19 = vpop.f32.mrf.mxu0  ;;  %v4956_v38 = vadd.f32 %v4906_v2, %v4790_v52 }
 0x6d4   : > { %v4908_v4 = vpop.f32.mrf.mxu1 }
 0x6d5   : > { %v7907_v24 = vpop.f32.mrf.mxu0 }
 0x6d6   : > { %v4910_v28 = vpop.f32.mrf.mxu1 }
 0x6d7   : > { %v5072_v63 = vpop.f32.mrf.mxu0  ;;  %v4959_v12 = vadd.f32 %v4910_v28, %v4794_v10 }
 0x6d8   : > { %v4912_v31 = vpop.f32.mrf.mxu1  ;;  %v5081_v24 = vadd.f32 %v5072_v63, %v4958_v41 }
 0x6d9   : > { %v7914_v7 = vpop.f32.mrf.mxu0 }
 0x6da   : > { %v5029_v48 = vpop.f32.mrf.mxu1 }
 0x6db   : > { %v5075_v29 = vpop.f32.mrf.mxu0 }
 0x6dc   : > { %v5031_v62 = vpop.f32.mrf.mxu1 }
 0x6dd   : > { %v7915_v8 = vpop.f32.mrf.mxu0 }
 0x6de   : > { %v5033_v59 = vpop.f32.mrf.mxu1  ;;  %v4836_v8 = vadd.f32 %v4835_v30, %v4737_v61  ;;  %v4960_v30 = vadd.f32 %v4912_v31, %v4796_v35 }
 0x6df   : > { %v5195_v15 = vpop.f32.mrf.mxu0 }
 0x6e0   : > { %v5035_v32 = vpop.f32.mrf.mxu1  ;;  %v4961_v9 = vadd.f32 %v4952_v19, %v4836_v8 }
 0x6e1   : > { %v7922_v47 = vpop.f32.mrf.mxu0  ;;  %v5083_v43 = vadd.f32 %v5035_v32, %v4960_v30 }
 0x6e2   : > { %v5152_v57 = vpop.f32.mrf.mxu1  ;;  %v5084_v37 = vadd.f32 %v5075_v29, %v4961_v9 }
 0x6e3   : > { %v5198_v34 = vpop.f32.mrf.mxu0 }
 0x6e4   : > { %v5154_v49 = vpop.f32.mrf.mxu1 }
 0x6e5   : > { %v7923_v39 = vpop.f32.mrf.mxu0 }
 0x6e6   : > { %v5156_v58 = vpop.f32.mrf.mxu1  ;;  %v4957_v39 = vadd.f32 %v4908_v4, %v4792_v11  ;;  %v5082_v4 = vadd.f32 %v5033_v59, %v4959_v12 }
 0x6e7   : > { %v5318_v45 = vpop.f32.mrf.mxu0 }
 0x6e8   : > { %v5158_v5 = vpop.f32.mrf.mxu1  ;;  %v5205_v19 = vadd.f32 %v5156_v58, %v5082_v4 }
 0x6e9   : > { %v7930_v18 = vpop.f32.mrf.mxu0  ;;  %v5206_v27 = vadd.f32 %v5158_v5, %v5083_v43 }
 0x6ea   : > { %v5275_v54 = vpop.f32.mrf.mxu1  ;;  %v5079_v18 = vadd.f32 %v5029_v48, %v4956_v38  ;;  %v5207_v48 = vadd.f32 %v5198_v34, %v5084_v37 }
 0x6eb   : > { %v5321_v0 = vpop.f32.mrf.mxu0 }
 0x6ec   : > { %v5277_v26 = vpop.f32.mrf.mxu1  ;;  %v5202_v44 = vadd.f32 %v5152_v57, %v5079_v18  ;;  %v5710_v18 = vpop.permute.xlu0 %5709 }
 0x6ed   : > { %v7931_v42 = vpop.f32.mrf.mxu0 }
 0x6ee   : > { %v5279_v51 = vpop.f32.mrf.mxu1  ;;  %v5204_v42 = vadd.f32 %v5195_v15, %v5081_v24  ;;  %v5325_v2 = vadd.f32 %v5275_v54, %v5202_v44  ;;  %v5705_v54 = vpop.permute.xlu1 %5704 }
 0x6ef   : > { %v5441_v40 = vpop.f32.mrf.mxu0  ;;  %v5328_v28 = vadd.f32 %v5279_v51, %v5205_v19 }
 0x6f0   : > { %v5281_v56 = vpop.f32.mrf.mxu1 }
 0x6f1   : > { %v7938_v13 = vpop.f32.mrf.mxu0  ;;  %v5329_v34 = vadd.f32 %v5281_v56, %v5206_v27 }
 0x6f3   : > { %v5444_v16 = vpop.f32.mrf.mxu0 }
 0x6f5   : > { %v7939_v46 = vpop.f32.mrf.mxu0 }
 0x6f6   : > { %v5398_v36 = vpop.f32.mrf.mxu1  ;;  %v5080_v46 = vadd.f32 %v5031_v62, %v4957_v39  ;;  %v5330_v62 = vadd.f32 %v5321_v0, %v5207_v48 }
 0x6f7   : > { %v5564_v33 = vpop.f32.mrf.mxu0  ;;  %v5448_v23 = vadd.f32 %v5398_v36, %v5325_v2 }
 0x6f8   : > { %v5400_v14 = vpop.f32.mrf.mxu1  ;;  %v5203_v50 = vadd.f32 %v5154_v49, %v5080_v46  ;;  %v5453_v29 = vadd.f32 %v5444_v16, %v5330_v62 }
 0x6f9   : > { %v7946_v25 = vpop.f32.mrf.mxu0 }
 0x6fa   : > { %v5402_v20 = vpop.f32.mrf.mxu1  ;;  %v5327_v25 = vadd.f32 %v5318_v45, %v5204_v42  ;;  %v5326_v15 = vadd.f32 %v5277_v26, %v5203_v50 }
 0x6fb   : > { %v5567_v3 = vpop.f32.mrf.mxu0  ;;  %v5451_v26 = vadd.f32 %v5402_v20, %v5328_v28 }
 0x6fc   : > { %v5404_v7 = vpop.f32.mrf.mxu1  ;;  %v5450_v63 = vadd.f32 %v5441_v40, %v5327_v25  ;;  %v5449_v45 = vadd.f32 %v5400_v14, %v5326_v15  ;;  %v5576_v40 = vadd.f32 %v5567_v3, %v5453_v29 }
 0x6fd   : > { %v7947_v47 = vpop.f32.mrf.mxu0  ;;  %v5452_v11 = vadd.f32 %v5404_v7, %v5329_v34  ;;  %v7436_v34 = vld [vmem:[%s10802_s9 + $0x4] sm:$0xf] }
 0x6fe   : > { %v5521_v13 = vpop.f32.mrf.mxu1  ;;  %v5573_v52 = vadd.f32 %v5564_v33, %v5450_v63 }
 0x6ff   : > { %v5571_v41 = vadd.f32 %v5521_v13, %v5448_v23 }
 0x700   : > { %v5523_v1 = vpop.f32.mrf.mxu1 }
 0x701   : > { %v5572_v31 = vadd.f32 %v5523_v1, %v5449_v45 }
 0x702   : > { %v5525_v61 = vpop.f32.mrf.mxu1 }
 0x703   : > { %v5574_v14 = vadd.f32 %v5525_v61, %v5451_v26 }
 0x704   : > { %v5527_v53 = vpop.f32.mrf.mxu1 }
 0x705   : > { %v5687_v57 = vpop.f32.mrf.mxu0  ;;  %v5575_v8 = vadd.f32 %v5527_v53, %v5452_v11  ;;  %v5772_v11 = vld [vmem:[%s10802_s9] sm:$0xf] }
 0x706   : > { %v5696_v21 = vadd.f32 %v5687_v57, %v5573_v52 }
 0x707   : > { %v5644_v44 = vpop.f32.mrf.mxu1  ;;  %v7954_v49 = vpop.f32.mrf.mxu0 }
 0x708   : > { %v5694_v59 = vadd.f32 %v5644_v44, %v5571_v41  ;;  %v5714_v32 = vadd.f32 %v5705_v54, %v5696_v21  ;;  %v6690_v49 = vld [vmem:[%s10805_s12] sm:$0x3] }
 0x709   : > { %v5646_v36 = vpop.f32.mrf.mxu1  ;;  %v5690_v33 = vpop.f32.mrf.mxu0 }
 0x70a   : > { %v5712_v58 = vadd.f32 %v5705_v54, %v5694_v59  ;;  %v5695_v0 = vadd.f32 %v5646_v36, %v5572_v31  ;;  %v5699_v38 = vadd.f32 %v5690_v33, %v5576_v40  ;;  %v5720_v42 = vmax.f32 %v5714_v32, 0.0 }
 0x70b   : > { %v5648_v24 = vpop.f32.mrf.mxu1  ;;  %v7955_v5 = vpop.f32.mrf.mxu0  ;;  %v10970_v40 = vmov 0.0  }
 0x70c   : > { %v5718_v51 = vmax.f32 %v5712_v58, 0.0  ;;  %v5713_v16 = vadd.f32 %v5705_v54, %v5695_v0  ;;  %v5697_v47 = vadd.f32 %v5648_v24, %v5574_v14  ;;  %v5717_v20 = vadd.f32 %v5710_v18, %v5699_v38 }
 0x70d   : > { %v5650_v39 = vpop.f32.mrf.mxu1  ;;  %v5726_v25 = vmul.f32 %v5720_v42, %v10959_v17 }
 0x70e   : > { %v5719_v56 = vmax.f32 %v5713_v16, 0.0  ;;  %v5715_v3 = vadd.f32 %v5710_v18, %v5697_v47  ;;  %v5698_v13 = vadd.f32 %v5650_v39, %v5575_v8  ;;  %v5724_v10 = vmul.f32 %v5718_v51, %v10963_v60  ;;  %v7444_v8 = vld [vmem:[%s10802_s9 + $0x8] sm:$0xf] }
 0x70f   : > { %v5723_v35 = vmax.f32 %v5717_v20, 0.0  ;;  %v7497_v2 = vpack.c.bf16 %v5726_v25, %v5726_v25  ;;  %v7447_v20 = vld [vmem:[%s10802_s9 + $0xc] sm:$0xf] }
 0x710   : > { %v5725_v9 = vmul.f32 %v5719_v56, %v10964_v6  ;;  %v5721_v7 = vmax.f32 %v5715_v3, 0.0  ;;  %v5716_v46 = vadd.f32 %v5710_v18, %v5698_v13 }
 0x711   : > { %v5729_v63 = vmul.f32 %v5723_v35, %v10959_v17 }
 0x712   : > { %v7496_v1 = vpack.c.bf16 %v5725_v9, %v5724_v10  ;;  %v5722_v12 = vmax.f32 %v5716_v46, 0.0  ;;  %v5727_v37 = vmul.f32 %v5721_v7, %v10963_v60  ;;  %v7450_v46 = vld [vmem:[%s10802_s9 + $0x10] sm:$0xf] }
 0x713   : > { %v7499_v30 = vpack.c.bf16 %v5729_v63, %v5729_v63 }
 0x714   : > { %5746 = vrot.lane.b32.xlu1 %v7496_v1, %s10967_s3  ;;  %v5728_v50 = vmul.f32 %v5722_v12, %v10964_v6 }
 0x716   : > { %v7498_v61 = vpack.c.bf16 %v5728_v50, %v5727_v37  ;;  %v7453_v50 = vld [vmem:[%s10802_s9 + $0x14] sm:$0xf] }
 0x718   : > { %5748 = vrot.lane.b32.xlu1 %v7497_v2, %s10967_s3  ;;  %5750 = vrot.lane.b32.xlu0 %v7498_v61, %s10967_s3 }
 0x71c   : > { %5752 = vrot.lane.b32.xlu0 %v7499_v30, %s10967_s3  ;;  %s7469_s3 = sshll.u32 %s8343_s29, 4 }
 0x71d   : > { %s7018_s0 = scalar_lea.hbm %s10806_s13, %s7469_s3 }
 0x786   : > { %v5747_v4 = vpop.permute.xlu1 %5746 }
 0x787   : > { %v5754_v48 = vrot.slane %v5747_v4, 4 }
 0x789   : > { %v5756_v15 = vsel %vm2775_vm14, %v5754_v48, %v5747_v4  ;;  %v7456_v4 = vld [vmem:[%s10802_s9 + $0x18] sm:$0xf] }
 0x78a   : > { %5764 = vst.msk [vmem:[#allocation2] sm:$0xff] %vm9312_vm15, %v5756_v15  ;;  %v5749_v23 = vpop.permute.xlu1 %5748  ;;  %v5751_v52 = vpop.permute.xlu0 %5750 }
 0x78b   : > { %v5757_v53 = vsel %vm2775_vm14, %v5754_v48, %v5749_v23  ;;  %v5755_v43 = vrot.slane %v5751_v52, 4 }
 0x78c   : > { %5765 = vst.msk [vmem:[#allocation2 + $0x8] sm:$0xf] %vm2812_vm0, %v5757_v53  ;;  %v7459_v53 = vld [vmem:[%s10802_s9 + $0x1c] sm:$0xf] }
 0x78d   : > { %v5758_v19 = vsel %vm2775_vm14, %v5755_v43, %v5751_v52 }
 0x78e   : > { %5766 = vst.msk [vmem:[#allocation2 + $0xc] sm:$0xff] %vm9312_vm15, %v5758_v19  ;;  %v5753_v62 = vpop.permute.xlu0 %5752 }
 0x78f   : > { %v5759_v57 = vsel %vm2775_vm14, %v5755_v43, %v5753_v62  ;;  %v7462_v62 = vld [vmem:[%s10802_s9 + $0x20] sm:$0xf] }
 0x790   : > { %5767 = vst.msk [vmem:[#allocation2 + $0x14] sm:$0xf] %vm2812_vm0, %v5759_v57 }
 0x791   : > { %v5768_v45 = vld [vmem:[#allocation2] sm:$0xff] }
 0x793   : > { %v5769_v27 = vld [vmem:[#allocation2 + $0x8] sm:$0xf] }
 0x795   : > { %v5770_v41 = vld [vmem:[#allocation2 + $0xc] sm:$0xff] }
 0x796   : > { %v7438_v21 = vcombine.high %v5768_v45, %v5770_v41  ;;  %v7437_v44 = vcombine.low %v5768_v45, %v5770_v41 }
 0x797   : > { %v5771_v28 = vld [vmem:[#allocation2 + $0x14] sm:$0xf] }
 0x798   : > { %5790 = vrot.lane.b32.xlu1 %v7438_v21, %s10932_s23  ;;  %v7439_v29 = vcombine.low %v5769_v27, %v5771_v28 }
 0x79a   : > { %5792 = vrot.lane.b32.xlu0 %v7439_v29, %s10932_s23 }
 0x79c   : > { %5788 = vrot.lane.b32.xlu1 %v7437_v44, %s10932_s23 }
 0x79e   : > { %5975 = vrot.lane.b32.xlu0 %v7438_v21, %s10933_s16 }
 0x7a0   : > { %5977 = vrot.lane.b32.xlu1 %v7439_v29, %s10933_s16 }
 0x7a2   : > { %5973 = vrot.lane.b32.xlu0 %v7437_v44, %s10933_s16 }
 0x7a4   : > { %6075 = vrot.lane.b32.xlu1 %v7438_v21, %s10934_s24 }
 0x7a6   : > { %6077 = vrot.lane.b32.xlu0 %v7439_v29, %s10934_s24 }
 0x7a8   : > { %6073 = vrot.lane.b32.xlu1 %v7437_v44, %s10934_s24  ;;  %s8251_s24 = smov [#allocation3]  }
 0x7a9   : > { %s8179_s29 = sshll.u32 %s8251_s24, 4  ;;  %s8180_s29 = int_to_ptr.vmem [resolvable:$false] %s8179_s29 }
 0x7aa   : > { %6175 = vrot.lane.b32.xlu0 %v7438_v21, %s10935_s21 }
 0x7ac   : > { %6177 = vrot.lane.b32.xlu1 %v7439_v29, %s10935_s21 }
 0x7ae   : > { %6173 = vrot.lane.b32.xlu0 %v7437_v44, %s10935_s21  ;;  %s8181_s21 = scalar_lea.vmem %s8180_s29, 32 }
 0x7b0   : > { %6275 = vrot.lane.b32.xlu1 %v7438_v21, %s10936_s20 }
 0x7b2   : > { %6277 = vrot.lane.b32.xlu0 %v7439_v29, %s10936_s20 }
 0x7b4   : > { %6273 = vrot.lane.b32.xlu1 %v7437_v44, %s10936_s20 }
 0x7b6   : > { %6375 = vrot.lane.b32.xlu0 %v7438_v21, %s10937_s30 }
 0x7b8   : > { %6377 = vrot.lane.b32.xlu1 %v7439_v29, %s10937_s30 }
 0x7ba   : > { %6373 = vrot.lane.b32.xlu0 %v7437_v44, %s10937_s30 }
 0x7bc   : > { %6475 = vrot.lane.b32.xlu1 %v7438_v21, %s10938_s15 }
 0x7be   : > { %6477 = vrot.lane.b32.xlu0 %v7439_v29, %s10938_s15 }
 0x7c0   : > { %6473 = vrot.lane.b32.xlu1 %v7437_v44, %s10938_s15  ;;  %s8250_s15 = smov 1  }
 0x7c2   : > { %6575 = vrot.lane.b32.xlu0 %v7438_v21, %s10939_s22 }
 0x7c4   : > { %6577 = vrot.lane.b32.xlu1 %v7439_v29, %s10939_s22 }
 0x7c6   : > { %6573 = vrot.lane.b32.xlu0 %v7437_v44, %s10939_s22  ;;  %s431_s22 = sand.u32 1, %s8227_s26  }
 0x7c7   : > { %s432_s27 = scalar_lea.vmem [#allocation3], %s431_s22 }
 0x7c8   : > { %6674 = vperm.xlu1 %8094, %v6671_v22   ;;  %s7020_s17 = sshll.u32 %s432_s27, 4  ;;  %s7021_s17 = int_to_ptr.vmem [resolvable:$true] %s7020_s17 }
 0x7c9   : > { %s8175_s16 = scalar_lea.vmem %s7021_s17, 16  ;;  %p8182_p0 = scmp.lt.s32.totalorder %s7021_s17, %s8180_s29 }
 0x7ca   : > { %6693 = vperm.xlu0 %8093, %v6690_v49   ;;  %p8176_p11 = scmp.ne.s32.totalorder %s7021_s17, %s8175_s16  ;;  %p8183_p1 = scmp.lt.s32.totalorder %s8181_s21, %s8175_s16 }
 0x7cc   : > { %p8177_p12 = pnand %p8176_p11, %p8360_p5  ;;  %p8184_p2 = por %p8183_p1, %p8182_p0 }
 0x7ce   : > { %p8178_p13 = pneg %p8177_p12 }
 0x7d0   : > { %p8185_p3 = pnand %p8184_p2, %p8178_p13 }
 0x80a   : > { %v5791_v54 = vpop.permute.xlu1 %5790 }
 0x80c   : > { %v5793_v31 = vpop.permute.xlu0 %5792 }
 0x80d   : > { %7957 = vmatpush3.bf16.msra.mxu0 %v5793_v31  ;;  %v5795_v59 = vsel %vm519_vm2, %v5791_v54, %v5793_v31 }
 0x80e   : > { %5817 = vmatprep.subr.bf16.mxu1 %v5795_v59  ;;  %v5789_v26 = vpop.permute.xlu1 %5788  ;;  %7962 = vmatprep.subr.bf16.mxu0 %v10970_v40 }
 0x80f   : > { %v5794_v36 = vsel %vm519_vm2, %v5789_v26, %v5791_v54  ;;  %vm6700_vm2 = vcmask 1043456  }
 0x810   : > { %7959 = vmatmul.mubr.msk.bf16.vlgmr.msra.gmra.mxu0 %vm5799_vm13, %v7436_v34  ;;  %v5976_v33 = vpop.permute.xlu0 %5975  ;;  %5818 = vmatpush1.bf16.msra.mxu1 %v5794_v36 }
 0x811   : > { %5904 = vmatprep.subr.bf16.mxu1 %v7438_v21  ;;  %7963 = vmatpush3.bf16.msra.mxu0 %v7439_v29 }
 0x812   : > { %v5978_v32 = vpop.permute.xlu1 %5977  ;;  %7964 = vmatprep.mubr.msk.bf16.mxu0 %vm8249_vm11, %v10970_v40  ;;  %7968 = vmatprep.subr.bf16.mxu0 %v10970_v40 }
 0x813   : > { %7440 = vmatmul.mubr.msk.bf16.vlgmr.msra.gmra.mxu1 %vm5799_vm13, %v7436_v34  ;;  %v5980_v58 = vsel %vm915_vm4, %v5976_v33, %v5978_v32 }
 0x814   : > { %v5974_v0 = vpop.permute.xlu0 %5973  ;;  %5905 = vmatpush1.bf16.msra.mxu1 %v7437_v44  ;;  %5922 = vmatprep.mubr.bf16.mxu1 %v10969_v55 }
 0x815   : > { %6001 = vmatprep.subr.bf16.mxu1 %v5980_v58  ;;  %v5979_v5 = vsel %vm915_vm4, %v5974_v0, %v5976_v33  ;;  %vm6793_vm4 = vcmask 254976  }
 0x816   : > { %v6076_v14 = vpop.permute.xlu1 %6075 }
 0x818   : > { %7965 = vmatmul.mubr.msk.bf16.vlgmr.msra.gmra.mxu0 %vm5799_vm13, %v5772_v11  ;;  %v6078_v38 = vpop.permute.xlu0 %6077 }
 0x819   : > { %7969 = vmatpush3.bf16.msra.mxu0 %v5978_v32  ;;  %7970 = vmatprep.mubr.msk.bf16.mxu0 %vm8249_vm11, %v10970_v40  ;;  %v6080_v16 = vsel %vm1154_vm3, %v6076_v14, %v6078_v38 }
 0x81a   : > { %v6074_v24 = vpop.permute.xlu1 %6073  ;;  %7974 = vmatprep.subr.bf16.mxu0 %v10970_v40 }
 0x81b   : > { %7442 = vmatmul.mubr.msk.bf16.vlgmr.msra.gmra.mxu1 %vm5799_vm13, %v5772_v11  ;;  %v6079_v18 = vsel %vm1154_vm3, %v6074_v24, %v6076_v14  ;;  %vm6696_vm3 = vcmask 64512  }
 0x81c   : > { %6002 = vmatpush1.bf16.msra.mxu1 %v5979_v5  ;;  %v6176_v51 = vpop.permute.xlu0 %6175  ;;  %6019 = vmatprep.mubr.bf16.mxu1 %v10969_v55 }
 0x81d   : > { %6101 = vmatprep.subr.bf16.mxu1 %v6080_v16 }
 0x81e   : > { %v6178_v47 = vpop.permute.xlu1 %6177 }
 0x81f   : > { %v6180_v56 = vsel %vm1393_vm6, %v6176_v51, %v6178_v47 }
 0x820   : > { %7971 = vmatmul.mubr.msk.bf16.vlgmr.msra.gmra.mxu0 %vm5799_vm13, %v7444_v8  ;;  %v6174_v39 = vpop.permute.xlu0 %6173 }
 0x821   : > { %7975 = vmatpush3.bf16.msra.mxu0 %v6078_v38  ;;  %7976 = vmatprep.mubr.msk.bf16.mxu0 %vm8249_vm11, %v10970_v40  ;;  %v6179_v10 = vsel %vm1393_vm6, %v6174_v39, %v6176_v51 }
 0x822   : > { %7980 = vmatprep.subr.bf16.mxu0 %v10970_v40  ;;  %v6276_v42 = vpop.permute.xlu1 %6275 }
 0x823   : > { %7445 = vmatmul.mubr.msk.bf16.vlgmr.msra.gmra.mxu1 %vm5799_vm13, %v7444_v8 }
 0x824   : > { %6102 = vmatpush1.bf16.msra.mxu1 %v6079_v18  ;;  %6119 = vmatprep.mubr.bf16.mxu1 %v10969_v55  ;;  %v6278_v3 = vpop.permute.xlu0 %6277 }
 0x825   : > { %6201 = vmatprep.subr.bf16.mxu1 %v6180_v56  ;;  %v6280_v9 = vsel %vm1632_vm5, %v6276_v42, %v6278_v3 }
 0x826   : > { %v6274_v13 = vpop.permute.xlu1 %6273 }
 0x827   : > { %v6279_v1 = vsel %vm1632_vm5, %v6274_v13, %v6276_v42  ;;  %vm7005_vm5 = vcmask 24576  }
 0x828   : > { %7977 = vmatmul.mubr.msk.bf16.vlgmr.msra.gmra.mxu0 %vm5799_vm13, %v7447_v20  ;;  %v6376_v7 = vpop.permute.xlu0 %6375 }
 0x829   : > { %7981 = vmatpush3.bf16.msra.mxu0 %v6178_v47  ;;  %7982 = vmatprep.mubr.msk.bf16.mxu0 %vm8249_vm11, %v10970_v40 }
 0x82a   : > { %7986 = vmatprep.subr.bf16.mxu0 %v10970_v40  ;;  %v6378_v25 = vpop.permute.xlu1 %6377 }
 0x82b   : > { %7448 = vmatmul.mubr.msk.bf16.vlgmr.msra.gmra.mxu1 %vm5799_vm13, %v7447_v20  ;;  %v6380_v12 = vsel %vm1871_vm8, %v6376_v7, %v6378_v25 }
 0x82c   : > { %6202 = vmatpush1.bf16.msra.mxu1 %v6179_v10  ;;  %6219 = vmatprep.mubr.bf16.mxu1 %v10969_v55  ;;  %v6374_v35 = vpop.permute.xlu0 %6373 }
 0x82d   : > { %6301 = vmatprep.subr.bf16.mxu1 %v6280_v9  ;;  %v6379_v63 = vsel %vm1871_vm8, %v6374_v35, %v6376_v7 }
 0x82e   : > { %v6476_v37 = vpop.permute.xlu1 %6475 }
 0x830   : > { %7983 = vmatmul.mubr.msk.bf16.vlgmr.msra.gmra.mxu0 %vm5799_vm13, %v7450_v46  ;;  %v6478_v2 = vpop.permute.xlu0 %6477 }
 0x831   : > { %7987 = vmatpush3.bf16.msra.mxu0 %v6278_v3  ;;  %7988 = vmatprep.mubr.msk.bf16.mxu0 %vm8249_vm11, %v10970_v40  ;;  %v6480_v30 = vsel %vm2110_vm7, %v6476_v37, %v6478_v2 }
 0x832   : > { %7992 = vmatprep.subr.bf16.mxu0 %v10970_v40  ;;  %v6474_v61 = vpop.permute.xlu1 %6473 }
 0x833   : > { %7451 = vmatmul.mubr.msk.bf16.vlgmr.msra.gmra.mxu1 %vm5799_vm13, %v7450_v46  ;;  %v6479_v23 = vsel %vm2110_vm7, %v6474_v61, %v6476_v37 }
 0x834   : > { %6302 = vmatpush1.bf16.msra.mxu1 %v6279_v1  ;;  %6319 = vmatprep.mubr.bf16.mxu1 %v10969_v55  ;;  %v6576_v15 = vpop.permute.xlu0 %6575 }
 0x835   : > { %6401 = vmatprep.subr.bf16.mxu1 %v6380_v12 }
 0x836   : > { %v6578_v48 = vpop.permute.xlu1 %6577 }
 0x837   : > { %v6580_v52 = vsel %vm2349_vm9, %v6576_v15, %v6578_v48 }
 0x838   : > { %7989 = vmatmul.mubr.msk.bf16.vlgmr.msra.gmra.mxu0 %vm5799_vm13, %v7453_v50  ;;  %v6574_v43 = vpop.permute.xlu0 %6573 }
 0x839   : > { %7993 = vmatpush3.bf16.msra.mxu0 %v6378_v25  ;;  %7994 = vmatprep.mubr.msk.bf16.mxu0 %vm8249_vm11, %v10970_v40  ;;  %v6579_v19 = vsel %vm2349_vm9, %v6574_v43, %v6576_v15 }
 0x83a   : > { %7998 = vmatprep.subr.bf16.mxu0 %v10970_v40 }
 0x83b   : > { %7454 = vmatmul.mubr.msk.bf16.vlgmr.msra.gmra.mxu1 %vm5799_vm13, %v7453_v50 }
 0x83c   : > { %6402 = vmatpush1.bf16.msra.mxu1 %v6379_v63  ;;  %6419 = vmatprep.mubr.bf16.mxu1 %v10969_v55 }
 0x83d   : > { %6501 = vmatprep.subr.bf16.mxu1 %v6480_v30 }
 0x840   : > { %7995 = vmatmul.mubr.msk.bf16.vlgmr.msra.gmra.mxu0 %vm5799_vm13, %v7456_v4 }
 0x841   : > { %7999 = vmatpush3.bf16.msra.mxu0 %v6478_v2  ;;  %8000 = vmatprep.mubr.msk.bf16.mxu0 %vm8249_vm11, %v10970_v40 }
 0x842   : > { %8004 = vmatprep.subr.bf16.mxu0 %v10970_v40 }
 0x843   : > { %7457 = vmatmul.mubr.msk.bf16.vlgmr.msra.gmra.mxu1 %vm5799_vm13, %v7456_v4 }
 0x844   : > { %6502 = vmatpush1.bf16.msra.mxu1 %v6479_v23  ;;  %6519 = vmatprep.mubr.bf16.mxu1 %v10969_v55 }
 0x845   : > { %6601 = vmatprep.subr.bf16.mxu1 %v6580_v52 }
 0x848   : > { %8001 = vmatmul.mubr.msk.bf16.vlgmr.msra.gmra.mxu0 %vm5799_vm13, %v7459_v53 }
 0x849   : > { %8005 = vmatpush3.bf16.msra.mxu0 %v6578_v48  ;;  %8006 = vmatprep.mubr.msk.bf16.mxu0 %vm8249_vm11, %v10970_v40 }
 0x84a   : > { %8010 = vmatprep.subr.bf16.mxu0 %v10970_v40 }
 0x84b   : > { %7460 = vmatmul.mubr.msk.bf16.vlgmr.msra.gmra.mxu1 %vm5799_vm13, %v7459_v53 }
 0x84c   : > { %6602 = vmatpush1.bf16.msra.mxu1 %v6579_v19  ;;  %6619 = vmatprep.mubr.bf16.mxu1 %v10969_v55 }
 0x850   : > { %8007 = vmatmul.mubr.msk.bf16.vlgmr.msra.gmra.mxu0 %vm5799_vm13, %v7462_v62 }
 0x851   : > { %8012 = vmatprep.mubr.msk.bf16.mxu0 %vm8249_vm11, %v10970_v40 }
 0x853   : > { %7463 = vmatmul.mubr.msk.bf16.vlgmr.msra.gmra.mxu1 %vm5799_vm13, %v7462_v62 }
 0x854   : > { %6742 = vmatprep.mubr.bf16.mxu1 %v10969_v55 }
 0x8d0   : > { %v5878_v57 = vpop.f32.mrf.mxu0 }
 0x8d2   : > { %v7960_v45 = vpop.f32.mrf.mxu0 }
 0x8d3   : > { %v5837_v41 = vpop.f32.mrf.mxu1 }
 0x8d4   : > { %v5881_v21 = vpop.f32.mrf.mxu0 }
 0x8d5   : > { %v5839_v27 = vpop.f32.mrf.mxu1 }
 0x8d6   : > { %v7961_v28 = vpop.f32.mrf.mxu0 }
 0x8d7   : > { %v5841_v29 = vpop.f32.mrf.mxu1 }
 0x8d8   : > { %v5965_v44 = vpop.f32.mrf.mxu0 }
 0x8d9   : > { %v5842_v22 = vpop.f32.mrf.mxu1  ;;  %v5966_v30 = vadd.f32 %v5965_v44, %v5878_v57 }
 0x8da   : > { %v7966_v49 = vpop.f32.mrf.mxu0 }
 0x8db   : > { %v5924_v54 = vpop.f32.mrf.mxu1 }
 0x8dc   : > { %v5968_v31 = vpop.f32.mrf.mxu0  ;;  %v5925_v52 = vadd.f32 %v5924_v54, %v5837_v41 }
 0x8dd   : > { %v5926_v59 = vpop.f32.mrf.mxu1 }
 0x8de   : > { %v7967_v34 = vpop.f32.mrf.mxu0  ;;  %v5927_v62 = vadd.f32 %v5926_v59, %v5839_v27 }
 0x8df   : > { %v5928_v26 = vpop.f32.mrf.mxu1 }
 0x8e0   : > { %v6062_v36 = vpop.f32.mrf.mxu0 }
 0x8e1   : > { %v5929_v33 = vpop.f32.mrf.mxu1  ;;  %v6070_v15 = vadd.f32 %v6062_v36, %v5966_v30 }
 0x8e2   : > { %v7972_v32 = vpop.f32.mrf.mxu0 }
 0x8e3   : > { %v6021_v58 = vpop.f32.mrf.mxu1 }
 0x8e4   : > { %v6065_v55 = vpop.f32.mrf.mxu0  ;;  %v6068_v45 = vadd.f32 %v6021_v58, %v5925_v52  ;;  %v6836_v52 = vld [vmem:[%s10795_s2 + $0xe0] sm:$0xff] }
 0x8e5   : > { %v6023_v0 = vpop.f32.mrf.mxu1 }
 0x8e6   : > { %v7973_v11 = vpop.f32.mrf.mxu0  ;;  %v6069_v22 = vadd.f32 %v6023_v0, %v5927_v62  ;;  %v6675_v0 = vpop.permute.xlu1 %6674  ;;  %v6834_v62 = vld [vmem:[%s10795_s2 + $0xd0] sm:$0xff] }
 0x8e7   : > { %v6025_v14 = vpop.f32.mrf.mxu1 }
 0x8e8   : > { %v6162_v38 = vpop.f32.mrf.mxu0 }
 0x8e9   : > { %v6026_v24 = vpop.f32.mrf.mxu1  ;;  %v6170_v43 = vadd.f32 %v6162_v38, %v6070_v15  ;;  %v6837_v15 = vld [vmem:[%s10795_s2 + $0xe8] sm:$0xff] }
 0x8ea   : > { %v7978_v5 = vpop.f32.mrf.mxu0 }
 0x8eb   : > { %v6121_v51 = vpop.f32.mrf.mxu1 }
 0x8ec   : > { %v6165_v16 = vpop.f32.mrf.mxu0  ;;  %v6168_v49 = vadd.f32 %v6121_v51, %v6068_v45  ;;  %v6818_v45 = vld [vmem:[%s10795_s2 + $0x50] sm:$0xff] }
 0x8ed   : > { %v6123_v8 = vpop.f32.mrf.mxu1 }
 0x8ee   : > { %v7979_v47 = vpop.f32.mrf.mxu0  ;;  %v6169_v33 = vadd.f32 %v6123_v8, %v6069_v22 }
 0x8ef   : > { %v6125_v39 = vpop.f32.mrf.mxu1 }
 0x8f0   : > { %v6262_v18 = vpop.f32.mrf.mxu0 }
 0x8f1   : > { %v6126_v42 = vpop.f32.mrf.mxu1  ;;  %v6270_v28 = vadd.f32 %v6262_v18, %v6170_v43  ;;  %v6835_v43 = vld [vmem:[%s10795_s2 + $0xd8] sm:$0xff] }
 0x8f2   : > { %v7984_v56 = vpop.f32.mrf.mxu0 }
 0x8f3   : > { %v6221_v20 = vpop.f32.mrf.mxu1 }
 0x8f4   : > { %v6265_v3 = vpop.f32.mrf.mxu0  ;;  %v6268_v57 = vadd.f32 %v6221_v20, %v6168_v49  ;;  %v6694_v49 = vpop.permute.xlu0 %6693 }
 0x8f5   : > { %v6223_v13 = vpop.f32.mrf.mxu1 }
 0x8f6   : > { %v7985_v10 = vpop.f32.mrf.mxu0  ;;  %v6269_v55 = vadd.f32 %v6223_v13, %v6169_v33 }
 0x8f7   : > { %v6225_v9 = vpop.f32.mrf.mxu1 }
 0x8f8   : > { %v6362_v7 = vpop.f32.mrf.mxu0 }
 0x8f9   : > { %v6226_v46 = vpop.f32.mrf.mxu1  ;;  %v6370_v34 = vadd.f32 %v6362_v7, %v6270_v28 }
 0x8fa   : > { %v7990_v25 = vpop.f32.mrf.mxu0 }
 0x8fb   : > { %v6321_v1 = vpop.f32.mrf.mxu1 }
 0x8fc   : > { %v6365_v35 = vpop.f32.mrf.mxu0  ;;  %v6368_v41 = vadd.f32 %v6321_v1, %v6268_v57 }
 0x8fd   : > { %v6323_v12 = vpop.f32.mrf.mxu1 }
 0x8fe   : > { %v7991_v37 = vpop.f32.mrf.mxu0  ;;  %v6369_v27 = vadd.f32 %v6323_v12, %v6269_v55 }
 0x8ff   : > { %v6325_v50 = vpop.f32.mrf.mxu1 }
 0x900   : > { %v6462_v2 = vpop.f32.mrf.mxu0 }
 0x901   : > { %v6326_v63 = vpop.f32.mrf.mxu1  ;;  %v6470_v32 = vadd.f32 %v6462_v2, %v6370_v34 }
 0x902   : > { %v7996_v61 = vpop.f32.mrf.mxu0  ;;  %v6689_v63 = vld [vmem:[%s10804_s11] sm:$0x1] }
 0x903   : > { %v6421_v4 = vpop.f32.mrf.mxu1 }
 0x904   : > { %v6465_v48 = vpop.f32.mrf.mxu0  ;;  %v6468_v59 = vadd.f32 %v6421_v4, %v6368_v41  ;;  %v6838_v4 = vld [vmem:[%s10795_s2 + $0xf0] sm:$0xff] }
 0x905   : > { %v6423_v23 = vpop.f32.mrf.mxu1  ;;  %v6822_v48 = vld [vmem:[%s10795_s2 + $0x70] sm:$0xff] }
 0x906   : > { %v7997_v53 = vpop.f32.mrf.mxu0  ;;  %v6469_v5 = vadd.f32 %v6423_v23, %v6369_v27  ;;  %v6821_v23 = vld [vmem:[%s10795_s2 + $0x68] sm:$0xff] }
 0x907   : > { %v6425_v19 = vpop.f32.mrf.mxu1  ;;  %v6820_v53 = vld [vmem:[%s10795_s2 + $0x60] sm:$0xff]  ;;  %v6817_v27 = vld [vmem:[%s10795_s2 + $0x48] sm:$0xff] }
 0x908   : > { %v6562_v21 = vpop.f32.mrf.mxu0  ;;  %v6819_v19 = vld [vmem:[%s10795_s2 + $0x58] sm:$0xff] }
 0x909   : > { %v6426_v29 = vpop.f32.mrf.mxu1  ;;  %v6570_v11 = vadd.f32 %v6562_v21, %v6470_v32  ;;  %v6833_v21 = vld [vmem:[%s10795_s2 + $0xc8] sm:$0xff] }
 0x90a   : > { %v8002_v31 = vpop.f32.mrf.mxu0 }
 0x90b   : > { %v6521_v26 = vpop.f32.mrf.mxu1 }
 0x90c   : > { %v6565_v44 = vpop.f32.mrf.mxu0  ;;  %v6568_v51 = vadd.f32 %v6521_v26, %v6468_v59  ;;  %v6832_v59 = vld [vmem:[%s10795_s2 + $0xc0] sm:$0xff] }
 0x90d   : > { %v6523_v36 = vpop.f32.mrf.mxu1 }
 0x90e   : > { %v8003_v54 = vpop.f32.mrf.mxu0  ;;  %v6569_v39 = vadd.f32 %v6523_v36, %v6469_v5  ;;  %v6814_v5 = vld [vmem:[%s10795_s2 + $0x30] sm:$0xff] }
 0x90f   : > { %v6525_v14 = vpop.f32.mrf.mxu1 }
 0x910   : > { %v6662_v58 = vpop.f32.mrf.mxu0 }
 0x911   : > { %v6670_v38 = vadd.f32 %v6662_v58, %v6570_v11  ;;  %v6526_v24 = vpop.f32.mrf.mxu1  ;;  %v6816_v58 = vld [vmem:[%s10795_s2 + $0x40] sm:$0xff] }
 0x912   : > { %v8008_v16 = vpop.f32.mrf.mxu0  ;;  %v6815_v24 = vld [vmem:[%s10795_s2 + $0x38] sm:$0xff] }
 0x913   : > { %v6679_v47 = vadd.f32 %v6675_v0, %v6670_v38  ;;  %v6621_v8 = vpop.f32.mrf.mxu1  ;;  %v6831_v38 = vld [vmem:[%s10795_s2 + $0xb8] sm:$0xff]  ;;  %v6813_v16 = vld [vmem:[%s10795_s2 + $0x28] sm:$0xff] }
 0x914   : > { %v6668_v18 = vadd.f32 %v6621_v8, %v6568_v51  ;;  %v6665_v42 = vpop.f32.mrf.mxu0  ;;  %v6829_v51 = vld [vmem:[%s10795_s2 + $0xa8] sm:$0xff]  ;;  %v6843_v8 = vld [vmem:[%s10795_s2 + $0x118] sm:$0xff] }
 0x915   : > { %v6682_v56 = vmax.f32 %v6679_v47, 0.0  ;;  %v6623_v20 = vpop.f32.mrf.mxu1  ;;  %v6828_v47 = vld [vmem:[%s10795_s2 + $0xa0] sm:$0xff]  ;;  %v6827_v42 = vld [vmem:[%s10795_s2 + $0x98] sm:$0xff] }
 0x916   : > { %v6677_v3 = vadd.f32 %v6675_v0, %v6668_v18  ;;  %v6669_v13 = vadd.f32 %v6623_v20, %v6569_v39  ;;  %v8009_v10 = vpop.f32.mrf.mxu0  ;;  %v6812_v39 = vld [vmem:[%s10795_s2 + $0x20] sm:$0xff]  ;;  %v6842_v18 = vld [vmem:[%s10795_s2 + $0x110] sm:$0xff]  ;;  %v6811_v20 = vld [vmem:[%s10795_s2 + $0x18] sm:$0xff] }
 0x917   : > { %v6685_v9 = vmul.f32 %v6682_v56, %v10959_v17  ;;  %v6625_v7 = vpop.f32.mrf.mxu1  ;;  %v6841_v56 = vld [vmem:[%s10795_s2 + $0x108] sm:$0xff]  ;;  %v6810_v10 = vld [vmem:[%s10795_s2 + $0x10] sm:$0xff] }
 0x918   : > { %v6680_v46 = vmax.f32 %v6677_v3, 0.0  ;;  %v6678_v25 = vadd.f32 %v6675_v0, %v6669_v13  ;;  %v6830_v0 = vld [vmem:[%s10795_s2 + $0xb0] sm:$0xff]  ;;  %v6840_v13 = vld [vmem:[%s10795_s2 + $0x100] sm:$0xff]  ;;  %v6809_v7 = vld [vmem:[%s10795_s2 + $0x8] sm:$0xff] }
 0x919   : > { %v6626_v1 = vpop.f32.mrf.mxu1  ;;  %v6688_v35 = vpack.c.bf16 %v6685_v9, %v6685_v9  ;;  %v6826_v3 = vld [vmem:[%s10795_s2 + $0x90] sm:$0xff]  ;;  %v6825_v9 = vld [vmem:[%s10795_s2 + $0x88] sm:$0xff] }
 0x91a   : > { %v6683_v12 = vmul.f32 %v6680_v46, %v10963_v60  ;;  %v6681_v37 = vmax.f32 %v6678_v25, 0.0  ;;  %v6839_v60 = vld [vmem:[%s10795_s2 + $0xf8] sm:$0xff]  ;;  %v6824_v46 = vld [vmem:[%s10795_s2 + $0x80] sm:$0xff] }
 0x91b   : > { %v6708_v50 = vsel %vm6700_vm2, %v6688_v35, 0  ;;  %v6808_v25 = vld [vmem:[%s10795_s2] sm:$0xff] }
 0x91c   : > { %v6684_v2 = vmul.f32 %v6681_v37, %v10964_v6  ;;  %8011 = vmatpush3.bf16.msra.mxu0 %v6708_v50  ;;  %v6686_v61 = vpack.c.bf16 %v6683_v12, %v6683_v12  ;;  %v6823_v6 = vld [vmem:[%s10795_s2 + $0x78] sm:$0xff] }
 0x91d   : > { %8016 = vmatprep.subr.mxu0 %v10970_v40 }
 0x91e   : > { %v6687_v17 = vpack.c.bf16 %v6684_v2, %v6684_v2  ;;  %v6702_v30 = vsel %vm6700_vm2, %v6686_v61, 0 }
 0x91f   : > { %8013 = vmatmul.mubr.msk.bf16.vlgmr.msra.gmra.mxu0 %vm6696_vm3, %v6689_v63 }
 0x920   : > { %7465 = vmatprep.subr.msk.bf16.mxu1 %vm6700_vm2, %v6687_v17  ;;  %8024 = vmatprep.mubr.msk.f32.mxu0 %vm8249_vm11, %v10970_v40 }
 0x921   : > { %6725 = vmatpush1.bf16.msra.mxu1 %v6702_v30  ;;  %8017 = vmatpush3.msra.mxu0 %v6843_v8 }
 0x922   : > { %7646 = vmatprep.subr.mxu1 %v6839_v60  ;;  %8018 = vmatprep.subr.mxu0 %v10970_v40 }
 0x923   : > { %8019 = vmatpush3.msra.mxu0 %v6842_v18 }
 0x924   : > { %7466 = vmatmul.mubr.msk.bf16.vlgmr.msra.gmra.mxu1 %vm6696_vm3, %v6689_v63  ;;  %8020 = vmatprep.subr.mxu0 %v10970_v40 }
 0x925   : > { %7647 = vmatpush3.msra.mxu1 %v6823_v6  ;;  %8021 = vmatpush3.msra.mxu0 %v6841_v56 }
 0x926   : > { %7648 = vmatprep.subr.mxu1 %v6838_v4  ;;  %8022 = vmatprep.subr.mxu0 %v10970_v40 }
 0x927   : > { %7649 = vmatpush3.msra.mxu1 %v6822_v48  ;;  %8023 = vmatpush3.msra.mxu0 %v6840_v13 }
 0x928   : > { %7650 = vmatprep.subr.mxu1 %v6837_v15 }
 0x929   : > { %7651 = vmatpush3.msra.mxu1 %v6821_v23 }
 0x92a   : > { %7652 = vmatprep.subr.mxu1 %v6836_v52 }
 0x92b   : > { %7653 = vmatpush3.msra.mxu1 %v6820_v53 }
 0x92c   : > { %7654 = vmatprep.subr.mxu1 %v6835_v43 }
 0x92d   : > { %7655 = vmatpush3.msra.mxu1 %v6819_v19 }
 0x92e   : > { %7656 = vmatprep.subr.mxu1 %v6834_v62 }
 0x92f   : > { %7657 = vmatpush3.msra.mxu1 %v6818_v45 }
 0x930   : > { %7658 = vmatprep.subr.mxu1 %v6833_v21 }
 0x931   : > { %7659 = vmatpush3.msra.mxu1 %v6817_v27 }
 0x932   : > { %7660 = vmatprep.subr.mxu1 %v6832_v59 }
 0x933   : > { %7661 = vmatpush3.msra.mxu1 %v6816_v58 }
 0x934   : > { %7662 = vmatprep.subr.mxu1 %v6831_v38 }
 0x935   : > { %7663 = vmatpush3.msra.mxu1 %v6815_v24 }
 0x936   : > { %7664 = vmatprep.subr.mxu1 %v6830_v0 }
 0x937   : > { %7665 = vmatpush3.msra.mxu1 %v6814_v5 }
 0x938   : > { %7666 = vmatprep.subr.mxu1 %v6829_v51 }
 0x939   : > { %7667 = vmatpush3.msra.mxu1 %v6813_v16 }
 0x93a   : > { %7668 = vmatprep.subr.mxu1 %v6828_v47 }
 0x93b   : > { %7669 = vmatpush3.msra.mxu1 %v6812_v39 }
 0x93c   : > { %7670 = vmatprep.subr.mxu1 %v6827_v42 }
 0x93d   : > { %7671 = vmatpush3.msra.mxu1 %v6811_v20 }
 0x93e   : > { %7672 = vmatprep.subr.mxu1 %v6826_v3 }
 0x93f   : > { %7673 = vmatpush3.msra.mxu1 %v6810_v10 }
 0x940   : > { %7674 = vmatprep.subr.mxu1 %v6825_v9 }
 0x941   : > { %7675 = vmatpush3.msra.mxu1 %v6809_v7 }
 0x942   : > { %7676 = vmatprep.subr.mxu1 %v6824_v46 }
 0x943   : > { %7677 = vmatpush3.msra.mxu1 %v6808_v25 }
 0x9df   : > { %v6785_v28 = vpop.f32.mrf.mxu0 }
 0x9e0   : > { %v10673_v57 = vadd.f32 %v6785_v28, %v6694_v49 }
 0x9e1   : > { %v8014_v29 = vpop.f32.mrf.mxu0 }
 0x9e2   : > { %v6794_v11 = vsel %vm6793_vm4, %v10673_v57, -inf }
 0x9e3   : > { %v6788_v22 = vpop.f32.mrf.mxu0 }
 0x9e4   : > { %v6744_v31 = vpop.f32.mrf.mxu1 }
 0x9e5   : > { %v10671_v34 = vadd.f32 %v6744_v31, %v6694_v49  ;;  %v8015_v26 = vpop.f32.mrf.mxu0 }
 0x9e6   : > { %v6746_v33 = vpop.f32.mrf.mxu1 }
 0x9e7   : > { %v10675_v44 = vadd.f32 %v6746_v33, %v6694_v49  ;;  %v6791_v36 = vsel %vm535_vm1, %v10671_v34, -inf }
 0x9e8   : > { %v6748_v32 = vpop.f32.mrf.mxu1 }
 0x9e9   : > { %v6792_v55 = vsel %vm535_vm1, %v10675_v44, -inf  ;;  %vm7002_vm1 = vcmask 15360  }
 0x9ea   : > { %v6795_v41 = vmax.f32 %v6791_v36, %v6792_v55  ;;  %v6749_v54 = vpop.f32.mrf.mxu1 }
 0x9ec   : > { %v6796_v14 = vmax.f32 %v6795_v41, %v6794_v11 }
 0x9ee   : > { %6797 = vmax.xlane.f32.xlu1 %v6796_v14 }
 0xa77   : > { %v6798_v40 = vpop.xlane.xlu1 %6797 }
 0xa78   : > { %v6799_v1 = vsub.f32 %v10671_v34, %v6798_v40  ;;  %v6800_v35 = vsub.f32 %v10675_v44, %v6798_v40  ;;  %v6801_v12 = vsub.f32 %v10673_v57, %v6798_v40 }
 0xa7a   : > { %v6802_v37 = vmul.f32 1.442695, %v6799_v1  ;;  %v6804_v50 = vmul.f32 1.442695, %v6800_v35  ;;  %v6806_v2 = vmul.f32 1.442695, %v6801_v12 }
 0xa7c   : > { %8167 = vpow2.f32 %v6802_v37 }
 0xa7d   : > { %8169 = vpow2.f32 %v6804_v50 }
 0xa7e   : > { %8171 = vpow2.f32 %v6806_v2 }
 0xa89   : > { %v8168_v63 = vpop.eup %8167 }
 0xa8a   : > { %v8170_v61 = vpop.eup %8169 }
 0xa8b   : > { %v8172_v17 = vpop.eup %8171  ;;  %6911 = vmatprep.mubr.f32.mxu1 %v8170_v61 }
 0xa8c   : > { %8025 = vmatmul.mubr.msk.f32.vlgmr.msra.gmra.mxu0 %vm4653_vm12, %v8172_v17  ;;  %6912 = vmatmul.mubr.f32.vlgmr.msra.gmra.mxu1 %v8168_v63 }
 0xb4c   : > { %v6983_v30 = vpop.f32.mrf.mxu0  ;;  %v7678_v60 = vpop.f32.mrf.mxu1 }
 0xb4e   : > { %v8026_v6 = vpop.f32.mrf.mxu0  ;;  %v7679_v4 = vpop.f32.mrf.mxu1 }
 0xb4f   : > { %v7680_v48 = vadd.f32 %v7679_v4, %v7678_v60 }
 0xb51   : > { %v6984_v15 = vadd.f32 %v7680_v48, %v6983_v30 }
 0xb53   : > { %6989 = vperm.xlu0 %8093, %v6984_v15  }
 0xbce   : > { %v6990_v23 = vpop.permute.xlu0 %6989 }
 0xbcf   : > { %8173 = vrcp.f32 %v6990_v23 }
 0xbdc   : > { %v8174_v52 = vpop.eup %8173 }
 0xbdd   : > { %v6993_v53 = vmul.f32 %v8174_v52, %v6984_v15 }
 0xbdf   : > { %6995 = vrot.lane.b32.xlu0 %v6993_v53, %s10932_s23  ;;  %v6998_v43 = vrot.slane %v6993_v53, 1  ;;  %s7008_s23 = scalar_lea.sflag [#allocation4], %s431_s22 }
 0xbe3   : > { %6999 = vrot.lane.b32.xlu0 %v6998_v43, %s8250_s15 }
 0xc51   : > { %v6996_v19 = vpop.permute.xlu0 %6995 }
 0xc55   : > { %v7000_v62 = vpop.permute.xlu0 %6999 }
 0xc56   : > { %v7003_v45 = vsel %vm7002_vm1, %v6996_v19, %v7000_v62 }
 0xc57   : > { %v7004_v21 = vmul.f32 0.00390625, %v7003_v45 }
 0xc59   : > { %7006 = vst.msk [vmem:[%s432_s27] sm:$0x1] %vm7005_vm5, %v7004_v21 }
 0xc5a   : > { %8188 = shalt.err (!%p8185_p3)
}
 0xc5b   : > { %s8189_s20 = scalar_lea.hbm %s7018_s0, 16  ;;  %s8193_s22 = scalar_lea.hbm %s10806_s13, 32 }
 0xc5c   : > { %p8190_p4 = scmp.ne.s32.totalorder %s7018_s0, %s8189_s20  ;;  %p8194_p9 = scmp.lt.s32.totalorder %s7018_s0, %s10806_s13 }
 0xc5d   : > { %p8195_p10 = scmp.lt.s32.totalorder %s8193_s22, %s8189_s20 }
 0xc5e   : > { %p8191_p7 = pnand %p8190_p4, %p8360_p5 }
 0xc5f   : > { %p8196_p11 = por %p8195_p10, %p8194_p9 }
 0xc60   : > { %p8192_p8 = pneg %p8191_p7 }
 0xc62   : > { %p8197_p12 = pnand %p8196_p11, %p8192_p8 }
 0xc64   : > { %8200 = shalt.err (!%p8197_p12)
}
 0xc65   : > { %8040 = dma.vmem_to_hbm [thread:$0]  (%p8360_p5), %s7021_s17, 16, %s7018_s0, %s7008_s23  }
 0xc66 PF: > { %p8046_p13 = scmp.ge.s32.totalorder %s8235_s28, 2  ;;  %s7032_s1 = sand.u32 1, %s8223_s25  }
 0xc67   : > { %s7033_s4 = scalar_lea.sflag [#allocation4], %s7032_s1 }
 0xc68   : > { %p8043_p0 = pnand %p8046_p13, %p8364_p6 }
 0xc6a   : > { %p8044_p1 = pneg %p8043_p0 }
 0xc6c   : > { %8218 = dma.done.wait (%p8044_p1), %s7033_s4, 16  }
 0xc6d   : > { %8220 = vsyncadd (%p8044_p1), %s7033_s4, 4294967280  ;;  %s10971_s16 = sld [smem:[#allocation6_spill]]  ;;  %p23_p2 = scmp.ge.s32.totalorder %s8347_s14, 4  }
 0xc6e   : > { %s10972_s27 = sld [smem:[#allocation7_spill]]  ;;  %s10973_s25 = smov %s8227_s26 }
 0xc6f   : > { %s10975_s28 = smov %s8347_s14  ;;  %25 = sbr.rel (!%p23_p2) target bundleno = 8 (0x8), region = 139 }
 0xc73   : > { %s10974_s26 = smov %s10971_s16 }
 0xc74   :  { %7037 = vsyncpa [#allocation4], 1 }
 0xc75   :  { %7039 = vsyncpa [#allocation4 + $0x1], 1 }

</bundles_post_ra>
